<compile_context>
chip_gen: v5e
topology: v5e:2x2
jax: 0.10.0
libtpu: 0.0.40
codegen_flags: <defaults>
</compile_context>

<pallas_src>
import functools

import jax
import jax.numpy as jnp
import numpy as np
from jax.experimental import pallas as pl
from jax.experimental.pallas import tpu as pltpu


# ---------------------------------------------------------------------------
# Helpers
# ---------------------------------------------------------------------------
def _round_up(v, m):
    return (v + m - 1) // m * m


def _full_spec(shape):
    shape = tuple(int(s) for s in shape)
    return pl.BlockSpec(shape, lambda *_: (0,) * len(shape))


def _param_layout(cfg):
    """Row layout of the packed parameter buffer (each entry 8-row aligned)."""
    K, N, H, RH, FH, OUT, KS = (cfg["K"], cfg["N"], cfg["H"], cfg["RH"],
                                cfg["FH"], cfg["OUT"], cfg["KSIZE"])
    entries = [
        ("conv_w", KS * K, K), ("conv_b", 1, K),
        ("fg_wl", N, 2 * N), ("fg_wr", N, 2 * N),
        ("fg_blin", 1, 2 * N), ("fg_a", 1, 2 * N), ("fg_bias", K, K),
        ("tg_wl", K, 2 * K), ("tg_wr", K, 2 * K),
        ("tg_blin", 1, 2 * K), ("tg_a", 1, 2 * K), ("tg_bias", N, N),
        ("wih_x", K, 3 * H), ("wih_f", K, 3 * H), ("wih_t", K, 3 * H),
        ("gru_whh", H, 3 * H), ("gru_bih_fold", 1, 3 * H), ("gru_bhh_n", 1, H),
        ("fc1_w", H, FH), ("fc1_b", 1, FH),
        ("fc2_w", FH, OUT), ("fc2_b", 1, OUT),
        ("rd_whh", RH, 3 * RH), ("rd_bhh_n", 1, RH),
        ("rfc_w", RH, OUT), ("rfc_b", 1, OUT),
    ]
    layout = {}
    row, max_c = 0, 0
    for name, r, c in entries:
        layout[name] = (row, r, c)
        row += _round_up(r, 8)
        max_c = max(max_c, c)
    return layout, _round_up(row, 8), _round_up(max(max_c, 128), 128)


# ---------------------------------------------------------------------------
# One-time (init-time) parameter packing -> 2 flat f32 buffers + static cfg.
# ---------------------------------------------------------------------------
def pack_params(p):
    p = {k: np.array(v, np.float32) for k, v in p.items()}
    K = p["conv_b"].shape[1]
    N = p["tg_bias"].shape[0]
    H = p["gru_whh"].shape[0]
    RH = p["rd_whh"].shape[0]
    FH = p["fc1_w"].shape[1]
    OUT = p["fc2_w"].shape[1]
    KS = p["conv_w_taps"].shape[0]
    GS = _round_up(3 * RH, 128)               # lane-aligned per-timestep stride
    H_pad = _round_up(H, 8)
    cfg = dict(K=K, N=N, H=H, RH=RH, FH=FH, OUT=OUT, KSIZE=KS, GS=GS, H_pad=H_pad)
    layout, total_rows, lane_w = _param_layout(cfg)
    cfg["layout"] = layout

    # Fold the hidden biases of the r/z gates into the hoisted input biases.
    # The n-gate hidden bias must stay inside r*(...) (exact PyTorch GRU).
    bih_fold = p["gru_bih"].copy()
    bih_fold[:, :2 * H] += p["gru_bhh"][:, :2 * H]
    bhh_n = p["gru_bhh"][:, 2 * H:]
    rd_bih_fold = p["rd_bih"].copy()
    rd_bih_fold[:, :2 * RH] += p["rd_bhh"][:, :2 * RH]
    rd_bhh_n = p["rd_bhh"][:, 2 * RH:]

    wih = p["gru_wih"]                        # (3K, 3H), rows = [xc | h_feat | h_temp]
    vals = {
        "conv_w": p["conv_w_taps"].reshape(KS * K, K),
        "conv_b": p["conv_b"],
        "fg_wl": p["fg_wl"], "fg_wr": p["fg_wr"],
        "fg_blin": p["fg_blin"], "fg_a": p["fg_a"], "fg_bias": p["fg_bias"],
        "tg_wl": p["tg_wl"], "tg_wr": p["tg_wr"],
        "tg_blin": p["tg_blin"], "tg_a": p["tg_a"], "tg_bias": p["tg_bias"],
        "wih_x": wih[:K], "wih_f": wih[K:2 * K], "wih_t": wih[2 * K:],
        "gru_whh": p["gru_whh"], "gru_bih_fold": bih_fold, "gru_bhh_n": bhh_n,
        "fc1_w": p["fc1_w"], "fc1_b": p["fc1_b"],
        "fc2_w": p["fc2_w"], "fc2_b": p["fc2_b"],
        "rd_whh": p["rd_whh"], "rd_bhh_n": rd_bhh_n,
        "rfc_w": p["rfc_w"], "rfc_b": p["rfc_b"],
    }
    w_buf = np.zeros((total_rows, lane_w), np.float32)
    for name, (r0, r, c) in layout.items():
        w_buf[r0:r0 + r, :c] = vals[name]

    # Decoder projection: fold repeat_interleave(window)+view quirk and the
    # decoder input weight (+ its folded bias) into one (H_pad+8, N*GS) buffer.
    src = (np.arange(N)[:, None] * H + np.arange(H)[None, :]) // N          # (N, H)
    sel = (src[:, :, None] == np.arange(H)[None, None, :]).astype(np.float32)
    w_all = np.einsum("tcj,cg->tjg", sel, p["rd_wih"])                      # (N, H, 3RH)
    wdec_buf = np.zeros((H_pad + 8, N * GS), np.float32)
    for t in range(N):
        wdec_buf[:H, t * GS:t * GS + 3 * RH] = w_all[t]
        wdec_buf[H_pad, t * GS:t * GS + 3 * RH] = rd_bih_fold[0]
    return jnp.asarray(w_buf), jnp.asarray(wdec_buf), cfg


# ---------------------------------------------------------------------------
# Fused kernel: the whole MTAD-GAT forward for the full (tiny) batch.
# ---------------------------------------------------------------------------
def mtad_gat_fused_kernel(xp_ref, w_ref, wdec_ref, preds_ref, recons_ref, *,
                          alpha, cfg):
    B = xp_ref.shape[0]
    K = xp_ref.shape[2]
    N = recons_ref.shape[1]
    H, RH, OUT = cfg["H"], cfg["RH"], cfg["OUT"]
    KS, GS, H_pad = cfg["KSIZE"], cfg["GS"], cfg["H_pad"]
    layout = cfg["layout"]
    f32 = jnp.float32

    def mm(a, b):
        return jnp.dot(a, b, preferred_element_type=jnp.float32)

    def leaky(v):
        return jnp.where(v >= 0, v, alpha * v)

    def get(name):
        r0, r, c = layout[name]
        return w_ref[r0:r0 + r, 0:c]

    def bt(x3):
        # (B, P, Q) -> (B, Q, P); B is tiny & static, 2-D transposes are cheap.
        return jnp.stack([x3[b].T for b in range(x3.shape[0])], axis=0)

    # ---- unpack parameters (static slices of the packed buffer) -----------
    conv_w, conv_b = get("conv_w"), get("conv_b")
    fg_wl, fg_wr = get("fg_wl"), get("fg_wr")
    fg_blin, fg_a, fg_bias = get("fg_blin"), get("fg_a"), get("fg_bias")
    tg_wl, tg_wr = get("tg_wl"), get("tg_wr")
    tg_blin, tg_a, tg_bias = get("tg_blin"), get("tg_a"), get("tg_bias")
    wih_x, wih_f, wih_t = get("wih_x"), get("wih_f"), get("wih_t")
    whh, bih_fold, bhh_n = get("gru_whh"), get("gru_bih_fold"), get("gru_bhh_n")
    fc1_w, fc1_b = get("fc1_w"), get("fc1_b")
    fc2_w, fc2_b = get("fc2_w"), get("fc2_b")
    rd_whh, rd_bhh_n = get("rd_whh"), get("rd_bhh_n")
    rfc_w, rfc_b = get("rfc_w"), get("rfc_b")

    xp = xp_ref[...]                                       # (B, N+KS-1, K)

    # ---- stage 1: conv over time + ReLU (batch folded into rows) ----------
    acc = jnp.zeros((B * N, K), f32)
    for j in range(KS):                                    # static conv taps
        xj = xp[:, j:j + N, :].reshape(B * N, K)
        acc = acc + mm(xj, conv_w[j * K:(j + 1) * K, :])
    xc_flat = jnp.maximum(acc + conv_b, 0.0)               # (B*N, K)
    xc = xc_flat.reshape(B, N, K)
    v_feat = bt(xc)                                        # (B, K, N)
    vf_flat = v_feat.reshape(B * K, N)

    # ---- stage 2: feature-oriented GATv2 (nodes = features) ---------------
    lf = mm(vf_flat, fg_wl).reshape(B, K, 2 * N)
    rf = mm(vf_flat, fg_wr).reshape(B, K, 2 * N)
    pre_f = lf[:, :, None, :] + rf[:, None, :, :] + fg_blin           # (B,K,K,2N)
    e_f = jnp.sum(leaky(pre_f) * fg_a, axis=-1) + fg_bias             # (B,K,K)
    e_f = e_f - jnp.max(e_f, axis=-1, keepdims=True)
    p_f = jnp.exp(e_f)
    attn_f = p_f * pl.reciprocal(jnp.sum(p_f, axis=-1, keepdims=True),
                                 approx=True)
    h_feat_t = jax.nn.sigmoid(
        jnp.einsum("bij,bjd->bid", attn_f, v_feat,
                   preferred_element_type=jnp.float32))               # (B,K,N)
    hf_flat = bt(h_feat_t).reshape(B * N, K)                          # (B*N, K)

    # ---- stage 3: temporal-oriented GATv2 (nodes = timestamps) ------------
    lt = mm(xc_flat, tg_wl).reshape(B, N, 2 * K)
    rt = mm(xc_flat, tg_wr).reshape(B, N, 2 * K)
    pre_t = lt[:, :, None, :] + rt[:, None, :, :] + tg_blin           # (B,N,N,2K)
    e_t = jnp.sum(leaky(pre_t) * tg_a, axis=-1) + tg_bias             # (B,N,N)
    e_t = e_t - jnp.max(e_t, axis=-1, keepdims=True)
    p_t = jnp.exp(e_t)
    attn_t = p_t * pl.reciprocal(jnp.sum(p_t, axis=-1, keepdims=True),
                                 approx=True)
    h_temp = jax.nn.sigmoid(
        jnp.einsum("bij,bjd->bid", attn_t, xc,
                   preferred_element_type=jnp.float32))               # (B,N,K)
    ht_flat = h_temp.reshape(B * N, K)

    # ---- stage 4: forecasting GRU (input projection hoisted, SSA gx) ------
    gx_flat = (mm(xc_flat, wih_x) + mm(hf_flat, wih_f) + mm(ht_flat, wih_t)
               + bih_fold)                                            # (B*N, 3H)
    gx = gx_flat.reshape(B, N, 3 * H)
    h = jnp.zeros((B, H), f32)
    for t in range(N):                                                # static, tiny
        gxt = gx[:, t, :]
        gh = mm(h, whh)
        r = jax.nn.sigmoid(gxt[:, :H] + gh[:, :H])
        z = jax.nn.sigmoid(gxt[:, H:2 * H] + gh[:, H:2 * H])
        c = jnp.tanh(gxt[:, 2 * H:] + r * (gh[:, 2 * H:] + bhh_n))
        h = (1.0 - z) * c + z * h                                     # (B, H)

    # ---- stage 5: forecasting MLP ------------------------------------------
    hid = jnp.maximum(mm(h, fc1_w) + fc1_b, 0.0)
    preds_ref[...] = mm(hid, fc2_w) + fc2_b

    # ---- stage 6: reconstruction decoder GRU (proj + bias hoisted) --------
    gxd_all = mm(h, wdec_ref[0:H, :]) + wdec_ref[H_pad:H_pad + 1, :]  # (B, N*GS)
    hd = jnp.zeros((B, RH), f32)
    hs = []
    for t in range(N):                                                # static, tiny
        gxd = gxd_all[:, t * GS:t * GS + 3 * RH]
        ghd = mm(hd, rd_whh)
        r = jax.nn.sigmoid(gxd[:, :RH] + ghd[:, :RH])
        z = jax.nn.sigmoid(gxd[:, RH:2 * RH] + ghd[:, RH:2 * RH])
        c = jnp.tanh(gxd[:, 2 * RH:] + r * (ghd[:, 2 * RH:] + rd_bhh_n))
        hd = (1.0 - z) * c + z * hd                                   # (B, RH)
        hs.append(hd)
    dec = jnp.stack(hs, axis=1).reshape(B * N, RH)
    recons_ref[...] = (mm(dec, rfc_w) + rfc_b).reshape(B, N, OUT)


# ---------------------------------------------------------------------------
# Wrapper: per-call work is just padding x and one pallas_call (3 input DMAs).
# ---------------------------------------------------------------------------
def mtad_gat_forward(w_buf, wdec_buf, x, *, cfg, alpha=0.2):
    b_sz, n_win, _ = x.shape
    pad = (cfg["KSIZE"] - 1) // 2
    xp = jnp.pad(x, ((0, 0), (pad, pad), (0, 0)))
    out_dim = cfg["OUT"]
    kernel = functools.partial(mtad_gat_fused_kernel, alpha=alpha, cfg=cfg)
    inputs = (xp, w_buf, wdec_buf)
    preds, recons = pl.pallas_call(
        kernel,
        out_shape=(jax.ShapeDtypeStruct((b_sz, out_dim), jnp.float32),
                   jax.ShapeDtypeStruct((b_sz, n_win, out_dim), jnp.float32)),
        grid=(1,),
        in_specs=[_full_spec(a.shape) for a in inputs],
        out_specs=(_full_spec((b_sz, out_dim)),
                   _full_spec((b_sz, n_win, out_dim))),
        compiler_params=pltpu.CompilerParams(dimension_semantics=("arbitrary",)),
    )(*inputs)
    return preds, recons


# ---------------------------------------------------------------------------
# Deterministic parameter initialization (shapes follow the PyTorch module)
# ---------------------------------------------------------------------------
def init_params(key, n_features, window_size, out_dim, kernel_size=7,
                gru_hid=32, forecast_hid=32, recon_hid=32):
    k, n = n_features, window_size
    keys = iter(jax.random.split(key, 40))

    def rnd(shape, scale=0.1):
        return (scale * jax.random.normal(next(keys), shape)).astype(jnp.float32)

    p = {}
    conv_w = rnd((k, k, kernel_size))
    p["conv_w_taps"] = jnp.transpose(conv_w, (2, 1, 0))      # (ksize, K_in, K_out)
    p["conv_b"] = rnd((1, k))
    e_f = 2 * n
    fg_w = rnd((e_f, 2 * n))
    p["fg_wl"] = jnp.transpose(fg_w[:, :n])
    p["fg_wr"] = jnp.transpose(fg_w[:, n:])
    p["fg_blin"] = rnd((1, e_f))
    p["fg_a"] = rnd((1, e_f))
    p["fg_bias"] = rnd((k, k))
    e_t = 2 * k
    tg_w = rnd((e_t, 2 * k))
    p["tg_wl"] = jnp.transpose(tg_w[:, :k])
    p["tg_wr"] = jnp.transpose(tg_w[:, k:])
    p["tg_blin"] = rnd((1, e_t))
    p["tg_a"] = rnd((1, e_t))
    p["tg_bias"] = rnd((n, n))
    h = gru_hid
    p["gru_wih"] = jnp.transpose(rnd((3 * h, 3 * k)))        # (3K, 3H)
    p["gru_whh"] = jnp.transpose(rnd((3 * h, h)))            # (H, 3H)
    p["gru_bih"] = rnd((1, 3 * h))
    p["gru_bhh"] = rnd((1, 3 * h))
    p["fc1_w"] = jnp.transpose(rnd((forecast_hid, h)))
    p["fc1_b"] = rnd((1, forecast_hid))
    p["fc2_w"] = jnp.transpose(rnd((out_dim, forecast_hid)))
    p["fc2_b"] = rnd((1, out_dim))
    rh = recon_hid
    p["rd_wih"] = jnp.transpose(rnd((3 * rh, h)))            # (H, 3RH)
    p["rd_whh"] = jnp.transpose(rnd((3 * rh, rh)))           # (RH, 3RH)
    p["rd_bih"] = rnd((1, 3 * rh))
    p["rd_bhh"] = rnd((1, 3 * rh))
    p["rfc_w"] = jnp.transpose(rnd((out_dim, rh)))
    p["rfc_b"] = rnd((1, out_dim))
    return p


# ---------------------------------------------------------------------------
# Pure-JAX reference (same math, no Pallas) for a sanity check
# ---------------------------------------------------------------------------
def reference_forward(params, x, *, alpha=0.2):
    b_sz, n, k = x.shape
    ksize = params["conv_w_taps"].shape[0]
    pad = (ksize - 1) // 2
    xp = jnp.pad(x, ((0, 0), (pad, pad), (0, 0)))
    acc = jnp.zeros((b_sz, n, k), jnp.float32)
    for j in range(ksize):
        acc = acc + jnp.einsum("bni,io->bno", xp[:, j:j + n, :], params["conv_w_taps"][j])
    xc = jnp.maximum(acc + params["conv_b"], 0.0)

    def gat_ref(v, wl, wr, blin, a, bmat):
        left = v @ wl
        right = v @ wr
        pre = left[:, :, None, :] + right[:, None, :, :] + blin
        z = jnp.where(pre >= 0, pre, alpha * pre)
        e = jnp.sum(z * a, axis=-1) + bmat
        e = e - jnp.max(e, axis=-1, keepdims=True)
        p_ = jnp.exp(e)
        attn = p_ / jnp.sum(p_, axis=-1, keepdims=True)
        return jax.nn.sigmoid(jnp.einsum("bij,bjd->bid", attn, v))

    v_feat = jnp.transpose(xc, (0, 2, 1))
    h_feat = jnp.transpose(
        gat_ref(v_feat, params["fg_wl"], params["fg_wr"], params["fg_blin"],
                params["fg_a"], params["fg_bias"]), (0, 2, 1))
    h_temp = gat_ref(xc, params["tg_wl"], params["tg_wr"], params["tg_blin"],
                     params["tg_a"], params["tg_bias"])
    h_cat = jnp.concatenate([xc, h_feat, h_temp], axis=2)

    def gru_ref(xseq, wih, whh, bih, bhh):
        bb, tt, _ = xseq.shape
        hh = whh.shape[0]
        hcur = jnp.zeros((bb, hh), jnp.float32)
        outs = []
        for t in range(tt):
            gx = xseq[:, t, :] @ wih + bih
            gh = hcur @ whh + bhh
            r = jax.nn.sigmoid(gx[:, :hh] + gh[:, :hh])
            zg = jax.nn.sigmoid(gx[:, hh:2 * hh] + gh[:, hh:2 * hh])
            ng = jnp.tanh(gx[:, 2 * hh:] + r * gh[:, 2 * hh:])
            hcur = (1.0 - zg) * ng + zg * hcur
            outs.append(hcur)
        return jnp.stack(outs, axis=1)

    gru_out = gru_ref(h_cat, params["gru_wih"], params["gru_whh"],
                      params["gru_bih"], params["gru_bhh"])
    h_end = gru_out[:, -1, :]
    preds = (jnp.maximum(h_end @ params["fc1_w"] + params["fc1_b"], 0.0)
             @ params["fc2_w"] + params["fc2_b"])
    h_dim = h_end.shape[1]
    h_rep = jnp.repeat(h_end, n, axis=1).reshape(b_sz, n, h_dim)
    dec_out = gru_ref(h_rep, params["rd_wih"], params["rd_whh"],
                      params["rd_bih"], params["rd_bhh"])
    recons = dec_out @ params["rfc_w"] + params["rfc_b"]
    return preds, recons


# ---------------------------------------------------------------------------
if __name__ == "__main__":
    B, K, N, OUT = 2, 4, 8, 4          # batch, n_features, window_size, out_dim
    key = jax.random.PRNGKey(0)
    k_x, k_p = jax.random.split(key)
    x = jax.random.normal(k_x, (B, N, K), dtype=jnp.float32)
    params = init_params(k_p, n_features=K, window_size=N, out_dim=OUT,
                         kernel_size=7, gru_hid=32, forecast_hid=32, recon_hid=32)

    # One-time packing (hoisted out of the per-call path).
    w_buf, wdec_buf, cfg = pack_params(params)

    fwd = jax.jit(functools.partial(mtad_gat_forward, cfg=cfg))
    preds, recons = fwd(w_buf, wdec_buf, x)
    jax.block_until_ready((preds, recons))

    preds_ref, recons_ref = reference_forward(params, x)
    assert preds.shape == (B, OUT) and recons.shape == (B, N, OUT)
    ok = (np.allclose(np.asarray(preds), np.asarray(preds_ref), rtol=5e-3, atol=5e-3)
          and np.allclose(np.asarray(recons), np.asarray(recons_ref), rtol=5e-3, atol=5e-3))
    if not ok:
        raise AssertionError("Pallas output mismatch vs pure-JAX reference")
    print("KERNEL_OK")
</pallas_src>

<mosaic_0001>
module attributes {stable_mosaic.version = 11 : i64} {
  func.func @mtad_gat_fused_kernel(%arg0: i32, %arg1: memref<2x14x4xf32, #tpu.memory_space<vmem>>, %arg2: memref<352x128xf32, #tpu.memory_space<vmem>>, %arg3: memref<40x1024xf32, #tpu.memory_space<vmem>>, %arg4: memref<2x4xf32, #tpu.memory_space<vmem>>, %arg5: memref<2x8x4xf32, #tpu.memory_space<vmem>>) attributes {dimension_semantics = [#tpu.dimension_semantics<arbitrary>], iteration_bounds = array<i64: 1>, scalar_prefetch = 0 : i64, scratch_operands = 0 : i64, tpu.core_type = #tpu.core_type<tc>, window_params = [{pipeline_mode = #tpu.pipeline_mode<synchronous>, transform_indices = @transform_0, window_bounds = array<i64: 2, 14, 4>}, {pipeline_mode = #tpu.pipeline_mode<synchronous>, transform_indices = @transform_1, window_bounds = array<i64: 352, 128>}, {pipeline_mode = #tpu.pipeline_mode<synchronous>, transform_indices = @transform_2, window_bounds = array<i64: 40, 1024>}, {pipeline_mode = #tpu.pipeline_mode<synchronous>, transform_indices = @transform_3, window_bounds = array<i64: 2, 4>}, {pipeline_mode = #tpu.pipeline_mode<synchronous>, transform_indices = @transform_4, window_bounds = array<i64: 2, 8, 4>}]} {
    %c0 = arith.constant 0 : index
    %c0_0 = arith.constant 0 : index
    %0 = vector.load %arg2[%c0, %c0_0] : memref<352x128xf32, #tpu.memory_space<vmem>>, vector<28x4xf32>
    %c32 = arith.constant 32 : index
    %c0_1 = arith.constant 0 : index
    %1 = vector.load %arg2[%c32, %c0_1] : memref<352x128xf32, #tpu.memory_space<vmem>>, vector<1x4xf32>
    %c40 = arith.constant 40 : index
    %c0_2 = arith.constant 0 : index
    %2 = vector.load %arg2[%c40, %c0_2] : memref<352x128xf32, #tpu.memory_space<vmem>>, vector<8x16xf32>
    %c48 = arith.constant 48 : index
    %c0_3 = arith.constant 0 : index
    %3 = vector.load %arg2[%c48, %c0_3] : memref<352x128xf32, #tpu.memory_space<vmem>>, vector<8x16xf32>
    %c56 = arith.constant 56 : index
    %c0_4 = arith.constant 0 : index
    %4 = vector.load %arg2[%c56, %c0_4] : memref<352x128xf32, #tpu.memory_space<vmem>>, vector<1x16xf32>
    %c64 = arith.constant 64 : index
    %c0_5 = arith.constant 0 : index
    %5 = vector.load %arg2[%c64, %c0_5] : memref<352x128xf32, #tpu.memory_space<vmem>>, vector<1x16xf32>
    %c72 = arith.constant 72 : index
    %c0_6 = arith.constant 0 : index
    %6 = vector.load %arg2[%c72, %c0_6] : memref<352x128xf32, #tpu.memory_space<vmem>>, vector<4x4xf32>
    %c80 = arith.constant 80 : index
    %c0_7 = arith.constant 0 : index
    %7 = vector.load %arg2[%c80, %c0_7] : memref<352x128xf32, #tpu.memory_space<vmem>>, vector<4x8xf32>
    %c88 = arith.constant 88 : index
    %c0_8 = arith.constant 0 : index
    %8 = vector.load %arg2[%c88, %c0_8] : memref<352x128xf32, #tpu.memory_space<vmem>>, vector<4x8xf32>
    %c96 = arith.constant 96 : index
    %c0_9 = arith.constant 0 : index
    %9 = vector.load %arg2[%c96, %c0_9] : memref<352x128xf32, #tpu.memory_space<vmem>>, vector<1x8xf32>
    %c104 = arith.constant 104 : index
    %c0_10 = arith.constant 0 : index
    %10 = vector.load %arg2[%c104, %c0_10] : memref<352x128xf32, #tpu.memory_space<vmem>>, vector<1x8xf32>
    %c112 = arith.constant 112 : index
    %c0_11 = arith.constant 0 : index
    %11 = vector.load %arg2[%c112, %c0_11] : memref<352x128xf32, #tpu.memory_space<vmem>>, vector<8x8xf32>
    %c120 = arith.constant 120 : index
    %c0_12 = arith.constant 0 : index
    %12 = vector.load %arg2[%c120, %c0_12] : memref<352x128xf32, #tpu.memory_space<vmem>>, vector<4x96xf32>
    %c128 = arith.constant 128 : index
    %c0_13 = arith.constant 0 : index
    %13 = vector.load %arg2[%c128, %c0_13] : memref<352x128xf32, #tpu.memory_space<vmem>>, vector<4x96xf32>
    %c136 = arith.constant 136 : index
    %c0_14 = arith.constant 0 : index
    %14 = vector.load %arg2[%c136, %c0_14] : memref<352x128xf32, #tpu.memory_space<vmem>>, vector<4x96xf32>
    %c144 = arith.constant 144 : index
    %c0_15 = arith.constant 0 : index
    %15 = vector.load %arg2[%c144, %c0_15] : memref<352x128xf32, #tpu.memory_space<vmem>>, vector<32x96xf32>
    %c176 = arith.constant 176 : index
    %c0_16 = arith.constant 0 : index
    %16 = vector.load %arg2[%c176, %c0_16] : memref<352x128xf32, #tpu.memory_space<vmem>>, vector<1x96xf32>
    %c184 = arith.constant 184 : index
    %c0_17 = arith.constant 0 : index
    %17 = vector.load %arg2[%c184, %c0_17] : memref<352x128xf32, #tpu.memory_space<vmem>>, vector<1x32xf32>
    %c192 = arith.constant 192 : index
    %c0_18 = arith.constant 0 : index
    %18 = vector.load %arg2[%c192, %c0_18] : memref<352x128xf32, #tpu.memory_space<vmem>>, vector<32x32xf32>
    %c224 = arith.constant 224 : index
    %c0_19 = arith.constant 0 : index
    %19 = vector.load %arg2[%c224, %c0_19] : memref<352x128xf32, #tpu.memory_space<vmem>>, vector<1x32xf32>
    %c232 = arith.constant 232 : index
    %c0_20 = arith.constant 0 : index
    %20 = vector.load %arg2[%c232, %c0_20] : memref<352x128xf32, #tpu.memory_space<vmem>>, vector<32x4xf32>
    %c264 = arith.constant 264 : index
    %c0_21 = arith.constant 0 : index
    %21 = vector.load %arg2[%c264, %c0_21] : memref<352x128xf32, #tpu.memory_space<vmem>>, vector<1x4xf32>
    %c272 = arith.constant 272 : index
    %c0_22 = arith.constant 0 : index
    %22 = vector.load %arg2[%c272, %c0_22] : memref<352x128xf32, #tpu.memory_space<vmem>>, vector<32x96xf32>
    %c304 = arith.constant 304 : index
    %c0_23 = arith.constant 0 : index
    %23 = vector.load %arg2[%c304, %c0_23] : memref<352x128xf32, #tpu.memory_space<vmem>>, vector<1x32xf32>
    %c312 = arith.constant 312 : index
    %c0_24 = arith.constant 0 : index
    %24 = vector.load %arg2[%c312, %c0_24] : memref<352x128xf32, #tpu.memory_space<vmem>>, vector<32x4xf32>
    %c344 = arith.constant 344 : index
    %c0_25 = arith.constant 0 : index
    %25 = vector.load %arg2[%c344, %c0_25] : memref<352x128xf32, #tpu.memory_space<vmem>>, vector<1x4xf32>
    %c0_26 = arith.constant 0 : index
    %c0_27 = arith.constant 0 : index
    %c0_28 = arith.constant 0 : index
    %26 = vector.load %arg1[%c0_26, %c0_27, %c0_28] : memref<2x14x4xf32, #tpu.memory_space<vmem>>, vector<2x14x4xf32>
    %cst = arith.constant 0.000000e+00 : f32
    %27 = vector.broadcast %cst : f32 to vector<16x4xf32>
    %28 = vector.extract_strided_slice %26 {offsets = [0, 0, 0], sizes = [2, 8, 4], strides = [1, 1, 1]} : vector<2x14x4xf32> to vector<2x8x4xf32>
    %29 = vector.shape_cast %28 : vector<2x8x4xf32> to vector<16x4xf32>
    %30 = vector.extract_strided_slice %0 {offsets = [0, 0], sizes = [4, 4], strides = [1, 1]} : vector<28x4xf32> to vector<4x4xf32>
    %cst_29 = arith.constant dense<0.000000e+00> : vector<16x4xf32>
    %31 = tpu.matmul %29, %30, %cst_29 {dimension_numbers = #tpu.dot_dimension_numbers<[1], [0], [0], [1], [0, 0, 1, 1], [], []>} : vector<16x4xf32>, vector<4x4xf32>, vector<16x4xf32> -> vector<16x4xf32>
    %32 = arith.addf %27, %31 : vector<16x4xf32>
    %33 = vector.extract_strided_slice %26 {offsets = [0, 1, 0], sizes = [2, 8, 4], strides = [1, 1, 1]} : vector<2x14x4xf32> to vector<2x8x4xf32>
    %34 = vector.shape_cast %33 : vector<2x8x4xf32> to vector<16x4xf32>
    %35 = vector.extract_strided_slice %0 {offsets = [4, 0], sizes = [4, 4], strides = [1, 1]} : vector<28x4xf32> to vector<4x4xf32>
    %cst_30 = arith.constant dense<0.000000e+00> : vector<16x4xf32>
    %36 = tpu.matmul %34, %35, %cst_30 {dimension_numbers = #tpu.dot_dimension_numbers<[1], [0], [0], [1], [0, 0, 1, 1], [], []>} : vector<16x4xf32>, vector<4x4xf32>, vector<16x4xf32> -> vector<16x4xf32>
    %37 = arith.addf %32, %36 : vector<16x4xf32>
    %38 = vector.extract_strided_slice %26 {offsets = [0, 2, 0], sizes = [2, 8, 4], strides = [1, 1, 1]} : vector<2x14x4xf32> to vector<2x8x4xf32>
    %39 = vector.shape_cast %38 : vector<2x8x4xf32> to vector<16x4xf32>
    %40 = vector.extract_strided_slice %0 {offsets = [8, 0], sizes = [4, 4], strides = [1, 1]} : vector<28x4xf32> to vector<4x4xf32>
    %cst_31 = arith.constant dense<0.000000e+00> : vector<16x4xf32>
    %41 = tpu.matmul %39, %40, %cst_31 {dimension_numbers = #tpu.dot_dimension_numbers<[1], [0], [0], [1], [0, 0, 1, 1], [], []>} : vector<16x4xf32>, vector<4x4xf32>, vector<16x4xf32> -> vector<16x4xf32>
    %42 = arith.addf %37, %41 : vector<16x4xf32>
    %43 = vector.extract_strided_slice %26 {offsets = [0, 3, 0], sizes = [2, 8, 4], strides = [1, 1, 1]} : vector<2x14x4xf32> to vector<2x8x4xf32>
    %44 = vector.shape_cast %43 : vector<2x8x4xf32> to vector<16x4xf32>
    %45 = vector.extract_strided_slice %0 {offsets = [12, 0], sizes = [4, 4], strides = [1, 1]} : vector<28x4xf32> to vector<4x4xf32>
    %cst_32 = arith.constant dense<0.000000e+00> : vector<16x4xf32>
    %46 = tpu.matmul %44, %45, %cst_32 {dimension_numbers = #tpu.dot_dimension_numbers<[1], [0], [0], [1], [0, 0, 1, 1], [], []>} : vector<16x4xf32>, vector<4x4xf32>, vector<16x4xf32> -> vector<16x4xf32>
    %47 = arith.addf %42, %46 : vector<16x4xf32>
    %48 = vector.extract_strided_slice %26 {offsets = [0, 4, 0], sizes = [2, 8, 4], strides = [1, 1, 1]} : vector<2x14x4xf32> to vector<2x8x4xf32>
    %49 = vector.shape_cast %48 : vector<2x8x4xf32> to vector<16x4xf32>
    %50 = vector.extract_strided_slice %0 {offsets = [16, 0], sizes = [4, 4], strides = [1, 1]} : vector<28x4xf32> to vector<4x4xf32>
    %cst_33 = arith.constant dense<0.000000e+00> : vector<16x4xf32>
    %51 = tpu.matmul %49, %50, %cst_33 {dimension_numbers = #tpu.dot_dimension_numbers<[1], [0], [0], [1], [0, 0, 1, 1], [], []>} : vector<16x4xf32>, vector<4x4xf32>, vector<16x4xf32> -> vector<16x4xf32>
    %52 = arith.addf %47, %51 : vector<16x4xf32>
    %53 = vector.extract_strided_slice %26 {offsets = [0, 5, 0], sizes = [2, 8, 4], strides = [1, 1, 1]} : vector<2x14x4xf32> to vector<2x8x4xf32>
    %54 = vector.shape_cast %53 : vector<2x8x4xf32> to vector<16x4xf32>
    %55 = vector.extract_strided_slice %0 {offsets = [20, 0], sizes = [4, 4], strides = [1, 1]} : vector<28x4xf32> to vector<4x4xf32>
    %cst_34 = arith.constant dense<0.000000e+00> : vector<16x4xf32>
    %56 = tpu.matmul %54, %55, %cst_34 {dimension_numbers = #tpu.dot_dimension_numbers<[1], [0], [0], [1], [0, 0, 1, 1], [], []>} : vector<16x4xf32>, vector<4x4xf32>, vector<16x4xf32> -> vector<16x4xf32>
    %57 = arith.addf %52, %56 : vector<16x4xf32>
    %58 = vector.extract_strided_slice %26 {offsets = [0, 6, 0], sizes = [2, 8, 4], strides = [1, 1, 1]} : vector<2x14x4xf32> to vector<2x8x4xf32>
    %59 = vector.shape_cast %58 : vector<2x8x4xf32> to vector<16x4xf32>
    %60 = vector.extract_strided_slice %0 {offsets = [24, 0], sizes = [4, 4], strides = [1, 1]} : vector<28x4xf32> to vector<4x4xf32>
    %cst_35 = arith.constant dense<0.000000e+00> : vector<16x4xf32>
    %61 = tpu.matmul %59, %60, %cst_35 {dimension_numbers = #tpu.dot_dimension_numbers<[1], [0], [0], [1], [0, 0, 1, 1], [], []>} : vector<16x4xf32>, vector<4x4xf32>, vector<16x4xf32> -> vector<16x4xf32>
    %62 = arith.addf %57, %61 : vector<16x4xf32>
    %63 = vector.broadcast %1 : vector<1x4xf32> to vector<16x4xf32>
    %64 = arith.addf %62, %63 : vector<16x4xf32>
    %cst_36 = arith.constant 0.000000e+00 : f32
    %65 = vector.broadcast %cst_36 : f32 to vector<16x4xf32>
    %66 = arith.maximumf %64, %65 : vector<16x4xf32>
    %67 = vector.shape_cast %66 : vector<16x4xf32> to vector<2x8x4xf32>
    %68 = vector.extract_strided_slice %67 {offsets = [0, 0, 0], sizes = [1, 8, 4], strides = [1, 1, 1]} : vector<2x8x4xf32> to vector<1x8x4xf32>
    %69 = vector.shape_cast %68 : vector<1x8x4xf32> to vector<8x4xf32>
    %70 = tpu.transpose %69, [1, 0] : vector<8x4xf32> -> vector<4x8xf32>
    %71 = vector.extract_strided_slice %67 {offsets = [1, 0, 0], sizes = [1, 8, 4], strides = [1, 1, 1]} : vector<2x8x4xf32> to vector<1x8x4xf32>
    %72 = vector.shape_cast %71 : vector<1x8x4xf32> to vector<8x4xf32>
    %73 = tpu.transpose %72, [1, 0] : vector<8x4xf32> -> vector<4x8xf32>
    %74 = vector.shape_cast %70 : vector<4x8xf32> to vector<1x4x8xf32>
    %75 = vector.shape_cast %73 : vector<4x8xf32> to vector<1x4x8xf32>
    %76 = tpu.concatenate %74, %75 in 0 : vector<1x4x8xf32>, vector<1x4x8xf32> -> vector<2x4x8xf32>
    %77 = vector.shape_cast %76 : vector<2x4x8xf32> to vector<8x8xf32>
    %cst_37 = arith.constant dense<0.000000e+00> : vector<8x16xf32>
    %78 = tpu.matmul %77, %2, %cst_37 {dimension_numbers = #tpu.dot_dimension_numbers<[1], [0], [0], [1], [0, 0, 1, 1], [], []>} : vector<8x8xf32>, vector<8x16xf32>, vector<8x16xf32> -> vector<8x16xf32>
    %79 = vector.shape_cast %78 : vector<8x16xf32> to vector<2x4x16xf32>
    %cst_38 = arith.constant dense<0.000000e+00> : vector<8x16xf32>
    %80 = tpu.matmul %77, %3, %cst_38 {dimension_numbers = #tpu.dot_dimension_numbers<[1], [0], [0], [1], [0, 0, 1, 1], [], []>} : vector<8x8xf32>, vector<8x16xf32>, vector<8x16xf32> -> vector<8x16xf32>
    %81 = vector.shape_cast %80 : vector<8x16xf32> to vector<2x4x16xf32>
    %82 = vector.shape_cast %79 : vector<2x4x16xf32> to vector<2x4x1x16xf32>
    %83 = vector.shape_cast %81 : vector<2x4x16xf32> to vector<2x1x4x16xf32>
    %84 = vector.broadcast %82 : vector<2x4x1x16xf32> to vector<2x4x4x16xf32>
    %85 = vector.broadcast %83 : vector<2x1x4x16xf32> to vector<2x4x4x16xf32>
    %86 = arith.addf %84, %85 : vector<2x4x4x16xf32>
    %87 = vector.shape_cast %4 : vector<1x16xf32> to vector<1x1x1x16xf32>
    %88 = vector.broadcast %87 : vector<1x1x1x16xf32> to vector<2x4x4x16xf32>
    %89 = arith.addf %86, %88 : vector<2x4x4x16xf32>
    %cst_39 = arith.constant 0.000000e+00 : f32
    %90 = vector.broadcast %cst_39 : f32 to vector<2x4x4x16xf32>
    %91 = arith.cmpf oge, %89, %90 : vector<2x4x4x16xf32>
    %cst_40 = arith.constant 2.000000e-01 : f32
    %92 = vector.broadcast %cst_40 : f32 to vector<2x4x4x16xf32>
    %93 = arith.mulf %92, %89 : vector<2x4x4x16xf32>
    %94 = arith.select %91, %89, %93 : vector<2x4x4x16xi1>, vector<2x4x4x16xf32>
    %95 = vector.shape_cast %5 : vector<1x16xf32> to vector<1x1x1x16xf32>
    %96 = vector.broadcast %95 : vector<1x1x1x16xf32> to vector<2x4x4x16xf32>
    %97 = arith.mulf %94, %96 : vector<2x4x4x16xf32>
    %cst_41 = arith.constant dense<0.000000e+00> : vector<2x4x4xf32>
    %98 = vector.multi_reduction <add>, %97, %cst_41 [3] : vector<2x4x4x16xf32> to vector<2x4x4xf32>
    %99 = vector.shape_cast %6 : vector<4x4xf32> to vector<1x4x4xf32>
    %100 = vector.broadcast %99 : vector<1x4x4xf32> to vector<2x4x4xf32>
    %101 = arith.addf %98, %100 : vector<2x4x4xf32>
    %cst_42 = arith.constant dense<0xFF800000> : vector<2x4xf32>
    %102 = vector.multi_reduction <maximumf>, %101, %cst_42 [2] : vector<2x4x4xf32> to vector<2x4xf32>
    %103 = vector.shape_cast %102 : vector<2x4xf32> to vector<2x4x1xf32>
    %104 = vector.broadcast %103 : vector<2x4x1xf32> to vector<2x4x4xf32>
    %105 = arith.subf %101, %104 : vector<2x4x4xf32>
    %106 = math.exp %105 : vector<2x4x4xf32>
    %cst_43 = arith.constant dense<0.000000e+00> : vector<2x4xf32>
    %107 = vector.multi_reduction <add>, %106, %cst_43 [2] : vector<2x4x4xf32> to vector<2x4xf32>
    %108 = vector.shape_cast %107 : vector<2x4xf32> to vector<2x4x1xf32>
    %109 = tpu.reciprocal %108 {approx = true} : vector<2x4x1xf32> -> vector<2x4x1xf32>
    %110 = vector.broadcast %109 : vector<2x4x1xf32> to vector<2x4x4xf32>
    %111 = arith.mulf %106, %110 : vector<2x4x4xf32>
    "tpu.trace_start"() <{level = 10 : i32, message = "bij,bjd->bid"}> : () -> ()
    %cst_44 = arith.constant dense<0.000000e+00> : vector<2x4x8xf32>
    %112 = tpu.matmul %111, %76, %cst_44 {dimension_numbers = #tpu.dot_dimension_numbers<[2], [1], [1], [2], [0, 0, 0, 1, 1, 2], [0], [0]>} : vector<2x4x4xf32>, vector<2x4x8xf32>, vector<2x4x8xf32> -> vector<2x4x8xf32>
    "tpu.trace_stop"() : () -> ()
    %113 = arith.negf %112 : vector<2x4x8xf32>
    %114 = math.exp %113 : vector<2x4x8xf32>
    %cst_45 = arith.constant 1.000000e+00 : f32
    %115 = vector.broadcast %cst_45 : f32 to vector<2x4x8xf32>
    %116 = arith.addf %115, %114 : vector<2x4x8xf32>
    %117 = arith.divf %115, %116 : vector<2x4x8xf32>
    %118 = vector.extract_strided_slice %117 {offsets = [0, 0, 0], sizes = [1, 4, 8], strides = [1, 1, 1]} : vector<2x4x8xf32> to vector<1x4x8xf32>
    %119 = vector.shape_cast %118 : vector<1x4x8xf32> to vector<4x8xf32>
    %120 = tpu.transpose %119, [1, 0] : vector<4x8xf32> -> vector<8x4xf32>
    %121 = vector.extract_strided_slice %117 {offsets = [1, 0, 0], sizes = [1, 4, 8], strides = [1, 1, 1]} : vector<2x4x8xf32> to vector<1x4x8xf32>
    %122 = vector.shape_cast %121 : vector<1x4x8xf32> to vector<4x8xf32>
    %123 = tpu.transpose %122, [1, 0] : vector<4x8xf32> -> vector<8x4xf32>
    %124 = vector.shape_cast %120 : vector<8x4xf32> to vector<1x8x4xf32>
    %125 = vector.shape_cast %123 : vector<8x4xf32> to vector<1x8x4xf32>
    %126 = tpu.concatenate %124, %125 in 0 : vector<1x8x4xf32>, vector<1x8x4xf32> -> vector<2x8x4xf32>
    %127 = vector.shape_cast %126 : vector<2x8x4xf32> to vector<16x4xf32>
    %cst_46 = arith.constant dense<0.000000e+00> : vector<16x8xf32>
    %128 = tpu.matmul %66, %7, %cst_46 {dimension_numbers = #tpu.dot_dimension_numbers<[1], [0], [0], [1], [0, 0, 1, 1], [], []>} : vector<16x4xf32>, vector<4x8xf32>, vector<16x8xf32> -> vector<16x8xf32>
    %129 = vector.shape_cast %128 : vector<16x8xf32> to vector<2x8x8xf32>
    %cst_47 = arith.constant dense<0.000000e+00> : vector<16x8xf32>
    %130 = tpu.matmul %66, %8, %cst_47 {dimension_numbers = #tpu.dot_dimension_numbers<[1], [0], [0], [1], [0, 0, 1, 1], [], []>} : vector<16x4xf32>, vector<4x8xf32>, vector<16x8xf32> -> vector<16x8xf32>
    %131 = vector.shape_cast %130 : vector<16x8xf32> to vector<2x8x8xf32>
    %132 = vector.shape_cast %129 : vector<2x8x8xf32> to vector<2x8x1x8xf32>
    %133 = vector.shape_cast %131 : vector<2x8x8xf32> to vector<2x1x8x8xf32>
    %134 = vector.broadcast %132 : vector<2x8x1x8xf32> to vector<2x8x8x8xf32>
    %135 = vector.broadcast %133 : vector<2x1x8x8xf32> to vector<2x8x8x8xf32>
    %136 = arith.addf %134, %135 : vector<2x8x8x8xf32>
    %137 = vector.shape_cast %9 : vector<1x8xf32> to vector<1x1x1x8xf32>
    %138 = vector.broadcast %137 : vector<1x1x1x8xf32> to vector<2x8x8x8xf32>
    %139 = arith.addf %136, %138 : vector<2x8x8x8xf32>
    %cst_48 = arith.constant 0.000000e+00 : f32
    %140 = vector.broadcast %cst_48 : f32 to vector<2x8x8x8xf32>
    %141 = arith.cmpf oge, %139, %140 : vector<2x8x8x8xf32>
    %cst_49 = arith.constant 2.000000e-01 : f32
    %142 = vector.broadcast %cst_49 : f32 to vector<2x8x8x8xf32>
    %143 = arith.mulf %142, %139 : vector<2x8x8x8xf32>
    %144 = arith.select %141, %139, %143 : vector<2x8x8x8xi1>, vector<2x8x8x8xf32>
    %145 = vector.shape_cast %10 : vector<1x8xf32> to vector<1x1x1x8xf32>
    %146 = vector.broadcast %145 : vector<1x1x1x8xf32> to vector<2x8x8x8xf32>
    %147 = arith.mulf %144, %146 : vector<2x8x8x8xf32>
    %cst_50 = arith.constant dense<0.000000e+00> : vector<2x8x8xf32>
    %148 = vector.multi_reduction <add>, %147, %cst_50 [3] : vector<2x8x8x8xf32> to vector<2x8x8xf32>
    %149 = vector.shape_cast %11 : vector<8x8xf32> to vector<1x8x8xf32>
    %150 = vector.broadcast %149 : vector<1x8x8xf32> to vector<2x8x8xf32>
    %151 = arith.addf %148, %150 : vector<2x8x8xf32>
    %cst_51 = arith.constant dense<0xFF800000> : vector<2x8xf32>
    %152 = vector.multi_reduction <maximumf>, %151, %cst_51 [2] : vector<2x8x8xf32> to vector<2x8xf32>
    %153 = vector.shape_cast %152 : vector<2x8xf32> to vector<2x8x1xf32>
    %154 = vector.broadcast %153 : vector<2x8x1xf32> to vector<2x8x8xf32>
    %155 = arith.subf %151, %154 : vector<2x8x8xf32>
    %156 = math.exp %155 : vector<2x8x8xf32>
    %cst_52 = arith.constant dense<0.000000e+00> : vector<2x8xf32>
    %157 = vector.multi_reduction <add>, %156, %cst_52 [2] : vector<2x8x8xf32> to vector<2x8xf32>
    %158 = vector.shape_cast %157 : vector<2x8xf32> to vector<2x8x1xf32>
    %159 = tpu.reciprocal %158 {approx = true} : vector<2x8x1xf32> -> vector<2x8x1xf32>
    %160 = vector.broadcast %159 : vector<2x8x1xf32> to vector<2x8x8xf32>
    %161 = arith.mulf %156, %160 : vector<2x8x8xf32>
    "tpu.trace_start"() <{level = 10 : i32, message = "bij,bjd->bid"}> : () -> ()
    %cst_53 = arith.constant dense<0.000000e+00> : vector<2x8x4xf32>
    %162 = tpu.matmul %161, %67, %cst_53 {dimension_numbers = #tpu.dot_dimension_numbers<[2], [1], [1], [2], [0, 0, 0, 1, 1, 2], [0], [0]>} : vector<2x8x8xf32>, vector<2x8x4xf32>, vector<2x8x4xf32> -> vector<2x8x4xf32>
    "tpu.trace_stop"() : () -> ()
    %163 = arith.negf %162 : vector<2x8x4xf32>
    %164 = math.exp %163 : vector<2x8x4xf32>
    %cst_54 = arith.constant 1.000000e+00 : f32
    %165 = vector.broadcast %cst_54 : f32 to vector<2x8x4xf32>
    %166 = arith.addf %165, %164 : vector<2x8x4xf32>
    %167 = arith.divf %165, %166 : vector<2x8x4xf32>
    %168 = vector.shape_cast %167 : vector<2x8x4xf32> to vector<16x4xf32>
    %cst_55 = arith.constant dense<0.000000e+00> : vector<16x96xf32>
    %169 = tpu.matmul %66, %12, %cst_55 {dimension_numbers = #tpu.dot_dimension_numbers<[1], [0], [0], [1], [0, 0, 1, 1], [], []>} : vector<16x4xf32>, vector<4x96xf32>, vector<16x96xf32> -> vector<16x96xf32>
    %cst_56 = arith.constant dense<0.000000e+00> : vector<16x96xf32>
    %170 = tpu.matmul %127, %13, %cst_56 {dimension_numbers = #tpu.dot_dimension_numbers<[1], [0], [0], [1], [0, 0, 1, 1], [], []>} : vector<16x4xf32>, vector<4x96xf32>, vector<16x96xf32> -> vector<16x96xf32>
    %171 = arith.addf %169, %170 : vector<16x96xf32>
    %cst_57 = arith.constant dense<0.000000e+00> : vector<16x96xf32>
    %172 = tpu.matmul %168, %14, %cst_57 {dimension_numbers = #tpu.dot_dimension_numbers<[1], [0], [0], [1], [0, 0, 1, 1], [], []>} : vector<16x4xf32>, vector<4x96xf32>, vector<16x96xf32> -> vector<16x96xf32>
    %173 = arith.addf %171, %172 : vector<16x96xf32>
    %174 = vector.broadcast %16 : vector<1x96xf32> to vector<16x96xf32>
    %175 = arith.addf %173, %174 : vector<16x96xf32>
    %176 = vector.shape_cast %175 : vector<16x96xf32> to vector<2x8x96xf32>
    %cst_58 = arith.constant 0.000000e+00 : f32
    %177 = vector.broadcast %cst_58 : f32 to vector<2x32xf32>
    %178 = vector.extract_strided_slice %176 {offsets = [0, 0, 0], sizes = [2, 1, 96], strides = [1, 1, 1]} : vector<2x8x96xf32> to vector<2x1x96xf32>
    %179 = vector.shape_cast %178 : vector<2x1x96xf32> to vector<2x96xf32>
    %cst_59 = arith.constant dense<0.000000e+00> : vector<2x96xf32>
    %180 = tpu.matmul %177, %15, %cst_59 {dimension_numbers = #tpu.dot_dimension_numbers<[1], [0], [0], [1], [0, 0, 1, 1], [], []>} : vector<2x32xf32>, vector<32x96xf32>, vector<2x96xf32> -> vector<2x96xf32>
    %181 = vector.extract_strided_slice %179 {offsets = [0, 0], sizes = [2, 32], strides = [1, 1]} : vector<2x96xf32> to vector<2x32xf32>
    %182 = vector.extract_strided_slice %180 {offsets = [0, 0], sizes = [2, 32], strides = [1, 1]} : vector<2x96xf32> to vector<2x32xf32>
    %183 = arith.addf %181, %182 : vector<2x32xf32>
    %184 = arith.negf %183 : vector<2x32xf32>
    %185 = math.exp %184 : vector<2x32xf32>
    %cst_60 = arith.constant 1.000000e+00 : f32
    %186 = vector.broadcast %cst_60 : f32 to vector<2x32xf32>
    %187 = arith.addf %186, %185 : vector<2x32xf32>
    %188 = arith.divf %186, %187 : vector<2x32xf32>
    %189 = vector.extract_strided_slice %179 {offsets = [0, 32], sizes = [2, 32], strides = [1, 1]} : vector<2x96xf32> to vector<2x32xf32>
    %190 = vector.extract_strided_slice %180 {offsets = [0, 32], sizes = [2, 32], strides = [1, 1]} : vector<2x96xf32> to vector<2x32xf32>
    %191 = arith.addf %189, %190 : vector<2x32xf32>
    %192 = arith.negf %191 : vector<2x32xf32>
    %193 = math.exp %192 : vector<2x32xf32>
    %cst_61 = arith.constant 1.000000e+00 : f32
    %194 = vector.broadcast %cst_61 : f32 to vector<2x32xf32>
    %195 = arith.addf %194, %193 : vector<2x32xf32>
    %196 = arith.divf %194, %195 : vector<2x32xf32>
    %197 = vector.extract_strided_slice %179 {offsets = [0, 64], sizes = [2, 32], strides = [1, 1]} : vector<2x96xf32> to vector<2x32xf32>
    %198 = vector.extract_strided_slice %180 {offsets = [0, 64], sizes = [2, 32], strides = [1, 1]} : vector<2x96xf32> to vector<2x32xf32>
    %199 = vector.broadcast %17 : vector<1x32xf32> to vector<2x32xf32>
    %200 = arith.addf %198, %199 : vector<2x32xf32>
    %201 = arith.mulf %188, %200 : vector<2x32xf32>
    %202 = arith.addf %197, %201 : vector<2x32xf32>
    %203 = math.tanh %202 : vector<2x32xf32>
    %cst_62 = arith.constant 1.000000e+00 : f32
    %204 = vector.broadcast %cst_62 : f32 to vector<2x32xf32>
    %205 = arith.subf %204, %196 : vector<2x32xf32>
    %206 = arith.mulf %205, %203 : vector<2x32xf32>
    %207 = arith.mulf %196, %177 : vector<2x32xf32>
    %208 = arith.addf %206, %207 : vector<2x32xf32>
    %209 = vector.extract_strided_slice %176 {offsets = [0, 1, 0], sizes = [2, 1, 96], strides = [1, 1, 1]} : vector<2x8x96xf32> to vector<2x1x96xf32>
    %210 = vector.shape_cast %209 : vector<2x1x96xf32> to vector<2x96xf32>
    %cst_63 = arith.constant dense<0.000000e+00> : vector<2x96xf32>
    %211 = tpu.matmul %208, %15, %cst_63 {dimension_numbers = #tpu.dot_dimension_numbers<[1], [0], [0], [1], [0, 0, 1, 1], [], []>} : vector<2x32xf32>, vector<32x96xf32>, vector<2x96xf32> -> vector<2x96xf32>
    %212 = vector.extract_strided_slice %210 {offsets = [0, 0], sizes = [2, 32], strides = [1, 1]} : vector<2x96xf32> to vector<2x32xf32>
    %213 = vector.extract_strided_slice %211 {offsets = [0, 0], sizes = [2, 32], strides = [1, 1]} : vector<2x96xf32> to vector<2x32xf32>
    %214 = arith.addf %212, %213 : vector<2x32xf32>
    %215 = arith.negf %214 : vector<2x32xf32>
    %216 = math.exp %215 : vector<2x32xf32>
    %cst_64 = arith.constant 1.000000e+00 : f32
    %217 = vector.broadcast %cst_64 : f32 to vector<2x32xf32>
    %218 = arith.addf %217, %216 : vector<2x32xf32>
    %219 = arith.divf %217, %218 : vector<2x32xf32>
    %220 = vector.extract_strided_slice %210 {offsets = [0, 32], sizes = [2, 32], strides = [1, 1]} : vector<2x96xf32> to vector<2x32xf32>
    %221 = vector.extract_strided_slice %211 {offsets = [0, 32], sizes = [2, 32], strides = [1, 1]} : vector<2x96xf32> to vector<2x32xf32>
    %222 = arith.addf %220, %221 : vector<2x32xf32>
    %223 = arith.negf %222 : vector<2x32xf32>
    %224 = math.exp %223 : vector<2x32xf32>
    %cst_65 = arith.constant 1.000000e+00 : f32
    %225 = vector.broadcast %cst_65 : f32 to vector<2x32xf32>
    %226 = arith.addf %225, %224 : vector<2x32xf32>
    %227 = arith.divf %225, %226 : vector<2x32xf32>
    %228 = vector.extract_strided_slice %210 {offsets = [0, 64], sizes = [2, 32], strides = [1, 1]} : vector<2x96xf32> to vector<2x32xf32>
    %229 = vector.extract_strided_slice %211 {offsets = [0, 64], sizes = [2, 32], strides = [1, 1]} : vector<2x96xf32> to vector<2x32xf32>
    %230 = vector.broadcast %17 : vector<1x32xf32> to vector<2x32xf32>
    %231 = arith.addf %229, %230 : vector<2x32xf32>
    %232 = arith.mulf %219, %231 : vector<2x32xf32>
    %233 = arith.addf %228, %232 : vector<2x32xf32>
    %234 = math.tanh %233 : vector<2x32xf32>
    %cst_66 = arith.constant 1.000000e+00 : f32
    %235 = vector.broadcast %cst_66 : f32 to vector<2x32xf32>
    %236 = arith.subf %235, %227 : vector<2x32xf32>
    %237 = arith.mulf %236, %234 : vector<2x32xf32>
    %238 = arith.mulf %227, %208 : vector<2x32xf32>
    %239 = arith.addf %237, %238 : vector<2x32xf32>
    %240 = vector.extract_strided_slice %176 {offsets = [0, 2, 0], sizes = [2, 1, 96], strides = [1, 1, 1]} : vector<2x8x96xf32> to vector<2x1x96xf32>
    %241 = vector.shape_cast %240 : vector<2x1x96xf32> to vector<2x96xf32>
    %cst_67 = arith.constant dense<0.000000e+00> : vector<2x96xf32>
    %242 = tpu.matmul %239, %15, %cst_67 {dimension_numbers = #tpu.dot_dimension_numbers<[1], [0], [0], [1], [0, 0, 1, 1], [], []>} : vector<2x32xf32>, vector<32x96xf32>, vector<2x96xf32> -> vector<2x96xf32>
    %243 = vector.extract_strided_slice %241 {offsets = [0, 0], sizes = [2, 32], strides = [1, 1]} : vector<2x96xf32> to vector<2x32xf32>
    %244 = vector.extract_strided_slice %242 {offsets = [0, 0], sizes = [2, 32], strides = [1, 1]} : vector<2x96xf32> to vector<2x32xf32>
    %245 = arith.addf %243, %244 : vector<2x32xf32>
    %246 = arith.negf %245 : vector<2x32xf32>
    %247 = math.exp %246 : vector<2x32xf32>
    %cst_68 = arith.constant 1.000000e+00 : f32
    %248 = vector.broadcast %cst_68 : f32 to vector<2x32xf32>
    %249 = arith.addf %248, %247 : vector<2x32xf32>
    %250 = arith.divf %248, %249 : vector<2x32xf32>
    %251 = vector.extract_strided_slice %241 {offsets = [0, 32], sizes = [2, 32], strides = [1, 1]} : vector<2x96xf32> to vector<2x32xf32>
    %252 = vector.extract_strided_slice %242 {offsets = [0, 32], sizes = [2, 32], strides = [1, 1]} : vector<2x96xf32> to vector<2x32xf32>
    %253 = arith.addf %251, %252 : vector<2x32xf32>
    %254 = arith.negf %253 : vector<2x32xf32>
    %255 = math.exp %254 : vector<2x32xf32>
    %cst_69 = arith.constant 1.000000e+00 : f32
    %256 = vector.broadcast %cst_69 : f32 to vector<2x32xf32>
    %257 = arith.addf %256, %255 : vector<2x32xf32>
    %258 = arith.divf %256, %257 : vector<2x32xf32>
    %259 = vector.extract_strided_slice %241 {offsets = [0, 64], sizes = [2, 32], strides = [1, 1]} : vector<2x96xf32> to vector<2x32xf32>
    %260 = vector.extract_strided_slice %242 {offsets = [0, 64], sizes = [2, 32], strides = [1, 1]} : vector<2x96xf32> to vector<2x32xf32>
    %261 = vector.broadcast %17 : vector<1x32xf32> to vector<2x32xf32>
    %262 = arith.addf %260, %261 : vector<2x32xf32>
    %263 = arith.mulf %250, %262 : vector<2x32xf32>
    %264 = arith.addf %259, %263 : vector<2x32xf32>
    %265 = math.tanh %264 : vector<2x32xf32>
    %cst_70 = arith.constant 1.000000e+00 : f32
    %266 = vector.broadcast %cst_70 : f32 to vector<2x32xf32>
    %267 = arith.subf %266, %258 : vector<2x32xf32>
    %268 = arith.mulf %267, %265 : vector<2x32xf32>
    %269 = arith.mulf %258, %239 : vector<2x32xf32>
    %270 = arith.addf %268, %269 : vector<2x32xf32>
    %271 = vector.extract_strided_slice %176 {offsets = [0, 3, 0], sizes = [2, 1, 96], strides = [1, 1, 1]} : vector<2x8x96xf32> to vector<2x1x96xf32>
    %272 = vector.shape_cast %271 : vector<2x1x96xf32> to vector<2x96xf32>
    %cst_71 = arith.constant dense<0.000000e+00> : vector<2x96xf32>
    %273 = tpu.matmul %270, %15, %cst_71 {dimension_numbers = #tpu.dot_dimension_numbers<[1], [0], [0], [1], [0, 0, 1, 1], [], []>} : vector<2x32xf32>, vector<32x96xf32>, vector<2x96xf32> -> vector<2x96xf32>
    %274 = vector.extract_strided_slice %272 {offsets = [0, 0], sizes = [2, 32], strides = [1, 1]} : vector<2x96xf32> to vector<2x32xf32>
    %275 = vector.extract_strided_slice %273 {offsets = [0, 0], sizes = [2, 32], strides = [1, 1]} : vector<2x96xf32> to vector<2x32xf32>
    %276 = arith.addf %274, %275 : vector<2x32xf32>
    %277 = arith.negf %276 : vector<2x32xf32>
    %278 = math.exp %277 : vector<2x32xf32>
    %cst_72 = arith.constant 1.000000e+00 : f32
    %279 = vector.broadcast %cst_72 : f32 to vector<2x32xf32>
    %280 = arith.addf %279, %278 : vector<2x32xf32>
    %281 = arith.divf %279, %280 : vector<2x32xf32>
    %282 = vector.extract_strided_slice %272 {offsets = [0, 32], sizes = [2, 32], strides = [1, 1]} : vector<2x96xf32> to vector<2x32xf32>
    %283 = vector.extract_strided_slice %273 {offsets = [0, 32], sizes = [2, 32], strides = [1, 1]} : vector<2x96xf32> to vector<2x32xf32>
    %284 = arith.addf %282, %283 : vector<2x32xf32>
    %285 = arith.negf %284 : vector<2x32xf32>
    %286 = math.exp %285 : vector<2x32xf32>
    %cst_73 = arith.constant 1.000000e+00 : f32
    %287 = vector.broadcast %cst_73 : f32 to vector<2x32xf32>
    %288 = arith.addf %287, %286 : vector<2x32xf32>
    %289 = arith.divf %287, %288 : vector<2x32xf32>
    %290 = vector.extract_strided_slice %272 {offsets = [0, 64], sizes = [2, 32], strides = [1, 1]} : vector<2x96xf32> to vector<2x32xf32>
    %291 = vector.extract_strided_slice %273 {offsets = [0, 64], sizes = [2, 32], strides = [1, 1]} : vector<2x96xf32> to vector<2x32xf32>
    %292 = vector.broadcast %17 : vector<1x32xf32> to vector<2x32xf32>
    %293 = arith.addf %291, %292 : vector<2x32xf32>
    %294 = arith.mulf %281, %293 : vector<2x32xf32>
    %295 = arith.addf %290, %294 : vector<2x32xf32>
    %296 = math.tanh %295 : vector<2x32xf32>
    %cst_74 = arith.constant 1.000000e+00 : f32
    %297 = vector.broadcast %cst_74 : f32 to vector<2x32xf32>
    %298 = arith.subf %297, %289 : vector<2x32xf32>
    %299 = arith.mulf %298, %296 : vector<2x32xf32>
    %300 = arith.mulf %289, %270 : vector<2x32xf32>
    %301 = arith.addf %299, %300 : vector<2x32xf32>
    %302 = vector.extract_strided_slice %176 {offsets = [0, 4, 0], sizes = [2, 1, 96], strides = [1, 1, 1]} : vector<2x8x96xf32> to vector<2x1x96xf32>
    %303 = vector.shape_cast %302 : vector<2x1x96xf32> to vector<2x96xf32>
    %cst_75 = arith.constant dense<0.000000e+00> : vector<2x96xf32>
    %304 = tpu.matmul %301, %15, %cst_75 {dimension_numbers = #tpu.dot_dimension_numbers<[1], [0], [0], [1], [0, 0, 1, 1], [], []>} : vector<2x32xf32>, vector<32x96xf32>, vector<2x96xf32> -> vector<2x96xf32>
    %305 = vector.extract_strided_slice %303 {offsets = [0, 0], sizes = [2, 32], strides = [1, 1]} : vector<2x96xf32> to vector<2x32xf32>
    %306 = vector.extract_strided_slice %304 {offsets = [0, 0], sizes = [2, 32], strides = [1, 1]} : vector<2x96xf32> to vector<2x32xf32>
    %307 = arith.addf %305, %306 : vector<2x32xf32>
    %308 = arith.negf %307 : vector<2x32xf32>
    %309 = math.exp %308 : vector<2x32xf32>
    %cst_76 = arith.constant 1.000000e+00 : f32
    %310 = vector.broadcast %cst_76 : f32 to vector<2x32xf32>
    %311 = arith.addf %310, %309 : vector<2x32xf32>
    %312 = arith.divf %310, %311 : vector<2x32xf32>
    %313 = vector.extract_strided_slice %303 {offsets = [0, 32], sizes = [2, 32], strides = [1, 1]} : vector<2x96xf32> to vector<2x32xf32>
    %314 = vector.extract_strided_slice %304 {offsets = [0, 32], sizes = [2, 32], strides = [1, 1]} : vector<2x96xf32> to vector<2x32xf32>
    %315 = arith.addf %313, %314 : vector<2x32xf32>
    %316 = arith.negf %315 : vector<2x32xf32>
    %317 = math.exp %316 : vector<2x32xf32>
    %cst_77 = arith.constant 1.000000e+00 : f32
    %318 = vector.broadcast %cst_77 : f32 to vector<2x32xf32>
    %319 = arith.addf %318, %317 : vector<2x32xf32>
    %320 = arith.divf %318, %319 : vector<2x32xf32>
    %321 = vector.extract_strided_slice %303 {offsets = [0, 64], sizes = [2, 32], strides = [1, 1]} : vector<2x96xf32> to vector<2x32xf32>
    %322 = vector.extract_strided_slice %304 {offsets = [0, 64], sizes = [2, 32], strides = [1, 1]} : vector<2x96xf32> to vector<2x32xf32>
    %323 = vector.broadcast %17 : vector<1x32xf32> to vector<2x32xf32>
    %324 = arith.addf %322, %323 : vector<2x32xf32>
    %325 = arith.mulf %312, %324 : vector<2x32xf32>
    %326 = arith.addf %321, %325 : vector<2x32xf32>
    %327 = math.tanh %326 : vector<2x32xf32>
    %cst_78 = arith.constant 1.000000e+00 : f32
    %328 = vector.broadcast %cst_78 : f32 to vector<2x32xf32>
    %329 = arith.subf %328, %320 : vector<2x32xf32>
    %330 = arith.mulf %329, %327 : vector<2x32xf32>
    %331 = arith.mulf %320, %301 : vector<2x32xf32>
    %332 = arith.addf %330, %331 : vector<2x32xf32>
    %333 = vector.extract_strided_slice %176 {offsets = [0, 5, 0], sizes = [2, 1, 96], strides = [1, 1, 1]} : vector<2x8x96xf32> to vector<2x1x96xf32>
    %334 = vector.shape_cast %333 : vector<2x1x96xf32> to vector<2x96xf32>
    %cst_79 = arith.constant dense<0.000000e+00> : vector<2x96xf32>
    %335 = tpu.matmul %332, %15, %cst_79 {dimension_numbers = #tpu.dot_dimension_numbers<[1], [0], [0], [1], [0, 0, 1, 1], [], []>} : vector<2x32xf32>, vector<32x96xf32>, vector<2x96xf32> -> vector<2x96xf32>
    %336 = vector.extract_strided_slice %334 {offsets = [0, 0], sizes = [2, 32], strides = [1, 1]} : vector<2x96xf32> to vector<2x32xf32>
    %337 = vector.extract_strided_slice %335 {offsets = [0, 0], sizes = [2, 32], strides = [1, 1]} : vector<2x96xf32> to vector<2x32xf32>
    %338 = arith.addf %336, %337 : vector<2x32xf32>
    %339 = arith.negf %338 : vector<2x32xf32>
    %340 = math.exp %339 : vector<2x32xf32>
    %cst_80 = arith.constant 1.000000e+00 : f32
    %341 = vector.broadcast %cst_80 : f32 to vector<2x32xf32>
    %342 = arith.addf %341, %340 : vector<2x32xf32>
    %343 = arith.divf %341, %342 : vector<2x32xf32>
    %344 = vector.extract_strided_slice %334 {offsets = [0, 32], sizes = [2, 32], strides = [1, 1]} : vector<2x96xf32> to vector<2x32xf32>
    %345 = vector.extract_strided_slice %335 {offsets = [0, 32], sizes = [2, 32], strides = [1, 1]} : vector<2x96xf32> to vector<2x32xf32>
    %346 = arith.addf %344, %345 : vector<2x32xf32>
    %347 = arith.negf %346 : vector<2x32xf32>
    %348 = math.exp %347 : vector<2x32xf32>
    %cst_81 = arith.constant 1.000000e+00 : f32
    %349 = vector.broadcast %cst_81 : f32 to vector<2x32xf32>
    %350 = arith.addf %349, %348 : vector<2x32xf32>
    %351 = arith.divf %349, %350 : vector<2x32xf32>
    %352 = vector.extract_strided_slice %334 {offsets = [0, 64], sizes = [2, 32], strides = [1, 1]} : vector<2x96xf32> to vector<2x32xf32>
    %353 = vector.extract_strided_slice %335 {offsets = [0, 64], sizes = [2, 32], strides = [1, 1]} : vector<2x96xf32> to vector<2x32xf32>
    %354 = vector.broadcast %17 : vector<1x32xf32> to vector<2x32xf32>
    %355 = arith.addf %353, %354 : vector<2x32xf32>
    %356 = arith.mulf %343, %355 : vector<2x32xf32>
    %357 = arith.addf %352, %356 : vector<2x32xf32>
    %358 = math.tanh %357 : vector<2x32xf32>
    %cst_82 = arith.constant 1.000000e+00 : f32
    %359 = vector.broadcast %cst_82 : f32 to vector<2x32xf32>
    %360 = arith.subf %359, %351 : vector<2x32xf32>
    %361 = arith.mulf %360, %358 : vector<2x32xf32>
    %362 = arith.mulf %351, %332 : vector<2x32xf32>
    %363 = arith.addf %361, %362 : vector<2x32xf32>
    %364 = vector.extract_strided_slice %176 {offsets = [0, 6, 0], sizes = [2, 1, 96], strides = [1, 1, 1]} : vector<2x8x96xf32> to vector<2x1x96xf32>
    %365 = vector.shape_cast %364 : vector<2x1x96xf32> to vector<2x96xf32>
    %cst_83 = arith.constant dense<0.000000e+00> : vector<2x96xf32>
    %366 = tpu.matmul %363, %15, %cst_83 {dimension_numbers = #tpu.dot_dimension_numbers<[1], [0], [0], [1], [0, 0, 1, 1], [], []>} : vector<2x32xf32>, vector<32x96xf32>, vector<2x96xf32> -> vector<2x96xf32>
    %367 = vector.extract_strided_slice %365 {offsets = [0, 0], sizes = [2, 32], strides = [1, 1]} : vector<2x96xf32> to vector<2x32xf32>
    %368 = vector.extract_strided_slice %366 {offsets = [0, 0], sizes = [2, 32], strides = [1, 1]} : vector<2x96xf32> to vector<2x32xf32>
    %369 = arith.addf %367, %368 : vector<2x32xf32>
    %370 = arith.negf %369 : vector<2x32xf32>
    %371 = math.exp %370 : vector<2x32xf32>
    %cst_84 = arith.constant 1.000000e+00 : f32
    %372 = vector.broadcast %cst_84 : f32 to vector<2x32xf32>
    %373 = arith.addf %372, %371 : vector<2x32xf32>
    %374 = arith.divf %372, %373 : vector<2x32xf32>
    %375 = vector.extract_strided_slice %365 {offsets = [0, 32], sizes = [2, 32], strides = [1, 1]} : vector<2x96xf32> to vector<2x32xf32>
    %376 = vector.extract_strided_slice %366 {offsets = [0, 32], sizes = [2, 32], strides = [1, 1]} : vector<2x96xf32> to vector<2x32xf32>
    %377 = arith.addf %375, %376 : vector<2x32xf32>
    %378 = arith.negf %377 : vector<2x32xf32>
    %379 = math.exp %378 : vector<2x32xf32>
    %cst_85 = arith.constant 1.000000e+00 : f32
    %380 = vector.broadcast %cst_85 : f32 to vector<2x32xf32>
    %381 = arith.addf %380, %379 : vector<2x32xf32>
    %382 = arith.divf %380, %381 : vector<2x32xf32>
    %383 = vector.extract_strided_slice %365 {offsets = [0, 64], sizes = [2, 32], strides = [1, 1]} : vector<2x96xf32> to vector<2x32xf32>
    %384 = vector.extract_strided_slice %366 {offsets = [0, 64], sizes = [2, 32], strides = [1, 1]} : vector<2x96xf32> to vector<2x32xf32>
    %385 = vector.broadcast %17 : vector<1x32xf32> to vector<2x32xf32>
    %386 = arith.addf %384, %385 : vector<2x32xf32>
    %387 = arith.mulf %374, %386 : vector<2x32xf32>
    %388 = arith.addf %383, %387 : vector<2x32xf32>
    %389 = math.tanh %388 : vector<2x32xf32>
    %cst_86 = arith.constant 1.000000e+00 : f32
    %390 = vector.broadcast %cst_86 : f32 to vector<2x32xf32>
    %391 = arith.subf %390, %382 : vector<2x32xf32>
    %392 = arith.mulf %391, %389 : vector<2x32xf32>
    %393 = arith.mulf %382, %363 : vector<2x32xf32>
    %394 = arith.addf %392, %393 : vector<2x32xf32>
    %395 = vector.extract_strided_slice %176 {offsets = [0, 7, 0], sizes = [2, 1, 96], strides = [1, 1, 1]} : vector<2x8x96xf32> to vector<2x1x96xf32>
    %396 = vector.shape_cast %395 : vector<2x1x96xf32> to vector<2x96xf32>
    %cst_87 = arith.constant dense<0.000000e+00> : vector<2x96xf32>
    %397 = tpu.matmul %394, %15, %cst_87 {dimension_numbers = #tpu.dot_dimension_numbers<[1], [0], [0], [1], [0, 0, 1, 1], [], []>} : vector<2x32xf32>, vector<32x96xf32>, vector<2x96xf32> -> vector<2x96xf32>
    %398 = vector.extract_strided_slice %396 {offsets = [0, 0], sizes = [2, 32], strides = [1, 1]} : vector<2x96xf32> to vector<2x32xf32>
    %399 = vector.extract_strided_slice %397 {offsets = [0, 0], sizes = [2, 32], strides = [1, 1]} : vector<2x96xf32> to vector<2x32xf32>
    %400 = arith.addf %398, %399 : vector<2x32xf32>
    %401 = arith.negf %400 : vector<2x32xf32>
    %402 = math.exp %401 : vector<2x32xf32>
    %cst_88 = arith.constant 1.000000e+00 : f32
    %403 = vector.broadcast %cst_88 : f32 to vector<2x32xf32>
    %404 = arith.addf %403, %402 : vector<2x32xf32>
    %405 = arith.divf %403, %404 : vector<2x32xf32>
    %406 = vector.extract_strided_slice %396 {offsets = [0, 32], sizes = [2, 32], strides = [1, 1]} : vector<2x96xf32> to vector<2x32xf32>
    %407 = vector.extract_strided_slice %397 {offsets = [0, 32], sizes = [2, 32], strides = [1, 1]} : vector<2x96xf32> to vector<2x32xf32>
    %408 = arith.addf %406, %407 : vector<2x32xf32>
    %409 = arith.negf %408 : vector<2x32xf32>
    %410 = math.exp %409 : vector<2x32xf32>
    %cst_89 = arith.constant 1.000000e+00 : f32
    %411 = vector.broadcast %cst_89 : f32 to vector<2x32xf32>
    %412 = arith.addf %411, %410 : vector<2x32xf32>
    %413 = arith.divf %411, %412 : vector<2x32xf32>
    %414 = vector.extract_strided_slice %396 {offsets = [0, 64], sizes = [2, 32], strides = [1, 1]} : vector<2x96xf32> to vector<2x32xf32>
    %415 = vector.extract_strided_slice %397 {offsets = [0, 64], sizes = [2, 32], strides = [1, 1]} : vector<2x96xf32> to vector<2x32xf32>
    %416 = vector.broadcast %17 : vector<1x32xf32> to vector<2x32xf32>
    %417 = arith.addf %415, %416 : vector<2x32xf32>
    %418 = arith.mulf %405, %417 : vector<2x32xf32>
    %419 = arith.addf %414, %418 : vector<2x32xf32>
    %420 = math.tanh %419 : vector<2x32xf32>
    %cst_90 = arith.constant 1.000000e+00 : f32
    %421 = vector.broadcast %cst_90 : f32 to vector<2x32xf32>
    %422 = arith.subf %421, %413 : vector<2x32xf32>
    %423 = arith.mulf %422, %420 : vector<2x32xf32>
    %424 = arith.mulf %413, %394 : vector<2x32xf32>
    %425 = arith.addf %423, %424 : vector<2x32xf32>
    %cst_91 = arith.constant dense<0.000000e+00> : vector<2x32xf32>
    %426 = tpu.matmul %425, %18, %cst_91 {dimension_numbers = #tpu.dot_dimension_numbers<[1], [0], [0], [1], [0, 0, 1, 1], [], []>} : vector<2x32xf32>, vector<32x32xf32>, vector<2x32xf32> -> vector<2x32xf32>
    %427 = vector.broadcast %19 : vector<1x32xf32> to vector<2x32xf32>
    %428 = arith.addf %426, %427 : vector<2x32xf32>
    %cst_92 = arith.constant 0.000000e+00 : f32
    %429 = vector.broadcast %cst_92 : f32 to vector<2x32xf32>
    %430 = arith.maximumf %428, %429 : vector<2x32xf32>
    %cst_93 = arith.constant dense<0.000000e+00> : vector<2x4xf32>
    %431 = tpu.matmul %430, %20, %cst_93 {dimension_numbers = #tpu.dot_dimension_numbers<[1], [0], [0], [1], [0, 0, 1, 1], [], []>} : vector<2x32xf32>, vector<32x4xf32>, vector<2x4xf32> -> vector<2x4xf32>
    %432 = vector.broadcast %21 : vector<1x4xf32> to vector<2x4xf32>
    %433 = arith.addf %431, %432 : vector<2x4xf32>
    %c0_94 = arith.constant 0 : index
    %c0_95 = arith.constant 0 : index
    %434 = vector.load %arg4[%c0_94, %c0_95] : memref<2x4xf32, #tpu.memory_space<vmem>>, vector<2x4xf32>
    tpu.vector_store %arg4[%c0_94, %c0_95], %433 {strides = array<i32>} : memref<2x4xf32, #tpu.memory_space<vmem>>, vector<2x4xf32>,
    %c0_96 = arith.constant 0 : index
    %c0_97 = arith.constant 0 : index
    %435 = vector.load %arg3[%c0_96, %c0_97] : memref<40x1024xf32, #tpu.memory_space<vmem>>, vector<32x1024xf32>
    %cst_98 = arith.constant dense<0.000000e+00> : vector<2x1024xf32>
    %436 = tpu.matmul %425, %435, %cst_98 {dimension_numbers = #tpu.dot_dimension_numbers<[1], [0], [0], [1], [0, 0, 1, 1], [], []>} : vector<2x32xf32>, vector<32x1024xf32>, vector<2x1024xf32> -> vector<2x1024xf32>
    %c32_99 = arith.constant 32 : index
    %c0_100 = arith.constant 0 : index
    %437 = vector.load %arg3[%c32_99, %c0_100] : memref<40x1024xf32, #tpu.memory_space<vmem>>, vector<1x1024xf32>
    %438 = vector.broadcast %437 : vector<1x1024xf32> to vector<2x1024xf32>
    %439 = arith.addf %436, %438 : vector<2x1024xf32>
    %cst_101 = arith.constant 0.000000e+00 : f32
    %440 = vector.broadcast %cst_101 : f32 to vector<2x32xf32>
    %441 = vector.extract_strided_slice %439 {offsets = [0, 0], sizes = [2, 96], strides = [1, 1]} : vector<2x1024xf32> to vector<2x96xf32>
    %cst_102 = arith.constant dense<0.000000e+00> : vector<2x96xf32>
    %442 = tpu.matmul %440, %22, %cst_102 {dimension_numbers = #tpu.dot_dimension_numbers<[1], [0], [0], [1], [0, 0, 1, 1], [], []>} : vector<2x32xf32>, vector<32x96xf32>, vector<2x96xf32> -> vector<2x96xf32>
    %443 = vector.extract_strided_slice %441 {offsets = [0, 0], sizes = [2, 32], strides = [1, 1]} : vector<2x96xf32> to vector<2x32xf32>
    %444 = vector.extract_strided_slice %442 {offsets = [0, 0], sizes = [2, 32], strides = [1, 1]} : vector<2x96xf32> to vector<2x32xf32>
    %445 = arith.addf %443, %444 : vector<2x32xf32>
    %446 = arith.negf %445 : vector<2x32xf32>
    %447 = math.exp %446 : vector<2x32xf32>
    %cst_103 = arith.constant 1.000000e+00 : f32
    %448 = vector.broadcast %cst_103 : f32 to vector<2x32xf32>
    %449 = arith.addf %448, %447 : vector<2x32xf32>
    %450 = arith.divf %448, %449 : vector<2x32xf32>
    %451 = vector.extract_strided_slice %441 {offsets = [0, 32], sizes = [2, 32], strides = [1, 1]} : vector<2x96xf32> to vector<2x32xf32>
    %452 = vector.extract_strided_slice %442 {offsets = [0, 32], sizes = [2, 32], strides = [1, 1]} : vector<2x96xf32> to vector<2x32xf32>
    %453 = arith.addf %451, %452 : vector<2x32xf32>
    %454 = arith.negf %453 : vector<2x32xf32>
    %455 = math.exp %454 : vector<2x32xf32>
    %cst_104 = arith.constant 1.000000e+00 : f32
    %456 = vector.broadcast %cst_104 : f32 to vector<2x32xf32>
    %457 = arith.addf %456, %455 : vector<2x32xf32>
    %458 = arith.divf %456, %457 : vector<2x32xf32>
    %459 = vector.extract_strided_slice %441 {offsets = [0, 64], sizes = [2, 32], strides = [1, 1]} : vector<2x96xf32> to vector<2x32xf32>
    %460 = vector.extract_strided_slice %442 {offsets = [0, 64], sizes = [2, 32], strides = [1, 1]} : vector<2x96xf32> to vector<2x32xf32>
    %461 = vector.broadcast %23 : vector<1x32xf32> to vector<2x32xf32>
    %462 = arith.addf %460, %461 : vector<2x32xf32>
    %463 = arith.mulf %450, %462 : vector<2x32xf32>
    %464 = arith.addf %459, %463 : vector<2x32xf32>
    %465 = math.tanh %464 : vector<2x32xf32>
    %cst_105 = arith.constant 1.000000e+00 : f32
    %466 = vector.broadcast %cst_105 : f32 to vector<2x32xf32>
    %467 = arith.subf %466, %458 : vector<2x32xf32>
    %468 = arith.mulf %467, %465 : vector<2x32xf32>
    %469 = arith.mulf %458, %440 : vector<2x32xf32>
    %470 = arith.addf %468, %469 : vector<2x32xf32>
    %471 = vector.extract_strided_slice %439 {offsets = [0, 128], sizes = [2, 96], strides = [1, 1]} : vector<2x1024xf32> to vector<2x96xf32>
    %cst_106 = arith.constant dense<0.000000e+00> : vector<2x96xf32>
    %472 = tpu.matmul %470, %22, %cst_106 {dimension_numbers = #tpu.dot_dimension_numbers<[1], [0], [0], [1], [0, 0, 1, 1], [], []>} : vector<2x32xf32>, vector<32x96xf32>, vector<2x96xf32> -> vector<2x96xf32>
    %473 = vector.extract_strided_slice %471 {offsets = [0, 0], sizes = [2, 32], strides = [1, 1]} : vector<2x96xf32> to vector<2x32xf32>
    %474 = vector.extract_strided_slice %472 {offsets = [0, 0], sizes = [2, 32], strides = [1, 1]} : vector<2x96xf32> to vector<2x32xf32>
    %475 = arith.addf %473, %474 : vector<2x32xf32>
    %476 = arith.negf %475 : vector<2x32xf32>
    %477 = math.exp %476 : vector<2x32xf32>
    %cst_107 = arith.constant 1.000000e+00 : f32
    %478 = vector.broadcast %cst_107 : f32 to vector<2x32xf32>
    %479 = arith.addf %478, %477 : vector<2x32xf32>
    %480 = arith.divf %478, %479 : vector<2x32xf32>
    %481 = vector.extract_strided_slice %471 {offsets = [0, 32], sizes = [2, 32], strides = [1, 1]} : vector<2x96xf32> to vector<2x32xf32>
    %482 = vector.extract_strided_slice %472 {offsets = [0, 32], sizes = [2, 32], strides = [1, 1]} : vector<2x96xf32> to vector<2x32xf32>
    %483 = arith.addf %481, %482 : vector<2x32xf32>
    %484 = arith.negf %483 : vector<2x32xf32>
    %485 = math.exp %484 : vector<2x32xf32>
    %cst_108 = arith.constant 1.000000e+00 : f32
    %486 = vector.broadcast %cst_108 : f32 to vector<2x32xf32>
    %487 = arith.addf %486, %485 : vector<2x32xf32>
    %488 = arith.divf %486, %487 : vector<2x32xf32>
    %489 = vector.extract_strided_slice %471 {offsets = [0, 64], sizes = [2, 32], strides = [1, 1]} : vector<2x96xf32> to vector<2x32xf32>
    %490 = vector.extract_strided_slice %472 {offsets = [0, 64], sizes = [2, 32], strides = [1, 1]} : vector<2x96xf32> to vector<2x32xf32>
    %491 = vector.broadcast %23 : vector<1x32xf32> to vector<2x32xf32>
    %492 = arith.addf %490, %491 : vector<2x32xf32>
    %493 = arith.mulf %480, %492 : vector<2x32xf32>
    %494 = arith.addf %489, %493 : vector<2x32xf32>
    %495 = math.tanh %494 : vector<2x32xf32>
    %cst_109 = arith.constant 1.000000e+00 : f32
    %496 = vector.broadcast %cst_109 : f32 to vector<2x32xf32>
    %497 = arith.subf %496, %488 : vector<2x32xf32>
    %498 = arith.mulf %497, %495 : vector<2x32xf32>
    %499 = arith.mulf %488, %470 : vector<2x32xf32>
    %500 = arith.addf %498, %499 : vector<2x32xf32>
    %501 = vector.extract_strided_slice %439 {offsets = [0, 256], sizes = [2, 96], strides = [1, 1]} : vector<2x1024xf32> to vector<2x96xf32>
    %cst_110 = arith.constant dense<0.000000e+00> : vector<2x96xf32>
    %502 = tpu.matmul %500, %22, %cst_110 {dimension_numbers = #tpu.dot_dimension_numbers<[1], [0], [0], [1], [0, 0, 1, 1], [], []>} : vector<2x32xf32>, vector<32x96xf32>, vector<2x96xf32> -> vector<2x96xf32>
    %503 = vector.extract_strided_slice %501 {offsets = [0, 0], sizes = [2, 32], strides = [1, 1]} : vector<2x96xf32> to vector<2x32xf32>
    %504 = vector.extract_strided_slice %502 {offsets = [0, 0], sizes = [2, 32], strides = [1, 1]} : vector<2x96xf32> to vector<2x32xf32>
    %505 = arith.addf %503, %504 : vector<2x32xf32>
    %506 = arith.negf %505 : vector<2x32xf32>
    %507 = math.exp %506 : vector<2x32xf32>
    %cst_111 = arith.constant 1.000000e+00 : f32
    %508 = vector.broadcast %cst_111 : f32 to vector<2x32xf32>
    %509 = arith.addf %508, %507 : vector<2x32xf32>
    %510 = arith.divf %508, %509 : vector<2x32xf32>
    %511 = vector.extract_strided_slice %501 {offsets = [0, 32], sizes = [2, 32], strides = [1, 1]} : vector<2x96xf32> to vector<2x32xf32>
    %512 = vector.extract_strided_slice %502 {offsets = [0, 32], sizes = [2, 32], strides = [1, 1]} : vector<2x96xf32> to vector<2x32xf32>
    %513 = arith.addf %511, %512 : vector<2x32xf32>
    %514 = arith.negf %513 : vector<2x32xf32>
    %515 = math.exp %514 : vector<2x32xf32>
    %cst_112 = arith.constant 1.000000e+00 : f32
    %516 = vector.broadcast %cst_112 : f32 to vector<2x32xf32>
    %517 = arith.addf %516, %515 : vector<2x32xf32>
    %518 = arith.divf %516, %517 : vector<2x32xf32>
    %519 = vector.extract_strided_slice %501 {offsets = [0, 64], sizes = [2, 32], strides = [1, 1]} : vector<2x96xf32> to vector<2x32xf32>
    %520 = vector.extract_strided_slice %502 {offsets = [0, 64], sizes = [2, 32], strides = [1, 1]} : vector<2x96xf32> to vector<2x32xf32>
    %521 = vector.broadcast %23 : vector<1x32xf32> to vector<2x32xf32>
    %522 = arith.addf %520, %521 : vector<2x32xf32>
    %523 = arith.mulf %510, %522 : vector<2x32xf32>
    %524 = arith.addf %519, %523 : vector<2x32xf32>
    %525 = math.tanh %524 : vector<2x32xf32>
    %cst_113 = arith.constant 1.000000e+00 : f32
    %526 = vector.broadcast %cst_113 : f32 to vector<2x32xf32>
    %527 = arith.subf %526, %518 : vector<2x32xf32>
    %528 = arith.mulf %527, %525 : vector<2x32xf32>
    %529 = arith.mulf %518, %500 : vector<2x32xf32>
    %530 = arith.addf %528, %529 : vector<2x32xf32>
    %531 = vector.extract_strided_slice %439 {offsets = [0, 384], sizes = [2, 96], strides = [1, 1]} : vector<2x1024xf32> to vector<2x96xf32>
    %cst_114 = arith.constant dense<0.000000e+00> : vector<2x96xf32>
    %532 = tpu.matmul %530, %22, %cst_114 {dimension_numbers = #tpu.dot_dimension_numbers<[1], [0], [0], [1], [0, 0, 1, 1], [], []>} : vector<2x32xf32>, vector<32x96xf32>, vector<2x96xf32> -> vector<2x96xf32>
    %533 = vector.extract_strided_slice %531 {offsets = [0, 0], sizes = [2, 32], strides = [1, 1]} : vector<2x96xf32> to vector<2x32xf32>
    %534 = vector.extract_strided_slice %532 {offsets = [0, 0], sizes = [2, 32], strides = [1, 1]} : vector<2x96xf32> to vector<2x32xf32>
    %535 = arith.addf %533, %534 : vector<2x32xf32>
    %536 = arith.negf %535 : vector<2x32xf32>
    %537 = math.exp %536 : vector<2x32xf32>
    %cst_115 = arith.constant 1.000000e+00 : f32
    %538 = vector.broadcast %cst_115 : f32 to vector<2x32xf32>
    %539 = arith.addf %538, %537 : vector<2x32xf32>
    %540 = arith.divf %538, %539 : vector<2x32xf32>
    %541 = vector.extract_strided_slice %531 {offsets = [0, 32], sizes = [2, 32], strides = [1, 1]} : vector<2x96xf32> to vector<2x32xf32>
    %542 = vector.extract_strided_slice %532 {offsets = [0, 32], sizes = [2, 32], strides = [1, 1]} : vector<2x96xf32> to vector<2x32xf32>
    %543 = arith.addf %541, %542 : vector<2x32xf32>
    %544 = arith.negf %543 : vector<2x32xf32>
    %545 = math.exp %544 : vector<2x32xf32>
    %cst_116 = arith.constant 1.000000e+00 : f32
    %546 = vector.broadcast %cst_116 : f32 to vector<2x32xf32>
    %547 = arith.addf %546, %545 : vector<2x32xf32>
    %548 = arith.divf %546, %547 : vector<2x32xf32>
    %549 = vector.extract_strided_slice %531 {offsets = [0, 64], sizes = [2, 32], strides = [1, 1]} : vector<2x96xf32> to vector<2x32xf32>
    %550 = vector.extract_strided_slice %532 {offsets = [0, 64], sizes = [2, 32], strides = [1, 1]} : vector<2x96xf32> to vector<2x32xf32>
    %551 = vector.broadcast %23 : vector<1x32xf32> to vector<2x32xf32>
    %552 = arith.addf %550, %551 : vector<2x32xf32>
    %553 = arith.mulf %540, %552 : vector<2x32xf32>
    %554 = arith.addf %549, %553 : vector<2x32xf32>
    %555 = math.tanh %554 : vector<2x32xf32>
    %cst_117 = arith.constant 1.000000e+00 : f32
    %556 = vector.broadcast %cst_117 : f32 to vector<2x32xf32>
    %557 = arith.subf %556, %548 : vector<2x32xf32>
    %558 = arith.mulf %557, %555 : vector<2x32xf32>
    %559 = arith.mulf %548, %530 : vector<2x32xf32>
    %560 = arith.addf %558, %559 : vector<2x32xf32>
    %561 = vector.extract_strided_slice %439 {offsets = [0, 512], sizes = [2, 96], strides = [1, 1]} : vector<2x1024xf32> to vector<2x96xf32>
    %cst_118 = arith.constant dense<0.000000e+00> : vector<2x96xf32>
    %562 = tpu.matmul %560, %22, %cst_118 {dimension_numbers = #tpu.dot_dimension_numbers<[1], [0], [0], [1], [0, 0, 1, 1], [], []>} : vector<2x32xf32>, vector<32x96xf32>, vector<2x96xf32> -> vector<2x96xf32>
    %563 = vector.extract_strided_slice %561 {offsets = [0, 0], sizes = [2, 32], strides = [1, 1]} : vector<2x96xf32> to vector<2x32xf32>
    %564 = vector.extract_strided_slice %562 {offsets = [0, 0], sizes = [2, 32], strides = [1, 1]} : vector<2x96xf32> to vector<2x32xf32>
    %565 = arith.addf %563, %564 : vector<2x32xf32>
    %566 = arith.negf %565 : vector<2x32xf32>
    %567 = math.exp %566 : vector<2x32xf32>
    %cst_119 = arith.constant 1.000000e+00 : f32
    %568 = vector.broadcast %cst_119 : f32 to vector<2x32xf32>
    %569 = arith.addf %568, %567 : vector<2x32xf32>
    %570 = arith.divf %568, %569 : vector<2x32xf32>
    %571 = vector.extract_strided_slice %561 {offsets = [0, 32], sizes = [2, 32], strides = [1, 1]} : vector<2x96xf32> to vector<2x32xf32>
    %572 = vector.extract_strided_slice %562 {offsets = [0, 32], sizes = [2, 32], strides = [1, 1]} : vector<2x96xf32> to vector<2x32xf32>
    %573 = arith.addf %571, %572 : vector<2x32xf32>
    %574 = arith.negf %573 : vector<2x32xf32>
    %575 = math.exp %574 : vector<2x32xf32>
    %cst_120 = arith.constant 1.000000e+00 : f32
    %576 = vector.broadcast %cst_120 : f32 to vector<2x32xf32>
    %577 = arith.addf %576, %575 : vector<2x32xf32>
    %578 = arith.divf %576, %577 : vector<2x32xf32>
    %579 = vector.extract_strided_slice %561 {offsets = [0, 64], sizes = [2, 32], strides = [1, 1]} : vector<2x96xf32> to vector<2x32xf32>
    %580 = vector.extract_strided_slice %562 {offsets = [0, 64], sizes = [2, 32], strides = [1, 1]} : vector<2x96xf32> to vector<2x32xf32>
    %581 = vector.broadcast %23 : vector<1x32xf32> to vector<2x32xf32>
    %582 = arith.addf %580, %581 : vector<2x32xf32>
    %583 = arith.mulf %570, %582 : vector<2x32xf32>
    %584 = arith.addf %579, %583 : vector<2x32xf32>
    %585 = math.tanh %584 : vector<2x32xf32>
    %cst_121 = arith.constant 1.000000e+00 : f32
    %586 = vector.broadcast %cst_121 : f32 to vector<2x32xf32>
    %587 = arith.subf %586, %578 : vector<2x32xf32>
    %588 = arith.mulf %587, %585 : vector<2x32xf32>
    %589 = arith.mulf %578, %560 : vector<2x32xf32>
    %590 = arith.addf %588, %589 : vector<2x32xf32>
    %591 = vector.extract_strided_slice %439 {offsets = [0, 640], sizes = [2, 96], strides = [1, 1]} : vector<2x1024xf32> to vector<2x96xf32>
    %cst_122 = arith.constant dense<0.000000e+00> : vector<2x96xf32>
    %592 = tpu.matmul %590, %22, %cst_122 {dimension_numbers = #tpu.dot_dimension_numbers<[1], [0], [0], [1], [0, 0, 1, 1], [], []>} : vector<2x32xf32>, vector<32x96xf32>, vector<2x96xf32> -> vector<2x96xf32>
    %593 = vector.extract_strided_slice %591 {offsets = [0, 0], sizes = [2, 32], strides = [1, 1]} : vector<2x96xf32> to vector<2x32xf32>
    %594 = vector.extract_strided_slice %592 {offsets = [0, 0], sizes = [2, 32], strides = [1, 1]} : vector<2x96xf32> to vector<2x32xf32>
    %595 = arith.addf %593, %594 : vector<2x32xf32>
    %596 = arith.negf %595 : vector<2x32xf32>
    %597 = math.exp %596 : vector<2x32xf32>
    %cst_123 = arith.constant 1.000000e+00 : f32
    %598 = vector.broadcast %cst_123 : f32 to vector<2x32xf32>
    %599 = arith.addf %598, %597 : vector<2x32xf32>
    %600 = arith.divf %598, %599 : vector<2x32xf32>
    %601 = vector.extract_strided_slice %591 {offsets = [0, 32], sizes = [2, 32], strides = [1, 1]} : vector<2x96xf32> to vector<2x32xf32>
    %602 = vector.extract_strided_slice %592 {offsets = [0, 32], sizes = [2, 32], strides = [1, 1]} : vector<2x96xf32> to vector<2x32xf32>
    %603 = arith.addf %601, %602 : vector<2x32xf32>
    %604 = arith.negf %603 : vector<2x32xf32>
    %605 = math.exp %604 : vector<2x32xf32>
    %cst_124 = arith.constant 1.000000e+00 : f32
    %606 = vector.broadcast %cst_124 : f32 to vector<2x32xf32>
    %607 = arith.addf %606, %605 : vector<2x32xf32>
    %608 = arith.divf %606, %607 : vector<2x32xf32>
    %609 = vector.extract_strided_slice %591 {offsets = [0, 64], sizes = [2, 32], strides = [1, 1]} : vector<2x96xf32> to vector<2x32xf32>
    %610 = vector.extract_strided_slice %592 {offsets = [0, 64], sizes = [2, 32], strides = [1, 1]} : vector<2x96xf32> to vector<2x32xf32>
    %611 = vector.broadcast %23 : vector<1x32xf32> to vector<2x32xf32>
    %612 = arith.addf %610, %611 : vector<2x32xf32>
    %613 = arith.mulf %600, %612 : vector<2x32xf32>
    %614 = arith.addf %609, %613 : vector<2x32xf32>
    %615 = math.tanh %614 : vector<2x32xf32>
    %cst_125 = arith.constant 1.000000e+00 : f32
    %616 = vector.broadcast %cst_125 : f32 to vector<2x32xf32>
    %617 = arith.subf %616, %608 : vector<2x32xf32>
    %618 = arith.mulf %617, %615 : vector<2x32xf32>
    %619 = arith.mulf %608, %590 : vector<2x32xf32>
    %620 = arith.addf %618, %619 : vector<2x32xf32>
    %621 = vector.extract_strided_slice %439 {offsets = [0, 768], sizes = [2, 96], strides = [1, 1]} : vector<2x1024xf32> to vector<2x96xf32>
    %cst_126 = arith.constant dense<0.000000e+00> : vector<2x96xf32>
    %622 = tpu.matmul %620, %22, %cst_126 {dimension_numbers = #tpu.dot_dimension_numbers<[1], [0], [0], [1], [0, 0, 1, 1], [], []>} : vector<2x32xf32>, vector<32x96xf32>, vector<2x96xf32> -> vector<2x96xf32>
    %623 = vector.extract_strided_slice %621 {offsets = [0, 0], sizes = [2, 32], strides = [1, 1]} : vector<2x96xf32> to vector<2x32xf32>
    %624 = vector.extract_strided_slice %622 {offsets = [0, 0], sizes = [2, 32], strides = [1, 1]} : vector<2x96xf32> to vector<2x32xf32>
    %625 = arith.addf %623, %624 : vector<2x32xf32>
    %626 = arith.negf %625 : vector<2x32xf32>
    %627 = math.exp %626 : vector<2x32xf32>
    %cst_127 = arith.constant 1.000000e+00 : f32
    %628 = vector.broadcast %cst_127 : f32 to vector<2x32xf32>
    %629 = arith.addf %628, %627 : vector<2x32xf32>
    %630 = arith.divf %628, %629 : vector<2x32xf32>
    %631 = vector.extract_strided_slice %621 {offsets = [0, 32], sizes = [2, 32], strides = [1, 1]} : vector<2x96xf32> to vector<2x32xf32>
    %632 = vector.extract_strided_slice %622 {offsets = [0, 32], sizes = [2, 32], strides = [1, 1]} : vector<2x96xf32> to vector<2x32xf32>
    %633 = arith.addf %631, %632 : vector<2x32xf32>
    %634 = arith.negf %633 : vector<2x32xf32>
    %635 = math.exp %634 : vector<2x32xf32>
    %cst_128 = arith.constant 1.000000e+00 : f32
    %636 = vector.broadcast %cst_128 : f32 to vector<2x32xf32>
    %637 = arith.addf %636, %635 : vector<2x32xf32>
    %638 = arith.divf %636, %637 : vector<2x32xf32>
    %639 = vector.extract_strided_slice %621 {offsets = [0, 64], sizes = [2, 32], strides = [1, 1]} : vector<2x96xf32> to vector<2x32xf32>
    %640 = vector.extract_strided_slice %622 {offsets = [0, 64], sizes = [2, 32], strides = [1, 1]} : vector<2x96xf32> to vector<2x32xf32>
    %641 = vector.broadcast %23 : vector<1x32xf32> to vector<2x32xf32>
    %642 = arith.addf %640, %641 : vector<2x32xf32>
    %643 = arith.mulf %630, %642 : vector<2x32xf32>
    %644 = arith.addf %639, %643 : vector<2x32xf32>
    %645 = math.tanh %644 : vector<2x32xf32>
    %cst_129 = arith.constant 1.000000e+00 : f32
    %646 = vector.broadcast %cst_129 : f32 to vector<2x32xf32>
    %647 = arith.subf %646, %638 : vector<2x32xf32>
    %648 = arith.mulf %647, %645 : vector<2x32xf32>
    %649 = arith.mulf %638, %620 : vector<2x32xf32>
    %650 = arith.addf %648, %649 : vector<2x32xf32>
    %651 = vector.extract_strided_slice %439 {offsets = [0, 896], sizes = [2, 96], strides = [1, 1]} : vector<2x1024xf32> to vector<2x96xf32>
    %cst_130 = arith.constant dense<0.000000e+00> : vector<2x96xf32>
    %652 = tpu.matmul %650, %22, %cst_130 {dimension_numbers = #tpu.dot_dimension_numbers<[1], [0], [0], [1], [0, 0, 1, 1], [], []>} : vector<2x32xf32>, vector<32x96xf32>, vector<2x96xf32> -> vector<2x96xf32>
    %653 = vector.extract_strided_slice %651 {offsets = [0, 0], sizes = [2, 32], strides = [1, 1]} : vector<2x96xf32> to vector<2x32xf32>
    %654 = vector.extract_strided_slice %652 {offsets = [0, 0], sizes = [2, 32], strides = [1, 1]} : vector<2x96xf32> to vector<2x32xf32>
    %655 = arith.addf %653, %654 : vector<2x32xf32>
    %656 = arith.negf %655 : vector<2x32xf32>
    %657 = math.exp %656 : vector<2x32xf32>
    %cst_131 = arith.constant 1.000000e+00 : f32
    %658 = vector.broadcast %cst_131 : f32 to vector<2x32xf32>
    %659 = arith.addf %658, %657 : vector<2x32xf32>
    %660 = arith.divf %658, %659 : vector<2x32xf32>
    %661 = vector.extract_strided_slice %651 {offsets = [0, 32], sizes = [2, 32], strides = [1, 1]} : vector<2x96xf32> to vector<2x32xf32>
    %662 = vector.extract_strided_slice %652 {offsets = [0, 32], sizes = [2, 32], strides = [1, 1]} : vector<2x96xf32> to vector<2x32xf32>
    %663 = arith.addf %661, %662 : vector<2x32xf32>
    %664 = arith.negf %663 : vector<2x32xf32>
    %665 = math.exp %664 : vector<2x32xf32>
    %cst_132 = arith.constant 1.000000e+00 : f32
    %666 = vector.broadcast %cst_132 : f32 to vector<2x32xf32>
    %667 = arith.addf %666, %665 : vector<2x32xf32>
    %668 = arith.divf %666, %667 : vector<2x32xf32>
    %669 = vector.extract_strided_slice %651 {offsets = [0, 64], sizes = [2, 32], strides = [1, 1]} : vector<2x96xf32> to vector<2x32xf32>
    %670 = vector.extract_strided_slice %652 {offsets = [0, 64], sizes = [2, 32], strides = [1, 1]} : vector<2x96xf32> to vector<2x32xf32>
    %671 = vector.broadcast %23 : vector<1x32xf32> to vector<2x32xf32>
    %672 = arith.addf %670, %671 : vector<2x32xf32>
    %673 = arith.mulf %660, %672 : vector<2x32xf32>
    %674 = arith.addf %669, %673 : vector<2x32xf32>
    %675 = math.tanh %674 : vector<2x32xf32>
    %cst_133 = arith.constant 1.000000e+00 : f32
    %676 = vector.broadcast %cst_133 : f32 to vector<2x32xf32>
    %677 = arith.subf %676, %668 : vector<2x32xf32>
    %678 = arith.mulf %677, %675 : vector<2x32xf32>
    %679 = arith.mulf %668, %650 : vector<2x32xf32>
    %680 = arith.addf %678, %679 : vector<2x32xf32>
    %681 = vector.shape_cast %470 : vector<2x32xf32> to vector<2x1x32xf32>
    %682 = vector.shape_cast %500 : vector<2x32xf32> to vector<2x1x32xf32>
    %683 = vector.shape_cast %530 : vector<2x32xf32> to vector<2x1x32xf32>
    %684 = vector.shape_cast %560 : vector<2x32xf32> to vector<2x1x32xf32>
    %685 = vector.shape_cast %590 : vector<2x32xf32> to vector<2x1x32xf32>
    %686 = vector.shape_cast %620 : vector<2x32xf32> to vector<2x1x32xf32>
    %687 = vector.shape_cast %650 : vector<2x32xf32> to vector<2x1x32xf32>
    %688 = vector.shape_cast %680 : vector<2x32xf32> to vector<2x1x32xf32>
    %689 = tpu.concatenate %681, %682, %683, %684, %685, %686, %687, %688 in 1 : vector<2x1x32xf32>, vector<2x1x32xf32>, vector<2x1x32xf32>, vector<2x1x32xf32>, vector<2x1x32xf32>, vector<2x1x32xf32>, vector<2x1x32xf32>, vector<2x1x32xf32> -> vector<2x8x32xf32>
    %690 = vector.shape_cast %689 : vector<2x8x32xf32> to vector<16x32xf32>
    %cst_134 = arith.constant dense<0.000000e+00> : vector<16x4xf32>
    %691 = tpu.matmul %690, %24, %cst_134 {dimension_numbers = #tpu.dot_dimension_numbers<[1], [0], [0], [1], [0, 0, 1, 1], [], []>} : vector<16x32xf32>, vector<32x4xf32>, vector<16x4xf32> -> vector<16x4xf32>
    %692 = vector.broadcast %25 : vector<1x4xf32> to vector<16x4xf32>
    %693 = arith.addf %691, %692 : vector<16x4xf32>
    %694 = vector.shape_cast %693 : vector<16x4xf32> to vector<2x8x4xf32>
    %c0_135 = arith.constant 0 : index
    %c0_136 = arith.constant 0 : index
    %c0_137 = arith.constant 0 : index
    %695 = vector.load %arg5[%c0_135, %c0_136, %c0_137] : memref<2x8x4xf32, #tpu.memory_space<vmem>>, vector<2x8x4xf32>
    tpu.vector_store %arg5[%c0_135, %c0_136, %c0_137], %694 {strides = array<i32>} : memref<2x8x4xf32, #tpu.memory_space<vmem>>, vector<2x8x4xf32>,
    return
  }
  func.func @transform_0(%arg0: i32) -> (i32, i32, i32) {
    %c0_i32 = arith.constant 0 : i32
    %c0_i32_0 = arith.constant 0 : i32
    %c0_i32_1 = arith.constant 0 : i32
    %c0_i32_2 = arith.constant 0 : i32
    return %c0_i32, %c0_i32_0, %c0_i32_1 : i32, i32, i32
  }
  func.func @transform_1(%arg0: i32) -> (i32, i32) {
    %c0_i32 = arith.constant 0 : i32
    %c0_i32_0 = arith.constant 0 : i32
    %c0_i32_1 = arith.constant 0 : i32
    return %c0_i32, %c0_i32_0 : i32, i32
  }
  func.func @transform_2(%arg0: i32) -> (i32, i32) {
    %c0_i32 = arith.constant 0 : i32
    %c0_i32_0 = arith.constant 0 : i32
    %c0_i32_1 = arith.constant 0 : i32
    return %c0_i32, %c0_i32_0 : i32, i32
  }
  func.func @transform_3(%arg0: i32) -> (i32, i32) {
    %c0_i32 = arith.constant 0 : i32
    %c0_i32_0 = arith.constant 0 : i32
    %c0_i32_1 = arith.constant 0 : i32
    return %c0_i32, %c0_i32_0 : i32, i32
  }
  func.func @transform_4(%arg0: i32) -> (i32, i32, i32) {
    %c0_i32 = arith.constant 0 : i32
    %c0_i32_0 = arith.constant 0 : i32
    %c0_i32_1 = arith.constant 0 : i32
    %c0_i32_2 = arith.constant 0 : i32
    return %c0_i32, %c0_i32_0, %c0_i32_1 : i32, i32, i32
  }
}

</mosaic_0001>

<bundles_post_ra>
// kernel: mtad_gat_forward.1
= control target key start
LH: loop header
LB: loop body
LE: loop exit
PB: predicated region body
PF: predicated region fallthrough
CT: control target
= control target key end

     0   :  { %10 = vsyncpa [#allocation3], 0  ;;  %s5275_s0 = inlined_call_operand.vmem [shape: f32[2,14,4], index: 0, kind: input, shape index: {}]   ;;  %s5276_s1 = inlined_call_operand.hbm [shape: f32[352,128], index: 1, kind: input, shape index: {}]   ;;  %s5277_s2 = inlined_call_operand.hbm [shape: f32[40,1024], index: 2, kind: input, shape index: {}]   ;;  %s5278_s3 = inlined_call_operand.hbm [shape: f32[2,4], index: 3, kind: output, shape index: {0}]   ;;  %s5279_s4 = inlined_call_operand.vmem [shape: f32[2,8,4], index: 4, kind: output, shape index: {1}]  }
   0x1   :  { %11 = vsyncpa [#allocation6], 0 }
   0x2   :  { %12 = vsyncpa [#allocation4], 0  ;;  %s19_s17 = sshll.u32 %s5276_s1, 4  ;;  %s4211_s18 = smov [#allocation2]   ;;  %s20_s17 = int_to_ptr.hbm [resolvable:$true] %s19_s17 }
   0x3   :  { %s21_s19 = sshll.u32 %s4211_s18, 4  ;;  %s32_s22 = sshll.u32 %s5277_s2, 4  ;;  %s22_s19 = int_to_ptr.vmem [resolvable:$true] %s21_s19  ;;  %s33_s22 = int_to_ptr.hbm [resolvable:$true] %s32_s22 }
   0x4   :  { %s4212_s23 = smov 128   ;;  %s4213_s24 = smov 8  }
   0x5   :  { %27 = dma.hbm_to_vmem [thread:$0]  %s20_s17, 5632, %s22_s19, [#allocation3], %s4212_s23, %s4212_s23, %s4213_s24  }
   0x6   :  { %s4214_s25 = smov [#allocation5]   ;;  %s4215_s27 = smov 1024  }
   0x7   :  { %s34_s26 = sshll.u32 %s4214_s25, 4  ;;  %s4216_s28 = smov 64   ;;  %s35_s26 = int_to_ptr.vmem [resolvable:$true] %s34_s26 }
   0x8   :  { %40 = dma.hbm_to_vmem [thread:$0]  %s33_s22, 5120, %s35_s26, [#allocation6], %s4215_s27, %s4215_s27, %s4216_s28  }
   0x9   :  { %4205 = dma.done.wait [#allocation3], 5632  }
   0xa   :  { %4206 = vsyncadd [#allocation3], 4294961664 }
   0xb   :  { %4207 = dma.done.wait [#allocation6], 5120  }
   0xc   :  { %4208 = vsyncadd [#allocation6], 4294962176  ;;  %vm115_vm0 = vcmask 1043456   ;;  %vm101_vm1 = vcmask 1046528   ;;  %v49_v0 = vld [vmem:[#allocation2] sm:$0xff]  ;;  %v4256_v1 = vld [vmem:[%s5275_s0 + $0x10] sm:$0xff]  ;;  %v592_v29 = vlaneseq }
   0xd   :  { %v4261_v2 = vld [vmem:[%s5275_s0 + $0x18] sm:$0x3f]  ;;  %vm5280_vm2 = vcmask 31744   ;;  %vm170_vm3 = vcmask 1045504   ;;  %v109_v3 = vrot.slane %v49_v0, 4  ;;  %v105_v4 = vrot.slane %v4256_v1, 1 }
   0xe   :  { %v106_v5 = vrot.slane %v4261_v2, 1  ;;  %v50_v6 = vld [vmem:[#allocation2 + $0x8] sm:$0xff]  ;;  %v4268_v7 = vld [vmem:[%s5275_s0] sm:$0xff]  ;;  %vm209_vm4 = vcmask 1044480   ;;  %v4274_v8 = vld [vmem:[%s5275_s0 + $0x8] sm:$0x3f] }
   0xf   :  { %3797 = vmatpush.msk.msra.mxu2 %vm115_vm0, %v50_v6  ;;  %v171_v9 = vrot.slane %v4268_v7, 2  ;;  %v52_v10 = vld [vmem:[#allocation2 + $0x18] sm:$0xf]  ;;  %v216_v11 = vrot.slane %v50_v6, 4  ;;  %3889 = vmatpush.msk.msra.mxu1 %vm115_vm0, %v109_v3  ;;  %v172_v13 = vrot.slane %v4274_v8, 2  ;;  %v102_v14 = vrot.slane %v4268_v7, 1 }
  0x10   :  { %v107_v12 = vsel %vm101_vm1, %v105_v4, %v106_v5  ;;  %v103_v15 = vrot.slane %v4274_v8, 1  ;;  %v51_v16 = vld [vmem:[#allocation2 + $0x10] sm:$0xff]  ;;  %3791 = vmatpush.msk.msra.mxu0 %vm115_vm0, %v109_v3  ;;  %v210_v17 = vrot.slane %v4268_v7, 3  ;;  %v211_v18 = vrot.slane %v4274_v8, 3  ;;  %v3906_v6 = vld [vmem:[#allocation2 + $0x20] ss:$0 sm:$0xff] }
  0x11   :  { %3809 = vmatpush.msk.msrb.mxu2 %vm115_vm0, %v52_v10  ;;  %3793 = vmatmul.msk.f32.vlgmr.msra.gmra.mxu1 %vm5280_vm2, %v107_v12  ;;  %v293_v19 = vrot.slane %v51_v16, 4  ;;  %v173_v20 = vsel %vm170_vm3, %v171_v9, %v172_v13  ;;  %v174_v23 = vrot.slane %v4256_v1, 2  ;;  %v175_v24 = vrot.slane %v4261_v2, 2  ;;  %v4316_v38 = vld [vmem:[#allocation2 + $0x70] sm:$0xff]  ;;  %s4219_s0 = smov 96   ;;  %s3776_s11 = sshll.u32 %s5278_s3, 4  ;;  %s3777_s11 = int_to_ptr.hbm [resolvable:$true] %s3776_s11 }
  0x12   :  { %3794 = vmatpush.msk.msrb.mxu1 %vm115_vm0, %v49_v0  ;;  %3800 = vmatpush.msk.msra.mxu3 %vm115_vm0, %v216_v11  ;;  %v104_v21 = vsel %vm101_vm1, %v102_v14, %v103_v15  ;;  %v212_v22 = vsel %vm209_vm4, %v210_v17, %v211_v18  ;;  %v248_v25 = vrot.slane %v4268_v7, 4  ;;  %v249_v26 = vrot.slane %v4274_v8, 4  ;;  %v59_v51 = vld [vmem:[#allocation2 + $0x50] sm:$0xf]  ;;  %s4220_s12 = smov [#allocation7]  }
  0x13   :  { %3798 = vmatmul.msk.f32.vlgmr.msra.gmra.mxu2 %vm5280_vm2, %v173_v20  ;;  %3792 = vmatmul.msk.f32.vlgmr.msra.gmra.mxu0 %vm5280_vm2, %v104_v21  ;;  %v213_v27 = vrot.slane %v4256_v1, 3  ;;  %v214_v28 = vrot.slane %v4261_v2, 3  ;;  %v176_v30 = vsel %vm170_vm3, %v174_v23, %v175_v24  ;;  %v593_v33 = vshrl.u32 %v592_v29, 7  ;;  %v55_v20 = vld [vmem:[#allocation2 + $0x30] sm:$0xff]  ;;  %s3774_s13 = sshll.u32 %s4220_s12, 4  ;;  %s3775_s13 = int_to_ptr.vmem [resolvable:$true] %s3774_s13 }
  0x14   :  { %3801 = vmatmul.msk.f32.vlgmr.msra.gmra.mxu3 %vm5280_vm2, %v212_v22  ;;  %3806 = vmatpush.msk.msra.mxu1 %vm115_vm0, %v293_v19  ;;  %v250_v31 = vsel %vm115_vm0, %v248_v25, %v249_v26  ;;  %v326_v34 = vrot.slane %v4268_v7, 6  ;;  %v327_v35 = vrot.slane %v4274_v8, 6  ;;  %v251_v36 = vrot.slane %v4256_v1, 4  ;;  %v54_v19 = vld [vmem:[#allocation2 + $0x28] sm:$0xff] }
  0x15   :  { %3803 = vmatpush.msk.msrb.mxu0 %vm115_vm0, %v51_v16  ;;  %v215_v32 = vsel %vm209_vm4, %v213_v27, %v214_v28  ;;  %v252_v37 = vrot.slane %v4261_v2, 4  ;;  %3902 = vset.pattern.permute.xlu0 %v593_v33  ;;  %vm325_vm5 = vcmask 1041408   ;;  %v1285_v41 = vperm.slane %v4316_v38, 3  ;;  %v58_v22 = vld [vmem:[#allocation2 + $0x48] sm:$0xf] }
  0x16   :  { %3900 = vset.pattern.permute.xlu1 %v593_v33  ;;  %3901 = vset.pattern.permute.xlu2 %v593_v33  ;;  %v328_v39 = vsel %vm325_vm5, %v326_v34, %v327_v35  ;;  %v287_v42 = vrot.slane %v4268_v7, 5  ;;  %v288_v43 = vrot.slane %v4274_v8, 5  ;;  %vm286_vm6 = vcmask 1042432  }
  0x17   :  { %v253_v40 = vsel %vm115_vm0, %v251_v36, %v252_v37  ;;  %v329_v44 = vrot.slane %v4256_v1, 6  ;;  %v330_v45 = vrot.slane %v4261_v2, 6  ;;  %v290_v48 = vrot.slane %v4256_v1, 5  ;;  %3820 = vmatpush.msk.msra.mxu2 %vm115_vm0, %v59_v51  ;;  %457 = vmatpush.msrb.mxu3 %v54_v19 }
  0x18   :  { %v289_v46 = vsel %vm286_vm6, %v287_v42, %v288_v43  ;;  %v291_v49 = vrot.slane %v4261_v2, 5  ;;  %v591_v23 = vperm.slane %v58_v22, 0  ;;  %v1264_v25 = vperm.slane %v4316_v38, 0 }
  0x19   :  { %3795 = vmatmul.msk.f32.vlgmr.msrb.gmra.mxu1 %vm5280_vm2, %v4268_v7  ;;  %v331_v47 = vsel %vm325_vm5, %v329_v44, %v330_v45  ;;  %483 = vmatpush.msra.mxu3 %v55_v20  ;;  %v1271_v27 = vperm.slane %v4316_v38, 1  ;;  %v598_v28 = vperm.slane %v58_v22, 1  ;;  %vm439_vm7 = vcmask 64512  }
  0x1a   :  { %v292_v50 = vsel %vm286_vm6, %v290_v48, %v291_v49  ;;  %v605_v33 = vperm.slane %v58_v22, 2  ;;  %v1299_v35 = vperm.slane %v4316_v38, 5  ;;  %v1278_v36 = vperm.slane %v4316_v38, 2  ;;  %v4368_v49 = vld [vmem:[#allocation2 + $0x38] ss:$0 sm:$0xff] }
  0x1b   :  { %3799 = vmatmul.msk.f32.gmra.mxu2 %vm5280_vm2, %v176_v30  ;;  %3804 = vmatmul.msk.f32.vlgmr.msrb.gmra.mxu0 %vm5280_vm2, %v250_v31  ;;  %v60_v30 = vld [vmem:[#allocation2 + $0x58] sm:$0xf]  ;;  %v1306_v37 = vperm.slane %v4316_v38, 6  ;;  %vm565_vm10 = vcmask 125952  }
  0x1c   :  { %3802 = vmatmul.msk.f32.gmra.mxu3 %vm5280_vm2, %v215_v32  ;;  %v612_v32 = vperm.slane %v58_v22, 3 }
  0x1d   :  { %1290 = vperm.xlu0 %3902, %v1285_v41  }
  0x1e   :  { %596 = vperm.xlu1 %3900, %v591_v23   ;;  %603 = vperm.xlu2 %3901, %v598_v28  }
  0x21   :  { %3796 = vmatmul.msk.f32.gmra.mxu1 %vm5280_vm2, %v4256_v1 }
  0x23   :  { %3810 = vmatmul.msk.f32.vlgmr.msrb.gmra.mxu2 %vm5280_vm2, %v328_v39  ;;  %3805 = vmatmul.msk.f32.gmra.mxu0 %vm5280_vm2, %v253_v40  ;;  %v1292_v39 = vperm.slane %v4316_v38, 4  ;;  %v1313_v40 = vperm.slane %v4316_v38, 7 }
  0x26   :  { %1269 = vperm.xlu1 %3900, %v1264_v25   ;;  %610 = vperm.xlu2 %3901, %v605_v33  }
  0x29   :  { %3807 = vmatmul.msk.f32.vlgmr.msra.gmra.mxu1 %vm5280_vm2, %v289_v46 }
  0x2b   :  { %3811 = vmatmul.msk.f32.gmra.mxu2 %vm5280_vm2, %v331_v47 }
  0x2e   :  { %1276 = vperm.xlu1 %3900, %v1271_v27   ;;  %1283 = vperm.xlu2 %3901, %v1278_v36  }
  0x31   :  { %3808 = vmatmul.msk.f32.gmra.mxu1 %vm5280_vm2, %v292_v50 }
  0x36   :  { %617 = vperm.xlu1 %3900, %v612_v32   ;;  %1297 = vperm.xlu2 %3901, %v1292_v39   ;;  %v4393_v32 = vld [vmem:[#allocation2 + $0x68] ss:$0 sm:$0xff] }
  0x3e   :  { %1304 = vperm.xlu1 %3900, %v1299_v35  }
  0x46   :  { %1311 = vperm.xlu1 %3900, %v1306_v37  }
  0x4e   :  { %1318 = vperm.xlu1 %3900, %v1313_v40  }
  0x8e   :  { %v138_v52 = vpop.f32.mrf.mxu1 }
  0x8f   :  { %v4348_v21 = vpop.permute.xlu0 %1290 }
  0x90   :  { %v135_v53 = vpop.f32.mrf.mxu0 }
  0x96   :  { %v164_v54 = vpop.f32.mrf.mxu1  ;;  %v201_v55 = vpop.f32.mrf.mxu2 }
  0x97   :  { %v165_v56 = vadd.f32 %v164_v54, %v135_v53  ;;  %v240_v57 = vpop.f32.mrf.mxu3 }
  0x98   :  { %v278_v61 = vpop.f32.mrf.mxu0 }
  0x99   :  { %v207_v58 = vadd.f32 %v201_v55, %v165_v56 }
  0x9b   :  { %v246_v62 = vadd.f32 %v240_v57, %v207_v58 }
  0x9d   :  { %v284_v0 = vadd.f32 %v278_v61, %v246_v62 }
  0x9e   :  { %v167_v59 = vpop.f32.mrf.mxu1  ;;  %v204_v60 = vpop.f32.mrf.mxu2 }
  0x9f   :  { %v168_v63 = vadd.f32 %v167_v59, %v138_v52  ;;  %v243_v2 = vpop.f32.mrf.mxu3 }
  0xa0   :  { %v281_v9 = vpop.f32.mrf.mxu0 }
  0xa1   :  { %v208_v1 = vadd.f32 %v204_v60, %v168_v63  ;;  %v4375_v63 = vld [vmem:[#allocation2 + $0x40] ss:$0 sm:$0xff] }
  0xa3   :  { %v247_v7 = vadd.f32 %v243_v2, %v208_v1 }
  0xa5   :  { %v285_v11 = vadd.f32 %v281_v9, %v247_v7 }
  0xa6   :  { %v317_v3 = vpop.f32.mrf.mxu1  ;;  %v356_v4 = vpop.f32.mrf.mxu2 }
  0xa7   :  { %v323_v5 = vadd.f32 %v317_v3, %v284_v0 }
  0xa9   :  { %v362_v8 = vadd.f32 %v356_v4, %v323_v5 }
  0xab   :  { %v365_v10 = vadd.f32 %v3906_v6, %v362_v8 }
  0xad   :  { %v4338_v12 = vmax.f32 %v365_v10, 0.0 }
  0xae   :  { %v320_v13 = vpop.f32.mrf.mxu1  ;;  %v359_v14 = vpop.f32.mrf.mxu2 }
  0xaf   :  { %v324_v15 = vadd.f32 %v320_v13, %v285_v11  ;;  %369 = vxpose.xlu0.b32.start.end [1/1] (short) (narrow) %v4338_v12, 8  ;;  %3821 = vmatmul.msk.f32.vlgmr.msra.gmra.mxu2 %vm5280_vm2, %v4338_v12  ;;  %v4380_v11 = vld [vmem:[#allocation2 + $0x60] ss:$0 sm:$0xff] }
  0xb1   :  { %v363_v16 = vadd.f32 %v359_v14, %v324_v15 }
  0xb3   :  { %v366_v17 = vadd.f32 %v3906_v6, %v363_v16 }
  0xb5   :  { %v4343_v18 = vmax.f32 %v366_v17, 0.0 }
  0xb7   :  { %401 = vxpose.xlu0.b32.start.end [1/1] (short) (narrow) %v4343_v18, 8  ;;  %3822 = vmatmul.msk.f32.gmra.mxu2 %vm5280_vm2, %v4343_v18 }
 0x132   :  { %v4370_v53 = vpop.f32.mrf.mxu2 }
 0x133   :  { %v1085_v0 = vperm.slane %v4370_v53, 0  ;;  %v1071_v2 = vrot.slane %v4370_v53, 1  ;;  %v1072_v22 = vrot.slane %v4370_v53, 2  ;;  %v1076_v35 = vrot.slane %v4370_v53, 6 }
 0x153   :  { %v385_v24 = vpop.trf.xlu0 }
 0x154   :  { %435 = vst [vmem:[#allocation1] ss:$2 sm:$0xff] %v385_v24  ;;  %3814 = vmatpush.msk.msra.mxu0 %vm115_vm0, %v385_v24 }
 0x156   :  { %1750 = vmatpush.msrb.mxu0 %v4338_v12 }
 0x15b   :  { %v417_v26 = vpop.trf.xlu0 }
 0x15c   :  { %437 = vst [vmem:[#allocation1 + $0x1] ss:$2 sm:$0xff] %v417_v26  ;;  %3816 = vmatpush.msk.msrb.mxu1 %vm115_vm0, %v417_v26 }
 0x15e   :  { %1819 = vmatpush.msra.mxu1 %v4343_v18 }
 0x163   :  { %v438_v31 = vld.sshfl [vmem:[#allocation1] sm:$0xff pattern:$0x75316420] }
 0x164   :  { %3812 = vmatmul.msk.f32.vlgmr.msrb.gmra.mxu3 %vm439_vm7, %v438_v31  ;;  %462 = vst [vmem:[#allocation1] ss:$2 sm:$0xff] %v385_v24 }
 0x165   :  { %464 = vst [vmem:[#allocation1 + $0x1] ss:$2 sm:$0xff] %v417_v26  ;;  %3823 = vmatpush.msk.msrb.mxu3 %vm115_vm0, %v60_v30  ;;  %v1086_v26 = vperm.slane %v1071_v2, 0 }
 0x16c   :  { %v465_v34 = vld.sshfl [vmem:[#allocation1] sm:$0xff pattern:$0x75316420] }
 0x16d   :  { %3813 = vmatmul.msk.f32.vlgmr.msra.gmra.mxu3 %vm439_vm7, %v465_v34 }
 0x175   :  { %3824 = vmatmul.msk.f32.vlgmr.msrb.gmra.mxu3 %vm5280_vm2, %v4338_v12 }
 0x17d   :  { %3825 = vmatmul.msk.f32.gmra.mxu3 %vm5280_vm2, %v4343_v18 }
 0x1e7   :  { %v459_v41 = vpop.f32.mrf.mxu3 }
 0x1e8   :  { %v489_v42 = vrot.slane %v459_v41, 1  ;;  %v490_v43 = vrot.slane %v459_v41, 2  ;;  %v492_v44 = vrot.slane %v459_v41, 4  ;;  %v491_v45 = vrot.slane %v459_v41, 3 }
 0x1e9   :  { %v499_v46 = vperm.slane %v459_v41, 0  ;;  %v494_v52 = vrot.slane %v459_v41, 6  ;;  %v493_v7 = vrot.slane %v459_v41, 5  ;;  %v495_v13 = vrot.slane %v459_v41, 7 }
 0x1ea   :  { %v500_v47 = vperm.slane %v489_v42, 0  ;;  %v501_v48 = vperm.slane %v490_v43, 0  ;;  %v503_v51 = vperm.slane %v492_v44, 0  ;;  %v502_v57 = vperm.slane %v491_v45, 0 }
 0x1eb   :  { %v505_v1 = vperm.slane %v494_v52, 0  ;;  %v504_v31 = vperm.slane %v493_v7, 0  ;;  %v506_v34 = vperm.slane %v495_v13, 0  ;;  %v1077_v13 = vrot.slane %v4370_v53, 7 }
 0x1f0   :  { %v485_v50 = vpop.f32.mrf.mxu3 }
 0x1f1   :  { %v497_v38 = vrot.slane %v485_v50, 4  ;;  %v515_v54 = vadd.f32 %v499_v46, %v485_v50  ;;  %v516_v55 = vadd.f32 %v500_v47, %v485_v50  ;;  %v517_v56 = vadd.f32 %v501_v48, %v485_v50 }
 0x1f2   :  { %v518_v62 = vadd.f32 %v502_v57, %v485_v50  ;;  %v1087_v46 = vperm.slane %v1072_v22, 0  ;;  %v1073_v50 = vrot.slane %v4370_v53, 3 }
 0x1f3   :  { %v526_v58 = vadd.f32 %v4368_v49, %v517_v56  ;;  %v524_v59 = vadd.f32 %v4368_v49, %v515_v54  ;;  %v525_v60 = vadd.f32 %v4368_v49, %v516_v55  ;;  %v519_v61 = vadd.f32 %v503_v51, %v497_v38 }
 0x1f4   :  { %v521_v6 = vadd.f32 %v505_v1, %v497_v38  ;;  %v527_v20 = vadd.f32 %v4368_v49, %v518_v62  ;;  %v520_v39 = vadd.f32 %v504_v31, %v497_v38  ;;  %v522_v45 = vadd.f32 %v506_v34, %v497_v38 }
 0x1f5   :  { %vm534_vm8 = vcmp.ge.f32.partialorder %v526_v58, 0.0  ;;  %v542_v3 = vmul.f32 0.2, %v526_v58  ;;  %vm532_vm9 = vcmp.ge.f32.partialorder %v524_v59, 0.0  ;;  %v540_v4 = vmul.f32 0.2, %v524_v59 }
 0x1f6   :  { %v528_v5 = vadd.f32 %v4368_v49, %v519_v61  ;;  %v541_v10 = vmul.f32 0.2, %v525_v60  ;;  %vm533_vm11 = vcmp.ge.f32.partialorder %v525_v60, 0.0  ;;  %v530_v25 = vadd.f32 %v4368_v49, %v521_v6 }
 0x1f7   :  { %v550_v8 = vsel %vm534_vm8, %v526_v58, %v542_v3  ;;  %v548_v9 = vsel %vm532_vm9, %v524_v59, %v540_v4  ;;  %v543_v37 = vmul.f32 0.2, %v527_v20  ;;  %vm535_vm14 = vcmp.ge.f32.partialorder %v527_v20, 0.0 }
 0x1f8   :  { %v4382_v14 = vpop.f32.mrf.mxu3  ;;  %v559_v15 = vmul.f32 %v4375_v63, %v550_v8  ;;  %v557_v16 = vmul.f32 %v4375_v63, %v548_v9  ;;  %vm536_vm12 = vcmp.ge.f32.partialorder %v528_v5, 0.0  ;;  %v544_v17 = vmul.f32 0.2, %v528_v5 }
 0x1f9   :  { %v1117_v19 = vadd.f32 %v1085_v0, %v4382_v14  ;;  %v549_v27 = vsel %vm533_vm11, %v525_v60, %v541_v10  ;;  %v1118_v33 = vadd.f32 %v1086_v26, %v4382_v14  ;;  %v546_v44 = vmul.f32 0.2, %v530_v25 }
 0x1fa   :  { %v572_v23 = vsel %vm565_vm10, %v559_v15, 0.0  ;;  %v566_v24 = vsel %vm565_vm10, %v557_v16, 0.0  ;;  %v552_v28 = vsel %vm536_vm12, %v528_v5, %v544_v17  ;;  %v558_v40 = vmul.f32 %v4375_v63, %v549_v27  ;;  %v4418_v15 = vpop.f32.mrf.mxu2 }
 0x1fb   :  { %573 = vadd.xlane.f32.xlu0 %v572_v23  ;;  %567 = vadd.xlane.f32.xlu1 %v566_v24  ;;  %v1134_v30 = vadd.f32 %v4380_v11, %v1117_v19  ;;  %v561_v41 = vmul.f32 %v4375_v63, %v552_v28  ;;  %v1135_v42 = vadd.f32 %v4380_v11, %v1118_v33  ;;  %vm538_vm15 = vcmp.ge.f32.partialorder %v530_v25, 0.0 }
 0x1fc   :  { %v551_v51 = vsel %vm535_vm14, %v527_v20, %v543_v37  ;;  %v1119_v52 = vadd.f32 %v1087_v46, %v4382_v14  ;;  %v1074_v54 = vrot.slane %v4370_v53, 4  ;;  %v569_v55 = vsel %vm565_vm10, %v558_v40, 0.0 }
 0x1fd   :  { %vm1150_vm13 = vcmp.ge.f32.partialorder %v1134_v30, 0.0  ;;  %v1166_v36 = vmul.f32 0.2, %v1134_v30  ;;  %v1167_v48 = vmul.f32 0.2, %v1135_v42  ;;  %vm1151_vm8 = vcmp.ge.f32.partialorder %v1135_v42, 0.0 }
 0x1fe   :  { %v578_v56 = vsel %vm565_vm10, %v561_v41, 0.0  ;;  %v529_v38 = vadd.f32 %v4368_v49, %v520_v39  ;;  %v554_v58 = vsel %vm538_vm15, %v530_v25, %v546_v44  ;;  %v531_v59 = vadd.f32 %v4368_v49, %v522_v45 }
 0x1ff   :  { %v1182_v43 = vsel %vm1150_vm13, %v1134_v30, %v1166_v36  ;;  %v1183_v60 = vsel %vm1151_vm8, %v1135_v42, %v1167_v48  ;;  %v1136_v61 = vadd.f32 %v4380_v11, %v1119_v52  ;;  %v1091_v62 = vperm.slane %v1076_v35, 0 }
 0x200   :  { %v1199_v47 = vmul.f32 %v4393_v32, %v1182_v43  ;;  %v560_v0 = vmul.f32 %v4375_v63, %v551_v51  ;;  %v1088_v1 = vperm.slane %v1073_v50, 0  ;;  %v1089_v2 = vperm.slane %v1074_v54, 0 }
 0x201   :  { %v563_v3 = vmul.f32 %v4375_v63, %v554_v58  ;;  %vm537_vm9 = vcmp.ge.f32.partialorder %v529_v38, 0.0  ;;  %v545_v4 = vmul.f32 0.2, %v529_v38  ;;  %v1123_v5 = vadd.f32 %v1091_v62, %v4382_v14 }
 0x202   :  { %v1215_v57 = vsel %vm439_vm7, %v1199_v47, 0.0  ;;  %v1200_v6 = vmul.f32 %v4393_v32, %v1183_v60  ;;  %v547_v7 = vmul.f32 0.2, %v531_v59  ;;  %v1120_v49 = vadd.f32 %v1088_v1, %v4382_v14 }
 0x203   :  { %570 = vadd.xlane.f32.xlu1 %v569_v55  ;;  %579 = vadd.xlane.f32.xlu0 %v578_v56  ;;  %v1121_v8 = vadd.f32 %v1089_v2, %v4382_v14  ;;  %vm539_vm11 = vcmp.ge.f32.partialorder %v531_v59, 0.0  ;;  %v1168_v9 = vmul.f32 0.2, %v1136_v61  ;;  %v1075_v10 = vrot.slane %v4370_v53, 5  ;;  %v4426_v53 = vpop.f32.mrf.mxu3 }
 0x204   :  { %1216 = vadd.xlane.f32.xlu2 %v1215_v57  ;;  %vm1152_vm12 = vcmp.ge.f32.partialorder %v1136_v61, 0.0  ;;  %v575_v16 = vsel %vm565_vm10, %v560_v0, 0.0  ;;  %v584_v17 = vsel %vm565_vm10, %v563_v3, 0.0  ;;  %v553_v19 = vsel %vm537_vm9, %v529_v38, %v545_v4 }
 0x205   :  { %v1140_v20 = vadd.f32 %v4380_v11, %v1123_v5  ;;  %v1218_v22 = vsel %vm439_vm7, %v1200_v6, 0.0  ;;  %v555_v23 = vsel %vm539_vm11, %v531_v59, %v547_v7  ;;  %v1137_v24 = vadd.f32 %v4380_v11, %v1120_v49 }
 0x206   :  { %v1138_v25 = vadd.f32 %v4380_v11, %v1121_v8  ;;  %v1184_v26 = vsel %vm1152_vm12, %v1136_v61, %v1168_v9  ;;  %v1090_v27 = vperm.slane %v1075_v10, 0  ;;  %v1092_v28 = vperm.slane %v1077_v13, 0 }
 0x207   :  { %v562_v30 = vmul.f32 %v4375_v63, %v553_v19  ;;  %v1093_v31 = vperm.slane %v4418_v15, 0  ;;  %v1082_v33 = vrot.slane %v4418_v15, 5  ;;  %v1084_v34 = vrot.slane %v4418_v15, 7 }
 0x208   :  { %v564_v35 = vmul.f32 %v4375_v63, %v555_v23  ;;  %vm1156_vm13 = vcmp.ge.f32.partialorder %v1140_v20, 0.0  ;;  %v1172_v36 = vmul.f32 0.2, %v1140_v20  ;;  %v1122_v37 = vadd.f32 %v1090_v27, %v4382_v14 }
 0x209   :  { %v1201_v39 = vmul.f32 %v4393_v32, %v1184_v26  ;;  %v1169_v40 = vmul.f32 0.2, %v1137_v24  ;;  %v1170_v41 = vmul.f32 0.2, %v1138_v25  ;;  %v1125_v42 = vadd.f32 %v1093_v31, %v4426_v53 }
 0x20a   :  { %vm1153_vm14 = vcmp.ge.f32.partialorder %v1137_v24, 0.0  ;;  %vm1154_vm15 = vcmp.ge.f32.partialorder %v1138_v25, 0.0  ;;  %v1124_v43 = vadd.f32 %v1092_v28, %v4382_v14  ;;  %v1081_v44 = vrot.slane %v4418_v15, 4 }
 0x20b   :  { %576 = vadd.xlane.f32.xlu1 %v575_v16  ;;  %585 = vadd.xlane.f32.xlu0 %v584_v17  ;;  %v1078_v45 = vrot.slane %v4418_v15, 1  ;;  %v1098_v46 = vperm.slane %v1082_v33, 0  ;;  %v1100_v63 = vperm.slane %v1084_v34, 0  ;;  %v581_v47 = vsel %vm565_vm10, %v562_v30, 0.0 }
 0x20c   :  { %1219 = vadd.xlane.f32.xlu2 %v1218_v22  ;;  %v587_v48 = vsel %vm565_vm10, %v564_v35, 0.0  ;;  %v1188_v50 = vsel %vm1156_vm13, %v1140_v20, %v1172_v36  ;;  %v1139_v51 = vadd.f32 %v4380_v11, %v1122_v37  ;;  %v1221_v52 = vsel %vm439_vm7, %v1201_v39, 0.0 }
 0x20d   :  { %v1185_v54 = vsel %vm1153_vm14, %v1137_v24, %v1169_v40  ;;  %v1186_v14 = vsel %vm1154_vm15, %v1138_v25, %v1170_v41  ;;  %v1142_v55 = vadd.f32 %v4380_v11, %v1125_v42  ;;  %v1141_v56 = vadd.f32 %v4380_v11, %v1124_v43 }
 0x20e   :  { %v1097_v57 = vperm.slane %v1081_v44, 0  ;;  %v1130_v38 = vadd.f32 %v1098_v46, %v4426_v53  ;;  %v1132_v58 = vadd.f32 %v1100_v63, %v4426_v53  ;;  %v1205_v59 = vmul.f32 %v4393_v32, %v1188_v50 }
 0x20f   :  { %v1083_v60 = vrot.slane %v4418_v15, 6  ;;  %v1079_v61 = vrot.slane %v4418_v15, 2  ;;  %v1202_v62 = vmul.f32 %v4393_v32, %v1185_v54  ;;  %v1203_v0 = vmul.f32 %v4393_v32, %v1186_v14  ;;  %v597_v54 = vpop.permute.xlu1 %596 }
 0x210   :  { %v1129_v1 = vadd.f32 %v1097_v57, %v4426_v53  ;;  %v1094_v2 = vperm.slane %v1078_v45, 0  ;;  %v1171_v3 = vmul.f32 0.2, %v1139_v51  ;;  %v1174_v4 = vmul.f32 0.2, %v1142_v55 }
 0x211   :  { %v1147_v5 = vadd.f32 %v4380_v11, %v1130_v38  ;;  %v1149_v6 = vadd.f32 %v4380_v11, %v1132_v58  ;;  %vm1155_vm10 = vcmp.ge.f32.partialorder %v1139_v51, 0.0  ;;  %v1173_v7 = vmul.f32 0.2, %v1141_v56 }
 0x212   :  { %vm1158_vm8 = vcmp.ge.f32.partialorder %v1142_v55, 0.0  ;;  %v1126_v49 = vadd.f32 %v1094_v2, %v4426_v53  ;;  %v1233_v8 = vsel %vm439_vm7, %v1205_v59, 0.0  ;;  %vm1157_vm9 = vcmp.ge.f32.partialorder %v1141_v56, 0.0 }
 0x213   :  { %582 = vadd.xlane.f32.xlu1 %v581_v47  ;;  %588 = vadd.xlane.f32.xlu0 %v587_v48  ;;  %vm1163_vm11 = vcmp.ge.f32.partialorder %v1147_v5, 0.0  ;;  %v1179_v9 = vmul.f32 0.2, %v1147_v5  ;;  %v1224_v10 = vsel %vm439_vm7, %v1202_v62, 0.0  ;;  %v1146_v13 = vadd.f32 %v4380_v11, %v1129_v1 }
 0x214   :  { %1222 = vadd.xlane.f32.xlu2 %v1221_v52  ;;  %vm1165_vm12 = vcmp.ge.f32.partialorder %v1149_v6, 0.0  ;;  %v1181_v16 = vmul.f32 0.2, %v1149_v6  ;;  %v1227_v17 = vsel %vm439_vm7, %v1203_v0, 0.0  ;;  %v1187_v19 = vsel %vm1155_vm10, %v1139_v51, %v1171_v3 }
 0x215   :  { %v1190_v20 = vsel %vm1158_vm8, %v1142_v55, %v1174_v4  ;;  %v1195_v22 = vsel %vm1163_vm11, %v1147_v5, %v1179_v9  ;;  %v1189_v23 = vsel %vm1157_vm9, %v1141_v56, %v1173_v7  ;;  %v1143_v24 = vadd.f32 %v4380_v11, %v1126_v49  ;;  %v604_v7 = vpop.permute.xlu2 %603 }
 0x216   :  { %v1212_v25 = vmul.f32 %v4393_v32, %v1195_v22  ;;  %v1197_v26 = vsel %vm1165_vm12, %v1149_v6, %v1181_v16  ;;  %v1099_v27 = vperm.slane %v1083_v60, 0  ;;  %v1204_v30 = vmul.f32 %v4393_v32, %v1187_v19 }
 0x217   :  { %v1214_v28 = vmul.f32 %v4393_v32, %v1197_v26  ;;  %v1207_v31 = vmul.f32 %v4393_v32, %v1190_v20  ;;  %v1095_v33 = vperm.slane %v1079_v61, 0  ;;  %v1206_v34 = vmul.f32 %v4393_v32, %v1189_v23  ;;  %v4485_v62 = vpop.permute.xlu1 %1269 }
 0x218   :  { %v1178_v35 = vmul.f32 0.2, %v1146_v13  ;;  %v1131_v36 = vadd.f32 %v1099_v27, %v4426_v53  ;;  %vm1162_vm13 = vcmp.ge.f32.partialorder %v1146_v13, 0.0  ;;  %v1175_v37 = vmul.f32 0.2, %v1143_v24 }
 0x219   :  { %v1127_v39 = vadd.f32 %v1095_v33, %v4426_v53  ;;  %vm1159_vm14 = vcmp.ge.f32.partialorder %v1143_v24, 0.0  ;;  %v1230_v40 = vsel %vm439_vm7, %v1204_v30, 0.0  ;;  %v1239_v41 = vsel %vm439_vm7, %v1207_v31, 0.0 }
 0x21a   :  { %v1080_v42 = vrot.slane %v4418_v15, 3  ;;  %v1236_v43 = vsel %vm439_vm7, %v1206_v34, 0.0  ;;  %v1194_v44 = vsel %vm1162_vm13, %v1146_v13, %v1178_v35  ;;  %v1148_v45 = vadd.f32 %v4380_v11, %v1131_v36 }
 0x21b   :  { %1234 = vadd.xlane.f32.xlu0 %v1233_v8  ;;  %1225 = vadd.xlane.f32.xlu1 %v1224_v10  ;;  %v1191_v46 = vsel %vm1159_vm14, %v1143_v24, %v1175_v37  ;;  %v1144_v63 = vadd.f32 %v4380_v11, %v1127_v39  ;;  %v1211_v47 = vmul.f32 %v4393_v32, %v1194_v44  ;;  %v1254_v3 = vsel %vm439_vm7, %v1212_v25, 0.0 }
 0x21c   :  { %1228 = vadd.xlane.f32.xlu2 %v1227_v17  ;;  %v1096_v48 = vperm.slane %v1080_v42, 0  ;;  %v1208_v50 = vmul.f32 %v4393_v32, %v1191_v46  ;;  %v1180_v51 = vmul.f32 0.2, %v1148_v45  ;;  %vm1164_vm15 = vcmp.ge.f32.partialorder %v1148_v45, 0.0 }
 0x21d   :  { %v1176_v52 = vmul.f32 0.2, %v1144_v63  ;;  %vm1160_vm10 = vcmp.ge.f32.partialorder %v1144_v63, 0.0  ;;  %v1251_v14 = vsel %vm439_vm7, %v1211_v47, 0.0  ;;  %v1260_v5 = vsel %vm439_vm7, %v1214_v28, 0.0 }
 0x21e   :  { %v1128_v15 = vadd.f32 %v1096_v48, %v4426_v53  ;;  %v1242_v55 = vsel %vm439_vm7, %v1208_v50, 0.0  ;;  %v1196_v56 = vsel %vm1164_vm15, %v1148_v45, %v1180_v51  ;;  %v4217_v6 = vmov 0  }
 0x21f   :  { %v1192_v57 = vsel %vm1160_vm10, %v1144_v63, %v1176_v52  ;;  %v1213_v58 = vmul.f32 %v4393_v32, %v1196_v56  ;;  %3905 = vset.pattern.permute.xlu2 %v4217_v6  ;;  %3903 = vset.pattern.permute.xlu1 %v4217_v6  ;;  %vm673_vm9 = vcmask 1041409   ;;  %vm675_vm11 = vcmask 1042434  }
 0x220   :  { %v1145_v38 = vadd.f32 %v4380_v11, %v1128_v15  ;;  %v1209_v59 = vmul.f32 %v4393_v32, %v1192_v57  ;;  %v4489_v11 = vpop.permute.xlu1 %1276  ;;  %3904 = vset.pattern.permute.xlu0 %v4217_v6  ;;  %vm677_vm12 = vcmask 1043459   ;;  %vm684_vm13 = vcmask 27648  }
 0x221   :  { %v1257_v53 = vsel %vm439_vm7, %v1213_v58, 0.0  ;;  %vm1427_vm14 = vcmask 1044484   ;;  %vm1429_vm15 = vcmask 1045509   ;;  %vm1431_vm10 = vcmask 1046534  }
 0x222   :  { %v1177_v60 = vmul.f32 0.2, %v1145_v38  ;;  %vm1161_vm8 = vcmp.ge.f32.partialorder %v1145_v38, 0.0  ;;  %v1245_v61 = vsel %vm439_vm7, %v1209_v59, 0.0 }
 0x223   :  { %1231 = vadd.xlane.f32.xlu1 %v1230_v40  ;;  %1240 = vadd.xlane.f32.xlu0 %v1239_v41 }
 0x224   :  { %1237 = vadd.xlane.f32.xlu2 %v1236_v43  ;;  %v1193_v0 = vsel %vm1161_vm8, %v1145_v38, %v1177_v60  ;;  %vm1433_vm8 = vcmask 1047559  }
 0x225   :  { %v1210_v1 = vmul.f32 %v4393_v32, %v1193_v0  ;;  %v611_v32 = vpop.permute.xlu2 %610 }
 0x227   :  { %v1248_v2 = vsel %vm439_vm7, %v1210_v1, 0.0 }
 0x228   :  { %v618_v4 = vpop.permute.xlu1 %617 }
 0x22b   :  { %1252 = vadd.xlane.f32.xlu0 %v1251_v14 }
 0x22c   :  { %1243 = vadd.xlane.f32.xlu2 %v1242_v55 }
 0x22d   :  { %v1284_v9 = vpop.permute.xlu2 %1283 }
 0x230   :  { %v4493_v49 = vpop.permute.xlu1 %1304 }
 0x233   :  { %1258 = vadd.xlane.f32.xlu0 %v1257_v53 }
 0x234   :  { %1246 = vadd.xlane.f32.xlu2 %v1245_v61 }
 0x235   :  { %v1298_v17 = vpop.permute.xlu2 %1297 }
 0x238   :  { %v4495_v8 = vpop.permute.xlu1 %1311 }
 0x23c   :  { %1249 = vadd.xlane.f32.xlu2 %v1248_v2 }
 0x240   :  { %v4497_v10 = vpop.permute.xlu1 %1318 }
 0x244   :  { %1255 = vadd.xlane.f32.xlu2 %v1254_v3 }
 0x24c   :  { %1261 = vadd.xlane.f32.xlu2 %v1260_v5 }
 0x26e   :  { %v574_v13 = vpop.xlane.xlu0 %573  ;;  %v568_v16 = vpop.xlane.xlu1 %567 }
 0x26f   :  { %v4499_v19 = vadd.f32 %v611_v32, %v574_v13  ;;  %v4501_v20 = vadd.f32 %v597_v54, %v568_v16 }
 0x271   :  { %640 = vperm.xlu1 %3903, %v4501_v20   ;;  %646 = vperm.xlu2 %3905, %v4499_v19  }
 0x276   :  { %v571_v22 = vpop.xlane.xlu1 %570  ;;  %v580_v23 = vpop.xlane.xlu0 %579 }
 0x277   :  { %v4505_v24 = vadd.f32 %v604_v7, %v571_v22  ;;  %v1217_v25 = vpop.xlane.xlu2 %1216  ;;  %v4511_v33 = vadd.f32 %v597_v54, %v580_v23 }
 0x278   :  { %v4527_v44 = vadd.f32 %v4485_v62, %v1217_v25 }
 0x279   :  { %643 = vperm.xlu0 %3904, %v4505_v24  }
 0x27e   :  { %v577_v26 = vpop.xlane.xlu1 %576  ;;  %v586_v28 = vpop.xlane.xlu0 %585 }
 0x27f   :  { %v4508_v27 = vadd.f32 %v618_v4, %v577_v26  ;;  %v1220_v30 = vpop.xlane.xlu2 %1219  ;;  %v4517_v37 = vadd.f32 %v611_v32, %v586_v28 }
 0x280   :  { %v4530_v45 = vadd.f32 %v4489_v11, %v1220_v30 }
 0x281   :  { %649 = vperm.xlu2 %3905, %v4508_v27  }
 0x286   :  { %v583_v31 = vpop.xlane.xlu1 %582  ;;  %v589_v36 = vpop.xlane.xlu0 %588 }
 0x287   :  { %v4513_v34 = vadd.f32 %v604_v7, %v583_v31  ;;  %v1223_v35 = vpop.xlane.xlu2 %1222  ;;  %v4519_v39 = vadd.f32 %v618_v4, %v589_v36 }
 0x288   :  { %v4538_v50 = vadd.f32 %v1284_v9, %v1223_v35 }
 0x289   :  { %655 = vperm.xlu1 %3903, %v4513_v34   ;;  %652 = vperm.xlu2 %3905, %v4511_v33  }
 0x28e   :  { %v1226_v42 = vpop.xlane.xlu1 %1225  ;;  %v1235_v43 = vpop.xlane.xlu0 %1234 }
 0x28f   :  { %v1229_v40 = vpop.xlane.xlu2 %1228  ;;  %v4550_v54 = vadd.f32 %v4348_v21, %v1226_v42  ;;  %v4561_v38 = vadd.f32 %v4495_v8, %v1235_v43 }
 0x290   :  { %v4521_v41 = vadd.f32 %v1298_v17, %v1229_v40 }
 0x291   :  { %658 = vperm.xlu1 %3903, %v4517_v37   ;;  %661 = vperm.xlu2 %3905, %v4519_v39  }
 0x292   :  { %1373 = vperm.xlu0 %3904, %v4521_v41  }
 0x296   :  { %v1232_v47 = vpop.xlane.xlu1 %1231  ;;  %v1241_v48 = vpop.xlane.xlu0 %1240 }
 0x297   :  { %v1238_v46 = vpop.xlane.xlu2 %1237  ;;  %v4541_v51 = vadd.f32 %v4493_v49, %v1232_v47  ;;  %v4544_v15 = vadd.f32 %v4485_v62, %v1241_v48 }
 0x298   :  { %v4533_v63 = vadd.f32 %v4497_v10, %v1238_v46 }
 0x299   :  { %1364 = vperm.xlu1 %3903, %v4530_v45   ;;  %1361 = vperm.xlu2 %3905, %v4527_v44  }
 0x29a   :  { %1382 = vperm.xlu0 %3904, %v4533_v63  }
 0x29e   :  { %v1253_v57 = vpop.xlane.xlu0 %1252 }
 0x29f   :  { %v1244_v52 = vpop.xlane.xlu2 %1243  ;;  %v4563_v59 = vadd.f32 %v1298_v17, %v1253_v57 }
 0x2a0   :  { %v4553_v14 = vadd.f32 %v4489_v11, %v1244_v52  ;;  %v4584_v11 = vand.u32 127, %v592_v29 }
 0x2a1   :  { %1367 = vperm.xlu1 %3903, %v4538_v50   ;;  %1376 = vperm.xlu2 %3905, %v4541_v51  }
 0x2a2   :  { %1385 = vperm.xlu0 %3904, %v4544_v15  }
 0x2a6   :  { %v1259_v62 = vpop.xlane.xlu0 %1258 }
 0x2a7   :  { %v1247_v55 = vpop.xlane.xlu2 %1246  ;;  %v4576_v0 = vadd.f32 %v4495_v8, %v1259_v62 }
 0x2a8   :  { %v4555_v56 = vadd.f32 %v1284_v9, %v1247_v55 }
 0x2a9   :  { %1370 = vperm.xlu1 %3903, %v4550_v54   ;;  %1388 = vperm.xlu2 %3905, %v4553_v14  }
 0x2aa   :  { %1391 = vperm.xlu0 %3904, %v4555_v56  }
 0x2af   :  { %v1250_v58 = vpop.xlane.xlu2 %1249 }
 0x2b0   :  { %v4568_v60 = vadd.f32 %v4348_v21, %v1250_v58 }
 0x2b1   :  { %1379 = vperm.xlu1 %3903, %v4561_v38  }
 0x2b2   :  { %1397 = vperm.xlu0 %3904, %v4563_v59  }
 0x2b7   :  { %v1256_v53 = vpop.xlane.xlu2 %1255 }
 0x2b8   :  { %v4571_v61 = vadd.f32 %v4493_v49, %v1256_v53 }
 0x2b9   :  { %1394 = vperm.xlu1 %3903, %v4568_v60  }
 0x2ba   :  { %1400 = vperm.xlu2 %3905, %v4571_v61  }
 0x2bf   :  { %v1262_v1 = vpop.xlane.xlu2 %1261 }
 0x2c0   :  { %v4579_v2 = vadd.f32 %v4497_v10, %v1262_v1 }
 0x2c1   :  { %1403 = vperm.xlu1 %3903, %v4576_v0  }
 0x2c2   :  { %1406 = vperm.xlu0 %3904, %v4579_v2  }
 0x2cb   :  { %v647_v21 = vpop.permute.xlu2 %646 }
 0x2cc   :  { %v667_v49 = vperm.slane %v647_v21, %v4584_v11 }
 0x2db   :  { %v650_v4 = vpop.permute.xlu2 %649 }
 0x2dc   :  { %v668_v32 = vperm.slane %v650_v4, %v4584_v11 }
 0x2e3   :  { %v641_v3 = vpop.permute.xlu1 %640  ;;  %v653_v13 = vpop.permute.xlu2 %652 }
 0x2e4   :  { %v665_v6 = vperm.slane %v641_v3, %v4584_v11  ;;  %v669_v23 = vperm.slane %v653_v13, %v4584_v11 }
 0x2eb   :  { %v644_v5 = vpop.permute.xlu0 %643  ;;  %v662_v22 = vpop.permute.xlu2 %661 }
 0x2ec   :  { %v666_v7 = vperm.slane %v644_v5, %v4584_v11  ;;  %v672_v30 = vperm.slane %v662_v22, %v4584_v11 }
 0x2ee   :  { %v674_v8 = vsel %vm673_vm9, %v666_v7, %v665_v6 }
 0x2ef   :  { %v676_v29 = vsel %vm675_vm11, %v667_v49, %v674_v8 }
 0x2f0   :  { %v678_v9 = vsel %vm677_vm12, %v668_v32, %v676_v29 }
 0x2f1   :  { %v685_v10 = vsel %vm684_vm13, %v678_v9, -inf }
 0x2f2   :  { %686 = vmax.xlane.f32.xlu2 %v685_v10 }
 0x2f3   :  { %v1362_v47 = vpop.permute.xlu2 %1361 }
 0x2f4   :  { %v1408_v57 = vperm.slane %v1362_v47, %v4584_v11 }
 0x2fb   :  { %v656_v16 = vpop.permute.xlu1 %655  ;;  %v1377_v1 = vpop.permute.xlu2 %1376 }
 0x2fc   :  { %v670_v17 = vperm.slane %v656_v16, %v4584_v11  ;;  %v1413_v7 = vperm.slane %v1377_v1, %v4584_v11 }
 0x2fe   :  { %v679_v31 = vsel %vm673_vm9, %v670_v17, %v669_v23 }
 0x303   :  { %v659_v25 = vpop.permute.xlu1 %658  ;;  %v1389_v13 = vpop.permute.xlu2 %1388 }
 0x304   :  { %v671_v26 = vperm.slane %v659_v25, %v4584_v11  ;;  %v1374_v28 = vpop.permute.xlu0 %1373  ;;  %v1417_v23 = vperm.slane %v1389_v13, %v4584_v11 }
 0x305   :  { %v1412_v4 = vperm.slane %v1374_v28, %v4584_v11 }
 0x306   :  { %v680_v35 = vsel %vm675_vm11, %v671_v26, %v679_v31 }
 0x307   :  { %v681_v36 = vsel %vm677_vm12, %v672_v30, %v680_v35 }
 0x308   :  { %v688_v40 = vsel %vm684_vm13, %v681_v36, -inf }
 0x309   :  { %689 = vmax.xlane.f32.xlu0 %v688_v40 }
 0x30b   :  { %v1365_v42 = vpop.permute.xlu1 %1364 }
 0x30c   :  { %v1383_v43 = vpop.permute.xlu0 %1382  ;;  %v1409_v52 = vperm.slane %v1365_v42, %v4584_v11 }
 0x30d   :  { %v1415_v8 = vperm.slane %v1383_v43, %v4584_v11 }
 0x30e   :  { %v1424_v62 = vsel %vm673_vm9, %v1409_v52, %v1408_v57 }
 0x313   :  { %v1368_v46 = vpop.permute.xlu1 %1367 }
 0x314   :  { %v1386_v48 = vpop.permute.xlu0 %1385  ;;  %v1410_v55 = vperm.slane %v1368_v46, %v4584_v11  ;;  %v1401_v36 = vpop.permute.xlu2 %1400 }
 0x315   :  { %v1416_v17 = vperm.slane %v1386_v48, %v4584_v11  ;;  %v1421_v43 = vperm.slane %v1401_v36, %v4584_v11 }
 0x316   :  { %v1425_v21 = vsel %vm675_vm11, %v1410_v55, %v1424_v62 }
 0x317   :  { %v1435_v30 = vsel %vm673_vm9, %v1417_v23, %v1416_v17 }
 0x31b   :  { %v1371_v58 = vpop.permute.xlu1 %1370 }
 0x31c   :  { %v1411_v53 = vperm.slane %v1371_v58, %v4584_v11  ;;  %v1392_v5 = vpop.permute.xlu0 %1391 }
 0x31d   :  { %v1418_v22 = vperm.slane %v1392_v5, %v4584_v11 }
 0x31e   :  { %v1426_v3 = vsel %vm677_vm12, %v1411_v53, %v1425_v21 }
 0x31f   :  { %v1428_v6 = vsel %vm1427_vm14, %v1412_v4, %v1426_v3  ;;  %v1436_v31 = vsel %vm675_vm11, %v1418_v22, %v1435_v30 }
 0x320   :  { %v1430_v29 = vsel %vm1429_vm15, %v1413_v7, %v1428_v6 }
 0x323   :  { %v1380_v49 = vpop.permute.xlu1 %1379 }
 0x324   :  { %v1414_v32 = vperm.slane %v1380_v49, %v4584_v11  ;;  %v1398_v26 = vpop.permute.xlu0 %1397 }
 0x325   :  { %v1420_v40 = vperm.slane %v1398_v26, %v4584_v11 }
 0x326   :  { %v1432_v9 = vsel %vm1431_vm10, %v1414_v32, %v1430_v29 }
 0x327   :  { %v1434_v10 = vsel %vm1433_vm8, %v1415_v8, %v1432_v9 }
 0x328   :  { %v1444_v16 = vsel %vm439_vm7, %v1434_v10, -inf }
 0x329   :  { %1445 = vmax.xlane.f32.xlu1 %v1444_v16 }
 0x32b   :  { %v1395_v25 = vpop.permute.xlu1 %1394 }
 0x32c   :  { %v1419_v28 = vperm.slane %v1395_v25, %v4584_v11 }
 0x32e   :  { %v1437_v35 = vsel %vm677_vm12, %v1419_v28, %v1436_v31 }
 0x32f   :  { %v1438_v42 = vsel %vm1427_vm14, %v1420_v40, %v1437_v35 }
 0x330   :  { %v1439_v55 = vsel %vm1429_vm15, %v1421_v43, %v1438_v42 }
 0x333   :  { %v1404_v46 = vpop.permute.xlu1 %1403 }
 0x334   :  { %v1422_v47 = vperm.slane %v1404_v46, %v4584_v11  ;;  %v1407_v48 = vpop.permute.xlu0 %1406 }
 0x335   :  { %v1423_v52 = vperm.slane %v1407_v48, %v4584_v11 }
 0x336   :  { %v1440_v57 = vsel %vm1431_vm10, %v1422_v47, %v1439_v55 }
 0x337   :  { %v1441_v58 = vsel %vm1433_vm8, %v1423_v52, %v1440_v57 }
 0x338   :  { %v1447_v53 = vsel %vm439_vm7, %v1441_v58, -inf }
 0x339   :  { %1448 = vmax.xlane.f32.xlu2 %v1447_v53 }
 0x365   :  { %v687_v62 = vpop.xlane.xlu2 %686 }
 0x366   :  { %v693_v1 = vperm.slane %v687_v62, 0  ;;  %v694_v21 = vperm.slane %v687_v62, 1  ;;  %v695_v3 = vperm.slane %v687_v62, 2  ;;  %v696_v7 = vperm.slane %v687_v62, 3 }
 0x368   :  { %v709_v4 = vsub.f32 %v4501_v20, %v693_v1  ;;  %v710_v5 = vsub.f32 %v4505_v24, %v694_v21  ;;  %v711_v6 = vsub.f32 %v4499_v19, %v695_v3  ;;  %v712_v29 = vsub.f32 %v4508_v27, %v696_v7 }
 0x36a   :  { %v717_v49 = vmul.f32 1.442695, %v709_v4  ;;  %v719_v32 = vmul.f32 1.442695, %v710_v5  ;;  %v721_v8 = vmul.f32 1.442695, %v711_v6 }
 0x36b   :  { %v723_v10 = vmul.f32 1.442695, %v712_v29 }
 0x36c   :  { %3917 = vpow2.f32 %v717_v49 }
 0x36d   :  { %3919 = vpow2.f32 %v719_v32 }
 0x36e   :  { %3921 = vpow2.f32 %v721_v8 }
 0x36f   :  { %3923 = vpow2.f32 %v723_v10 }
 0x372   :  { %v4638_v9 = vpop.eup %3917 }
 0x373   :  { %v4640_v13 = vpop.eup %3919  ;;  %742 = vperm.xlu1 %3903, %v4638_v9  }
 0x374   :  { %v4643_v20 = vpop.eup %3921  ;;  %745 = vperm.xlu2 %3905, %v4640_v13  }
 0x375   :  { %748 = vperm.xlu0 %3904, %v4643_v20   ;;  %v4647_v19 = vpop.eup %3923 }
 0x37c   :  { %v690_v24 = vpop.xlane.xlu0 %689 }
 0x37d   :  { %751 = vperm.xlu0 %3904, %v4647_v19   ;;  %v697_v27 = vperm.slane %v690_v24, 0  ;;  %v698_v16 = vperm.slane %v690_v24, 1  ;;  %v700_v17 = vperm.slane %v690_v24, 3  ;;  %v699_v22 = vperm.slane %v690_v24, 2 }
 0x37f   :  { %v713_v23 = vsub.f32 %v4511_v33, %v697_v27  ;;  %v714_v25 = vsub.f32 %v4513_v34, %v698_v16  ;;  %v716_v26 = vsub.f32 %v4519_v39, %v700_v17  ;;  %v715_v35 = vsub.f32 %v4517_v37, %v699_v22 }
 0x381   :  { %v725_v28 = vmul.f32 1.442695, %v713_v23  ;;  %v727_v30 = vmul.f32 1.442695, %v714_v25  ;;  %v731_v31 = vmul.f32 1.442695, %v716_v26 }
 0x382   :  { %v729_v36 = vmul.f32 1.442695, %v715_v35 }
 0x383   :  { %3925 = vpow2.f32 %v725_v28 }
 0x384   :  { %3927 = vpow2.f32 %v727_v30 }
 0x385   :  { %3929 = vpow2.f32 %v731_v31 }
 0x386   :  { %3931 = vpow2.f32 %v729_v36 }
 0x389   :  { %v4654_v40 = vpop.eup %3925 }
 0x38a   :  { %v4656_v42 = vpop.eup %3927  ;;  %754 = vperm.xlu0 %3904, %v4654_v40  }
 0x38b   :  { %757 = vperm.xlu2 %3905, %v4656_v42   ;;  %v4660_v33 = vpop.eup %3929 }
 0x38c   :  { %763 = vperm.xlu1 %3903, %v4660_v33   ;;  %v4663_v34 = vpop.eup %3931 }
 0x392   :  { %760 = vperm.xlu0 %3904, %v4663_v34  }
 0x39c   :  { %v1446_v37 = vpop.xlane.xlu1 %1445 }
 0x39d   :  { %v1454_v39 = vperm.slane %v1446_v37, 2  ;;  %v1452_v43 = vperm.slane %v1446_v37, 0  ;;  %v1453_v46 = vperm.slane %v1446_v37, 1  ;;  %v1459_v55 = vperm.slane %v1446_v37, 7 }
 0x39e   :  { %v1455_v57 = vperm.slane %v1446_v37, 3  ;;  %v1456_v58 = vperm.slane %v1446_v37, 4  ;;  %v1457_v7 = vperm.slane %v1446_v37, 5 }
 0x39f   :  { %v1486_v47 = vsub.f32 %v4538_v50, %v1454_v39  ;;  %v1484_v48 = vsub.f32 %v4527_v44, %v1452_v43  ;;  %v1485_v52 = vsub.f32 %v4530_v45, %v1453_v46  ;;  %v1491_v21 = vsub.f32 %v4533_v63, %v1459_v55 }
 0x3a0   :  { %v1487_v3 = vsub.f32 %v4550_v54, %v1455_v57  ;;  %v1488_v4 = vsub.f32 %v4521_v41, %v1456_v58  ;;  %v1458_v44 = vperm.slane %v1446_v37, 6  ;;  %v1489_v54 = vsub.f32 %v4541_v51, %v1457_v7 }
 0x3a1   :  { %v1504_v53 = vmul.f32 1.442695, %v1486_v47  ;;  %v1500_v62 = vmul.f32 1.442695, %v1484_v48  ;;  %v1502_v1 = vmul.f32 1.442695, %v1485_v52 }
 0x3a2   :  { %v1514_v50 = vmul.f32 1.442695, %v1491_v21  ;;  %v1506_v5 = vmul.f32 1.442695, %v1487_v3  ;;  %v1508_v45 = vmul.f32 1.442695, %v1488_v4  ;;  %v1490_v41 = vsub.f32 %v4561_v38, %v1458_v44 }
 0x3a3   :  { %3933 = vpow2.f32 %v1504_v53  ;;  %v1510_v17 = vmul.f32 1.442695, %v1489_v54 }
 0x3a4   :  { %3935 = vpow2.f32 %v1500_v62  ;;  %v1512_v24 = vmul.f32 1.442695, %v1490_v41 }
 0x3a5   :  { %3937 = vpow2.f32 %v1502_v1 }
 0x3a6   :  { %3939 = vpow2.f32 %v1514_v50 }
 0x3a7   :  { %3941 = vpow2.f32 %v1506_v5 }
 0x3a8   :  { %3943 = vpow2.f32 %v1508_v45 }
 0x3a9   :  { %v4672_v6 = vpop.eup %3933 }
 0x3aa   :  { %v4674_v49 = vpop.eup %3935  ;;  %1555 = vperm.xlu0 %3904, %v4672_v6  }
 0x3ab   :  { %v4677_v32 = vpop.eup %3937  ;;  %1549 = vperm.xlu2 %3905, %v4674_v49  }
 0x3ac   :  { %1552 = vperm.xlu1 %3903, %v4677_v32   ;;  %v1449_v63 = vpop.xlane.xlu2 %1448  ;;  %v4684_v16 = vpop.eup %3939 }
 0x3ad   :  { %v1462_v8 = vperm.slane %v1449_v63, 2  ;;  %v1465_v10 = vperm.slane %v1449_v63, 5  ;;  %v1460_v27 = vperm.slane %v1449_v63, 0  ;;  %v1461_v23 = vperm.slane %v1449_v63, 1  ;;  %v4686_v25 = vpop.eup %3941 }
 0x3ae   :  { %v4689_v26 = vpop.eup %3943  ;;  %v1463_v31 = vperm.slane %v1449_v63, 3  ;;  %v1464_v37 = vperm.slane %v1449_v63, 4  ;;  %v1466_v46 = vperm.slane %v1449_v63, 6  ;;  %v1467_v52 = vperm.slane %v1449_v63, 7 }
 0x3af   :  { %v1494_v29 = vsub.f32 %v4555_v56, %v1462_v8  ;;  %v1497_v51 = vsub.f32 %v4571_v61, %v1465_v10  ;;  %v1492_v56 = vsub.f32 %v4544_v15, %v1460_v27  ;;  %v1493_v38 = vsub.f32 %v4553_v14, %v1461_v23 }
 0x3b0   :  { %v1495_v15 = vsub.f32 %v4568_v60, %v1463_v31  ;;  %v1496_v14 = vsub.f32 %v4563_v59, %v1464_v37  ;;  %v1498_v60 = vsub.f32 %v4576_v0, %v1466_v46  ;;  %v1499_v59 = vsub.f32 %v4579_v2, %v1467_v52 }
 0x3b1   :  { %v1520_v22 = vmul.f32 1.442695, %v1494_v29  ;;  %v1526_v28 = vmul.f32 1.442695, %v1497_v51  ;;  %v1516_v30 = vmul.f32 1.442695, %v1492_v56 }
 0x3b2   :  { %1570 = vperm.xlu0 %3904, %v4684_v16   ;;  %v1518_v36 = vmul.f32 1.442695, %v1493_v38  ;;  %v1522_v43 = vmul.f32 1.442695, %v1495_v15  ;;  %v1524_v48 = vmul.f32 1.442695, %v1496_v14 }
 0x3b3   :  { %1558 = vperm.xlu2 %3905, %v4686_v25   ;;  %3945 = vpow2.f32 %v1520_v22  ;;  %v1528_v58 = vmul.f32 1.442695, %v1498_v60  ;;  %v1530_v53 = vmul.f32 1.442695, %v1499_v59 }
 0x3b4   :  { %1561 = vperm.xlu1 %3903, %v4689_v26   ;;  %3947 = vpow2.f32 %v1512_v24 }
 0x3b5   :  { %3949 = vpow2.f32 %v1510_v17 }
 0x3b6   :  { %3951 = vpow2.f32 %v1526_v28 }
 0x3b7   :  { %3953 = vpow2.f32 %v1516_v30 }
 0x3b8   :  { %3955 = vpow2.f32 %v1518_v36 }
 0x3b9   :  { %v4696_v35 = vpop.eup %3945  ;;  %3957 = vpow2.f32 %v1522_v43 }
 0x3ba   :  { %v4698_v39 = vpop.eup %3947  ;;  %1579 = vperm.xlu0 %3904, %v4696_v35   ;;  %3959 = vpow2.f32 %v1524_v48 }
 0x3bb   :  { %v4701_v61 = vpop.eup %3949  ;;  %1567 = vperm.xlu2 %3905, %v4698_v39   ;;  %3961 = vpow2.f32 %v1528_v58 }
 0x3bc   :  { %1564 = vperm.xlu1 %3903, %v4701_v61   ;;  %v4707_v47 = vpop.eup %3951  ;;  %3963 = vpow2.f32 %v1530_v53 }
 0x3bd   :  { %v4709_v55 = vpop.eup %3953 }
 0x3be   :  { %v4712_v57 = vpop.eup %3955 }
 0x3bf   :  { %v4718_v62 = vpop.eup %3957 }
 0x3c0   :  { %v4720_v1 = vpop.eup %3959 }
 0x3c1   :  { %v4724_v21 = vpop.eup %3961 }
 0x3c2   :  { %1588 = vperm.xlu0 %3904, %v4707_v47   ;;  %v4726_v3 = vpop.eup %3963 }
 0x3c3   :  { %1573 = vperm.xlu2 %3905, %v4709_v55  }
 0x3c4   :  { %1576 = vperm.xlu1 %3903, %v4712_v57  }
 0x3cb   :  { %1582 = vperm.xlu2 %3905, %v4718_v62  }
 0x3cc   :  { %1585 = vperm.xlu1 %3903, %v4720_v1  }
 0x3ce   :  { %v746_v4 = vpop.permute.xlu2 %745 }
 0x3cf   :  { %v766_v5 = vperm.slane %v746_v4, %v4584_v11 }
 0x3d3   :  { %1591 = vperm.xlu2 %3905, %v4724_v21  }
 0x3d4   :  { %1594 = vperm.xlu1 %3903, %v4726_v3  }
 0x3e5   :  { %v743_v2 = vpop.permute.xlu1 %742  ;;  %v758_v10 = vpop.permute.xlu2 %757 }
 0x3e6   :  { %v765_v50 = vperm.slane %v743_v2, %v4584_v11  ;;  %v770_v17 = vperm.slane %v758_v10, %v4584_v11 }
 0x3e7   :  { %v749_v0 = vpop.permute.xlu0 %748 }
 0x3e8   :  { %v767_v44 = vperm.slane %v749_v0, %v4584_v11  ;;  %v773_v45 = vsel %vm673_vm9, %v766_v5, %v765_v50 }
 0x3ea   :  { %v774_v41 = vsel %vm675_vm11, %v767_v44, %v773_v45 }
 0x3ef   :  { %v752_v7 = vpop.permute.xlu0 %751 }
 0x3f0   :  { %v768_v63 = vperm.slane %v752_v7, %v4584_v11 }
 0x3f2   :  { %v775_v54 = vsel %vm677_vm12, %v768_v63, %v774_v41 }
 0x3f3   :  { %v781_v8 = vsel %vm684_vm13, %v775_v54, 0.0 }
 0x3f4   :  { %782 = vadd.xlane.f32.xlu0 %v781_v8 }
 0x3fc   :  { %v755_v29 = vpop.permute.xlu0 %754 }
 0x3fd   :  { %v769_v24 = vperm.slane %v755_v29, %v4584_v11 }
 0x3fe   :  { %v764_v27 = vpop.permute.xlu1 %763 }
 0x3ff   :  { %v776_v51 = vsel %vm673_vm9, %v770_v17, %v769_v24  ;;  %v772_v56 = vperm.slane %v764_v27, %v4584_v11 }
 0x404   :  { %v761_v22 = vpop.permute.xlu0 %760 }
 0x405   :  { %v771_v23 = vperm.slane %v761_v22, %v4584_v11  ;;  %v1550_v31 = vpop.permute.xlu2 %1549 }
 0x406   :  { %v1596_v48 = vperm.slane %v1550_v31, %v4584_v11 }
 0x407   :  { %v777_v38 = vsel %vm675_vm11, %v771_v23, %v776_v51 }
 0x408   :  { %v778_v28 = vsel %vm677_vm12, %v772_v56, %v777_v38 }
 0x409   :  { %v784_v30 = vsel %vm684_vm13, %v778_v28, 0.0 }
 0x40a   :  { %785 = vadd.xlane.f32.xlu2 %v784_v30 }
 0x40d   :  { %v1559_v36 = vpop.permute.xlu2 %1558 }
 0x40e   :  { %v1599_v0 = vperm.slane %v1559_v36, %v4584_v11 }
 0x415   :  { %v1568_v14 = vpop.permute.xlu2 %1567 }
 0x416   :  { %v1602_v44 = vperm.slane %v1568_v14, %v4584_v11 }
 0x41c   :  { %v1556_v15 = vpop.permute.xlu0 %1555 }
 0x41d   :  { %v1598_v52 = vperm.slane %v1556_v15, %v4584_v11  ;;  %v1574_v4 = vpop.permute.xlu2 %1573 }
 0x41e   :  { %v1553_v37 = vpop.permute.xlu1 %1552  ;;  %v1604_v27 = vperm.slane %v1574_v4, %v4584_v11 }
 0x41f   :  { %v1597_v43 = vperm.slane %v1553_v37, %v4584_v11 }
 0x421   :  { %v1612_v60 = vsel %vm673_vm9, %v1597_v43, %v1596_v48 }
 0x422   :  { %v1613_v59 = vsel %vm675_vm11, %v1598_v52, %v1612_v60 }
 0x423   :  { %v1614_v50 = vsel %vm677_vm12, %v1599_v0, %v1613_v59 }
 0x424   :  { %v1571_v58 = vpop.permute.xlu0 %1570 }
 0x425   :  { %v1603_v7 = vperm.slane %v1571_v58, %v4584_v11  ;;  %v1583_v17 = vpop.permute.xlu2 %1582 }
 0x426   :  { %v1562_v46 = vpop.permute.xlu1 %1561  ;;  %v1607_v38 = vperm.slane %v1583_v17, %v4584_v11 }
 0x427   :  { %v1600_v53 = vperm.slane %v1562_v46, %v4584_v11 }
 0x429   :  { %v1615_v45 = vsel %vm1427_vm14, %v1600_v53, %v1614_v50 }
 0x42c   :  { %v1580_v29 = vpop.permute.xlu0 %1579 }
 0x42d   :  { %v1606_v23 = vperm.slane %v1580_v29, %v4584_v11  ;;  %v1592_v37 = vpop.permute.xlu2 %1591 }
 0x42e   :  { %v1565_v2 = vpop.permute.xlu1 %1564  ;;  %v1610_v43 = vperm.slane %v1592_v37, %v4584_v11 }
 0x42f   :  { %v1601_v5 = vperm.slane %v1565_v2, %v4584_v11 }
 0x431   :  { %v1616_v63 = vsel %vm1429_vm15, %v1601_v5, %v1615_v45 }
 0x432   :  { %v1617_v41 = vsel %vm1431_vm10, %v1602_v44, %v1616_v63 }
 0x433   :  { %v1618_v54 = vsel %vm1433_vm8, %v1603_v7, %v1617_v41 }
 0x434   :  { %v1628_v8 = vsel %vm439_vm7, %v1618_v54, 0.0  ;;  %v1589_v30 = vpop.permute.xlu0 %1588 }
 0x435   :  { %1629 = vadd.xlane.f32.xlu1 %v1628_v8  ;;  %v1609_v15 = vperm.slane %v1589_v30, %v4584_v11 }
 0x436   :  { %v1577_v10 = vpop.permute.xlu1 %1576 }
 0x437   :  { %v1605_v24 = vperm.slane %v1577_v10, %v4584_v11 }
 0x439   :  { %v1619_v22 = vsel %vm673_vm9, %v1605_v24, %v1604_v27 }
 0x43a   :  { %v1620_v51 = vsel %vm675_vm11, %v1606_v23, %v1619_v22 }
 0x43b   :  { %v1621_v31 = vsel %vm677_vm12, %v1607_v38, %v1620_v51 }
 0x43e   :  { %v1586_v56 = vpop.permute.xlu1 %1585 }
 0x43f   :  { %v1608_v28 = vperm.slane %v1586_v56, %v4584_v11 }
 0x441   :  { %v1622_v36 = vsel %vm1427_vm14, %v1608_v28, %v1621_v31 }
 0x442   :  { %v1623_v14 = vsel %vm1429_vm15, %v1609_v15, %v1622_v36 }
 0x443   :  { %v1624_v52 = vsel %vm1431_vm10, %v1610_v43, %v1623_v14 }
 0x446   :  { %v1595_v46 = vpop.permute.xlu1 %1594 }
 0x447   :  { %v1611_v48 = vperm.slane %v1595_v46, %v4584_v11 }
 0x449   :  { %v1625_v60 = vsel %vm1433_vm8, %v1611_v48, %v1624_v52 }
 0x44a   :  { %v1631_v59 = vsel %vm439_vm7, %v1625_v60, 0.0 }
 0x44b   :  { %1632 = vadd.xlane.f32.xlu0 %v1631_v59 }
 0x467   :  { %v783_v58 = vpop.xlane.xlu0 %782 }
 0x468   :  { %3965 = vrcp.f32 %v783_v58 }
 0x46e   :  { %v3966_v53 = vpop.eup %3965 }
 0x46f   :  { %v791_v0 = vperm.slane %v3966_v53, 0  ;;  %v792_v2 = vperm.slane %v3966_v53, 1  ;;  %v793_v4 = vperm.slane %v3966_v53, 2  ;;  %v794_v45 = vperm.slane %v3966_v53, 3 }
 0x471   :  { %v807_v50 = vmul.f32 %v4638_v9, %v791_v0  ;;  %v808_v5 = vmul.f32 %v4640_v13, %v792_v2  ;;  %v809_v44 = vmul.f32 %v4643_v20, %v793_v4  ;;  %v810_v7 = vmul.f32 %v4647_v19, %v794_v45 }
 0x473   :  { %820 = vperm.xlu2 %3905, %v807_v50   ;;  %823 = vperm.xlu1 %3903, %v808_v5  }
 0x474   :  { %826 = vperm.xlu0 %3904, %v809_v44  }
 0x47b   :  { %829 = vperm.xlu2 %3905, %v810_v7  }
 0x47d   :  { %v786_v63 = vpop.xlane.xlu2 %785 }
 0x47e   :  { %3967 = vrcp.f32 %v786_v63 }
 0x484   :  { %v3968_v41 = vpop.eup %3967 }
 0x485   :  { %v796_v54 = vperm.slane %v3968_v41, 1  ;;  %v795_v8 = vperm.slane %v3968_v41, 0  ;;  %v797_v13 = vperm.slane %v3968_v41, 2  ;;  %v798_v20 = vperm.slane %v3968_v41, 3 }
 0x487   :  { %v812_v29 = vmul.f32 %v4656_v42, %v796_v54  ;;  %v811_v9 = vmul.f32 %v4654_v40, %v795_v8  ;;  %v813_v10 = vmul.f32 %v4663_v34, %v797_v13  ;;  %v814_v24 = vmul.f32 %v4660_v33, %v798_v20 }
 0x489   :  { %870 = vperm.xlu1 %3903, %v812_v29   ;;  %867 = vperm.xlu0 %3904, %v811_v9  }
 0x491   :  { %873 = vperm.xlu1 %3903, %v813_v10   ;;  %876 = vperm.xlu0 %3904, %v814_v24  }
 0x4a8   :  { %v1630_v19 = vpop.xlane.xlu1 %1629 }
 0x4a9   :  { %3969 = vrcp.f32 %v1630_v19 }
 0x4af   :  { %v3970_v27 = vpop.eup %3969 }
 0x4b0   :  { %v1638_v17 = vperm.slane %v3970_v27, 0  ;;  %v1641_v22 = vperm.slane %v3970_v27, 3  ;;  %v1639_v23 = vperm.slane %v3970_v27, 1  ;;  %v1640_v34 = vperm.slane %v3970_v27, 2 }
 0x4b1   :  { %v1644_v56 = vperm.slane %v3970_v27, 6  ;;  %v1643_v33 = vperm.slane %v3970_v27, 5  ;;  %v1642_v31 = vperm.slane %v3970_v27, 4  ;;  %v1645_v15 = vperm.slane %v3970_v27, 7 }
 0x4b2   :  { %v1670_v42 = vmul.f32 %v4674_v49, %v1638_v17  ;;  %v1673_v40 = vmul.f32 %v4686_v25, %v1641_v22  ;;  %v1671_v51 = vmul.f32 %v4677_v32, %v1639_v23  ;;  %v1672_v38 = vmul.f32 %v4672_v6, %v1640_v34 }
 0x4b3   :  { %v1676_v28 = vmul.f32 %v4698_v39, %v1644_v56  ;;  %v1675_v30 = vmul.f32 %v4701_v61, %v1643_v33  ;;  %v1674_v32 = vmul.f32 %v4689_v26, %v1642_v31  ;;  %v1677_v39 = vmul.f32 %v4684_v16, %v1645_v15 }
 0x4b4   :  { %1695 = vperm.xlu2 %3905, %v1670_v42   ;;  %1704 = vperm.xlu1 %3903, %v1673_v40  }
 0x4b5   :  { %1698 = vperm.xlu0 %3904, %v1671_v51  }
 0x4bc   :  { %1701 = vperm.xlu2 %3905, %v1672_v38   ;;  %1713 = vperm.xlu1 %3903, %v1676_v28  }
 0x4bd   :  { %1710 = vperm.xlu0 %3904, %v1675_v30  }
 0x4be   :  { %v1633_v49 = vpop.xlane.xlu0 %1632 }
 0x4bf   :  { %3971 = vrcp.f32 %v1633_v49 }
 0x4c4   :  { %1707 = vperm.xlu2 %3905, %v1674_v32   ;;  %v64_v32 = vld [vmem:[#allocation2 + $0x78] sm:$0xf] }
 0x4c5   :  { %v3972_v25 = vpop.eup %3971 }
 0x4c6   :  { %v1647_v36 = vperm.slane %v3972_v25, 1  ;;  %v1646_v37 = vperm.slane %v3972_v25, 0  ;;  %v1650_v61 = vperm.slane %v3972_v25, 4  ;;  %v1649_v43 = vperm.slane %v3972_v25, 3 }
 0x4c7   :  { %v1648_v46 = vperm.slane %v3972_v25, 2  ;;  %v1652_v60 = vperm.slane %v3972_v25, 6 }
 0x4c8   :  { %v1679_v14 = vmul.f32 %v4712_v57, %v1647_v36  ;;  %v1678_v6 = vmul.f32 %v4709_v55, %v1646_v37  ;;  %v1682_v48 = vmul.f32 %v4720_v1, %v1650_v61  ;;  %v1681_v26 = vmul.f32 %v4718_v62, %v1649_v43 }
 0x4c9   :  { %v1680_v52 = vmul.f32 %v4696_v35, %v1648_v46  ;;  %v1653_v57 = vperm.slane %v3972_v25, 7  ;;  %v1651_v55 = vperm.slane %v3972_v25, 5  ;;  %v1684_v16 = vmul.f32 %v4724_v21, %v1652_v60 }
 0x4ca   :  { %1767 = vperm.xlu1 %3903, %v1679_v14   ;;  %1764 = vperm.xlu0 %3904, %v1678_v6  }
 0x4cb   :  { %v1685_v59 = vmul.f32 %v4726_v3, %v1653_v57  ;;  %v1683_v58 = vmul.f32 %v4707_v47, %v1651_v55 }
 0x4cc   :  { %1716 = vperm.xlu2 %3905, %v1677_v39  }
 0x4cd   :  { %v821_v53 = vpop.permute.xlu2 %820 }
 0x4ce   :  { %v831_v0 = vperm.slane %v821_v53, %v4584_v11 }
 0x4d2   :  { %1776 = vperm.xlu1 %3903, %v1682_v48   ;;  %1773 = vperm.xlu0 %3904, %v1681_v26  }
 0x4d4   :  { %1770 = vperm.xlu2 %3905, %v1680_v52  }
 0x4d5   :  { %v830_v1 = vpop.permute.xlu2 %829 }
 0x4d6   :  { %v834_v50 = vperm.slane %v830_v1, %v4584_v11 }
 0x4da   :  { %1785 = vperm.xlu1 %3903, %v1685_v59   ;;  %1782 = vperm.xlu0 %3904, %v1684_v16  }
 0x4dc   :  { %1779 = vperm.xlu2 %3905, %v1683_v58  }
 0x4e5   :  { %v824_v62 = vpop.permute.xlu1 %823 }
 0x4e6   :  { %v832_v35 = vperm.slane %v824_v62, %v4584_v11  ;;  %v827_v2 = vpop.permute.xlu0 %826 }
 0x4e7   :  { %v833_v4 = vperm.slane %v827_v2, %v4584_v11 }
 0x4e8   :  { %v835_v3 = vsel %vm673_vm9, %v832_v35, %v831_v0 }
 0x4e9   :  { %v836_v21 = vsel %vm675_vm11, %v833_v4, %v835_v3 }
 0x4ea   :  { %v837_v5 = vsel %vm677_vm12, %v834_v50, %v836_v21 }
 0x4eb   :  { %3815 = vmatmul.msk.f32.vlgmr.msra.gmra.mxu0 %vm5280_vm2, %v837_v5 }
 0x4fb   :  { %v871_v47 = vpop.permute.xlu1 %870  ;;  %v868_v44 = vpop.permute.xlu0 %867 }
 0x4fc   :  { %v879_v45 = vperm.slane %v871_v47, %v4584_v11  ;;  %v878_v7 = vperm.slane %v868_v44, %v4584_v11 }
 0x4fe   :  { %v882_v29 = vsel %vm673_vm9, %v879_v45, %v878_v7 }
 0x503   :  { %v874_v63 = vpop.permute.xlu1 %873  ;;  %v877_v41 = vpop.permute.xlu0 %876 }
 0x504   :  { %v880_v54 = vperm.slane %v874_v63, %v4584_v11  ;;  %v881_v8 = vperm.slane %v877_v41, %v4584_v11 }
 0x506   :  { %v883_v9 = vsel %vm675_vm11, %v880_v54, %v882_v29 }
 0x507   :  { %v884_v13 = vsel %vm677_vm12, %v881_v8, %v883_v9 }
 0x508   :  { %3817 = vmatmul.msk.f32.vlgmr.msrb.gmra.mxu1 %vm5280_vm2, %v884_v13 }
 0x509   :  { %3833 = vmatpush.msk.msrb.mxu1 %vm115_vm0, %v64_v32  ;;  %v3911_v32 = vld [vmem:[#allocation2 + $0xb8] ss:$0 sm:$0xff] }
 0x50a   :  { %2027 = vrot.lane.b32.xlu1 %v3911_v32, %s4216_s28 }
 0x50e   :  { %v1696_v20 = vpop.permute.xlu2 %1695 }
 0x50f   :  { %v1718_v17 = vperm.slane %v1696_v20, %v4584_v11 }
 0x516   :  { %v1702_v10 = vpop.permute.xlu2 %1701 }
 0x517   :  { %v1720_v23 = vperm.slane %v1702_v10, %v4584_v11 }
 0x51e   :  { %v1708_v24 = vpop.permute.xlu2 %1707 }
 0x51f   :  { %v1722_v33 = vperm.slane %v1708_v24, %v4584_v11 }
 0x526   :  { %v1705_v19 = vpop.permute.xlu1 %1704  ;;  %v1717_v38 = vpop.permute.xlu2 %1716 }
 0x527   :  { %v1699_v27 = vpop.permute.xlu0 %1698  ;;  %v1721_v51 = vperm.slane %v1705_v19, %v4584_v11  ;;  %v1725_v25 = vperm.slane %v1717_v38, %v4584_v11  ;;  %v4861_v38 = vld [vmem:[#allocation2 + $0x98] sm:$0xff] }
 0x528   :  { %v1719_v22 = vperm.slane %v1699_v27, %v4584_v11 }
 0x52a   :  { %v1726_v42 = vsel %vm673_vm9, %v1719_v22, %v1718_v17 }
 0x52b   :  { %v1727_v40 = vsel %vm675_vm11, %v1720_v23, %v1726_v42 }
 0x52c   :  { %v1728_v56 = vsel %vm677_vm12, %v1721_v51, %v1727_v40 }
 0x52d   :  { %v1729_v31 = vsel %vm1427_vm14, %v1722_v33, %v1728_v56  ;;  %v4857_v56 = vld [vmem:[#allocation2 + $0xa0] sm:$0xff]  ;;  %v66_v33 = vld [vmem:[#allocation2 + $0x88] sm:$0xf] }
 0x52e   :  { %v1714_v34 = vpop.permute.xlu1 %1713  ;;  %v1771_v39 = vpop.permute.xlu2 %1770  ;;  %3836 = vmatpush.msk.msrb.mxu2 %vm115_vm0, %v66_v33 }
 0x52f   :  { %v1724_v28 = vperm.slane %v1714_v34, %v4584_v11  ;;  %v1711_v30 = vpop.permute.xlu0 %1710  ;;  %v1789_v52 = vperm.slane %v1771_v39, %v4584_v11  ;;  %v4855_v34 = vld [vmem:[#allocation2 + $0xa8] sm:$0xff] }
 0x530   :  { %v1723_v49 = vperm.slane %v1711_v30, %v4584_v11  ;;  %1973 = vmatpush.msra.mxu3 %v4855_v34  ;;  %2439 = vmatpush.msra.mxu2 %v4855_v34  ;;  %v4218_v30 = vmov 0.0  }
 0x532   :  { %v1730_v36 = vsel %vm1429_vm15, %v1723_v49, %v1729_v31  ;;  %1974 = vmatpush.msra.mxu3 %v4857_v56  ;;  %2440 = vmatpush.msra.mxu2 %v4857_v56 }
 0x533   :  { %v1731_v37 = vsel %vm1431_vm10, %v1724_v28, %v1730_v36  ;;  %v4866_v28 = vld [vmem:[#allocation2 + $0x90] sm:$0xff] }
 0x534   :  { %v1732_v15 = vsel %vm1433_vm8, %v1725_v25, %v1731_v37  ;;  %1975 = vmatpush.msra.mxu3 %v4861_v38  ;;  %2441 = vmatpush.msra.mxu2 %v4861_v38 }
 0x535   :  { %3826 = vmatmul.msk.f32.vlgmr.msrb.gmra.mxu0 %vm439_vm7, %v1732_v15 }
 0x536   :  { %v1780_v16 = vpop.permute.xlu2 %1779  ;;  %1976 = vmatpush.msra.mxu3 %v4866_v28  ;;  %2442 = vmatpush.msra.mxu2 %v4866_v28 }
 0x537   :  { %v1792_v53 = vperm.slane %v1780_v16, %v4584_v11  ;;  %1977 = vmatmul.f32.vlgmr.msra.gmra.mxu3 %v4218_v30 }
 0x538   :  { %2089 = vmatpush.msrb.mxu3 %v4855_v34 }
 0x53a   :  { %2090 = vmatpush.msrb.mxu3 %v4857_v56 }
 0x53c   :  { %v1768_v14 = vpop.permute.xlu1 %1767  ;;  %v1765_v6 = vpop.permute.xlu0 %1764  ;;  %2091 = vmatpush.msrb.mxu3 %v4861_v38 }
 0x53d   :  { %v1788_v61 = vperm.slane %v1768_v14, %v4584_v11  ;;  %v1787_v43 = vperm.slane %v1765_v6, %v4584_v11 }
 0x53e   :  { %2092 = vmatpush.msrb.mxu3 %v4866_v28 }
 0x53f   :  { %v1795_v46 = vsel %vm673_vm9, %v1788_v61, %v1787_v43 }
 0x540   :  { %v1796_v55 = vsel %vm675_vm11, %v1789_v52, %v1795_v46  ;;  %2557 = vmatpush.msra.mxu3 %v4855_v34  ;;  %v65_v46 = vld [vmem:[#allocation2 + $0x80] sm:$0xf] }
 0x541   :  { %3830 = vmatpush.msk.msra.mxu0 %vm115_vm0, %v65_v46 }
 0x542   :  { %2558 = vmatpush.msra.mxu3 %v4857_v56 }
 0x543   :  { %2203 = vmatpush.msrb.mxu0 %v4855_v34 }
 0x544   :  { %v1777_v48 = vpop.permute.xlu1 %1776  ;;  %v1774_v26 = vpop.permute.xlu0 %1773  ;;  %2559 = vmatpush.msra.mxu3 %v4861_v38 }
 0x545   :  { %v1790_v57 = vperm.slane %v1774_v26, %v4584_v11  ;;  %v1791_v60 = vperm.slane %v1777_v48, %v4584_v11  ;;  %2204 = vmatpush.msrb.mxu0 %v4857_v56 }
 0x546   :  { %2560 = vmatpush.msra.mxu3 %v4866_v28 }
 0x547   :  { %v1797_v59 = vsel %vm677_vm12, %v1790_v57, %v1796_v55  ;;  %2205 = vmatpush.msrb.mxu0 %v4861_v38 }
 0x548   :  { %v1798_v58 = vsel %vm1427_vm14, %v1791_v60, %v1797_v59 }
 0x549   :  { %v1799_v2 = vsel %vm1429_vm15, %v1792_v53, %v1798_v58  ;;  %2206 = vmatpush.msrb.mxu0 %v4866_v28 }
 0x54c   :  { %v1786_v1 = vpop.permute.xlu1 %1785  ;;  %v1783_v62 = vpop.permute.xlu0 %1782 }
 0x54d   :  { %v1794_v0 = vperm.slane %v1786_v1, %v4584_v11  ;;  %v1793_v35 = vperm.slane %v1783_v62, %v4584_v11 }
 0x54f   :  { %v1800_v4 = vsel %vm1431_vm10, %v1793_v35, %v1799_v2 }
 0x550   :  { %v1801_v50 = vsel %vm1433_vm8, %v1794_v0, %v1800_v4 }
 0x551   :  { %3827 = vmatmul.msk.f32.vlgmr.msra.gmra.mxu1 %vm439_vm7, %v1801_v50 }
 0x552   :  { %2321 = vmatpush.msra.mxu1 %v4855_v34 }
 0x554   :  { %2322 = vmatpush.msra.mxu1 %v4857_v56 }
 0x556   :  { %2323 = vmatpush.msra.mxu1 %v4861_v38 }
 0x558   :  { %2324 = vmatpush.msra.mxu1 %v4866_v28 }
 0x559   :  { %3834 = vmatmul.msk.f32.vlgmr.msrb.gmra.mxu1 %vm5280_vm2, %v4338_v12 }
 0x55a   :  { %2793 = vmatpush.msrb.mxu1 %v4855_v34 }
 0x55c   :  { %2794 = vmatpush.msrb.mxu1 %v4857_v56 }
 0x55e   :  { %2795 = vmatpush.msrb.mxu1 %v4861_v38 }
 0x560   :  { %2796 = vmatpush.msrb.mxu1 %v4866_v28 }
 0x561   :  { %3835 = vmatmul.msk.f32.gmra.mxu1 %vm5280_vm2, %v4343_v18 }
 0x568   :  { %v859_v3 = vpop.f32.mrf.mxu0 }
 0x569   :  { %v3818_v21 = vmul.f32 -1.442695, %v859_v3 }
 0x56b   :  { %3973 = vpow2.f32 %v3818_v21 }
 0x571   :  { %v3974_v5 = vpop.eup %3973 }
 0x572   :  { %v915_v47 = vadd.f32 1.0, %v3974_v5 }
 0x574   :  { %3975 = vrcp.f32 %v915_v47  ;;  %v928_v7 = vand.u32 2147483648, %v915_v47  ;;  %v926_v41 = vand.u32 2147483647, %v915_v47  ;;  %vm922_vm7 = vweird.f32 %v915_v47 }
 0x576   :  { %v929_v12 = vor.u32 1.1754944e-38, %v928_v7  ;;  %vm927_vm13 = vcmp.eq.f32.partialorder %v926_v41, 8.507059e+37 }
 0x57a   :  { %v3976_v11 = vpop.eup %3975 }
 0x57b   :  { %v918_v44 = vmul.f32 %v3976_v11, %v915_v47  ;;  %vm923_vm11 = vweird.f32 %v3976_v11 }
 0x57c   :  { %vm924_vm12 = vmor %vm922_vm7, %vm923_vm11  ;;  %v4902_v21 = vpop.permute.xlu1 %2027 }
 0x57d   :  { %v919_v45 = vsub.f32 1.0, %v918_v44 }
 0x57f   :  { %v920_v63 = vmul.f32 %v3976_v11, %v919_v45 }
 0x581   :  { %v921_v54 = vadd.f32 %v3976_v11, %v920_v63 }
 0x583   :  { %v925_v8 = vsel %vm924_vm12, %v3976_v11, %v921_v54 }
 0x584   :  { %v930_v18 = vsel %vm927_vm13, %v929_v12, %v925_v8  ;;  %v3912_v12 = vld [vmem:[#allocation2 + $0xb0] ss:$0 sm:$0xff] }
 0x585   :  { %947 = vxpose.xlu2.b32.start.end [1/1] (short) (narrow) %v930_v18, 8  ;;  %v906_v29 = vpop.f32.mrf.mxu1 }
 0x586   :  { %v3819_v9 = vmul.f32 -1.442695, %v906_v29 }
 0x588   :  { %3977 = vpow2.f32 %v3819_v9 }
 0x58e   :  { %v3978_v13 = vpop.eup %3977 }
 0x58f   :  { %v916_v20 = vadd.f32 1.0, %v3978_v13 }
 0x591   :  { %3979 = vrcp.f32 %v916_v20  ;;  %v943_v27 = vand.u32 2147483648, %v916_v20  ;;  %v941_v22 = vand.u32 2147483647, %v916_v20  ;;  %vm937_vm15 = vweird.f32 %v916_v20 }
 0x593   :  { %v944_v42 = vor.u32 1.1754944e-38, %v943_v27  ;;  %vm942_vm8 = vcmp.eq.f32.partialorder %v941_v22, 8.507059e+37 }
 0x597   :  { %v3980_v10 = vpop.eup %3979 }
 0x598   :  { %v933_v24 = vmul.f32 %v3980_v10, %v916_v20  ;;  %vm938_vm14 = vweird.f32 %v3980_v10 }
 0x599   :  { %vm939_vm10 = vmor %vm937_vm15, %vm938_vm14 }
 0x59a   :  { %v934_v19 = vsub.f32 1.0, %v933_v24 }
 0x59c   :  { %v935_v17 = vmul.f32 %v3980_v10, %v934_v19 }
 0x59e   :  { %v936_v23 = vadd.f32 %v3980_v10, %v935_v17 }
 0x5a0   :  { %v940_v40 = vsel %vm939_vm10, %v3980_v10, %v936_v23 }
 0x5a1   :  { %v945_v51 = vsel %vm942_vm8, %v944_v42, %v940_v40 }
 0x5a2   :  { %979 = vxpose.xlu0.b32.start.end [1/1] (short) (narrow) %v945_v51, 8 }
 0x5b2   :  { %v1752_v49 = vpop.f32.mrf.mxu0 }
 0x5b3   :  { %v3828_v31 = vmul.f32 -1.442695, %v1752_v49 }
 0x5b5   :  { %3981 = vpow2.f32 %v3828_v31 }
 0x5ba   :  { %v1978_v5 = vpop.f32.mrf.mxu3 }
 0x5bb   :  { %v3982_v25 = vpop.eup %3981  ;;  %v2030_v47 = vadd.f32 %v4902_v21, %v1978_v5  ;;  %v1982_v19 = vrot.slane %v1978_v5, 1 }
 0x5bc   :  { %v1830_v36 = vadd.f32 1.0, %v3982_v25 }
 0x5bd   :  { %v2032_v11 = vrot.slane %v2030_v47, 1 }
 0x5be   :  { %3983 = vrcp.f32 %v1830_v36  ;;  %v1843_v6 = vand.u32 2147483648, %v1830_v36  ;;  %v1841_v61 = vand.u32 2147483647, %v1830_v36  ;;  %vm1837_vm7 = vweird.f32 %v1830_v36 }
 0x5bf   :  { %2035 = vrot.lane.b32.xlu1 %v2032_v11, %s4216_s28 }
 0x5c0   :  { %v1844_v48 = vor.u32 1.1754944e-38, %v1843_v6  ;;  %vm1842_vm13 = vcmp.eq.f32.partialorder %v1841_v61, 8.507059e+37 }
 0x5c4   :  { %v3984_v37 = vpop.eup %3983 }
 0x5c5   :  { %v1833_v15 = vmul.f32 %v3984_v37, %v1830_v36  ;;  %vm1838_vm11 = vweird.f32 %v3984_v37 }
 0x5c6   :  { %vm1839_vm12 = vmor %vm1837_vm7, %vm1838_vm11 }
 0x5c7   :  { %v1834_v14 = vsub.f32 1.0, %v1833_v15  ;;  %2033 = vrot.lane.b32.xlu1 %v2030_v47, %s4216_s28 }
 0x5c9   :  { %v1835_v39 = vmul.f32 %v3984_v37, %v1834_v14 }
 0x5cb   :  { %v1836_v43 = vadd.f32 %v3984_v37, %v1835_v39 }
 0x5cd   :  { %v1840_v26 = vsel %vm1839_vm12, %v3984_v37, %v1836_v43 }
 0x5ce   :  { %v1821_v52 = vpop.f32.mrf.mxu1  ;;  %v1845_v57 = vsel %vm1842_vm13, %v1844_v48, %v1840_v26 }
 0x5cf   :  { %v3829_v60 = vmul.f32 -1.442695, %v1821_v52  ;;  %3837 = vmatmul.msk.f32.vlgmr.msrb.gmra.mxu2 %vm5280_vm2, %v1845_v57 }
 0x5d1   :  { %3985 = vpow2.f32 %v3829_v60 }
 0x5d6   :  { %v1914_v7 = vpop.f32.mrf.mxu1 }
 0x5d7   :  { %v3986_v55 = vpop.eup %3985 }
 0x5d8   :  { %v1831_v59 = vadd.f32 1.0, %v3986_v55 }
 0x5da   :  { %3987 = vrcp.f32 %v1831_v59  ;;  %v1858_v1 = vand.u32 2147483648, %v1831_v59  ;;  %v1856_v0 = vand.u32 2147483647, %v1831_v59  ;;  %vm1852_vm15 = vweird.f32 %v1831_v59 }
 0x5dc   :  { %v1859_v2 = vor.u32 1.1754944e-38, %v1858_v1  ;;  %vm1857_vm8 = vcmp.eq.f32.partialorder %v1856_v0, 8.507059e+37 }
 0x5de   :  { %v1917_v9 = vpop.f32.mrf.mxu1 }
 0x5e0   :  { %v3988_v16 = vpop.eup %3987 }
 0x5e1   :  { %v1848_v58 = vmul.f32 %v3988_v16, %v1831_v59  ;;  %vm1853_vm14 = vweird.f32 %v3988_v16 }
 0x5e2   :  { %vm1854_vm10 = vmor %vm1852_vm15, %vm1853_vm14 }
 0x5e3   :  { %v1849_v53 = vsub.f32 1.0, %v1848_v58 }
 0x5e5   :  { %v1850_v62 = vmul.f32 %v3988_v16, %v1849_v53 }
 0x5e7   :  { %v1851_v35 = vadd.f32 %v3988_v16, %v1850_v62 }
 0x5e9   :  { %v1855_v4 = vsel %vm1854_vm10, %v3988_v16, %v1851_v35 }
 0x5ea   :  { %v1860_v50 = vsel %vm1857_vm8, %v1859_v2, %v1855_v4 }
 0x5eb   :  { %3838 = vmatmul.msk.f32.gmra.mxu2 %vm5280_vm2, %v1860_v50 }
 0x61e   :  { %v963_v3 = vpop.trf.xlu2 }
 0x61f   :  { %3831 = vmatmul.msk.f32.vlgmr.msra.gmra.mxu0 %vm5280_vm2, %v963_v3 }
 0x620   :  { %2675 = vmatpush.msra.mxu0 %v4855_v34 }
 0x622   :  { %2676 = vmatpush.msra.mxu0 %v4857_v56 }
 0x624   :  { %2677 = vmatpush.msra.mxu0 %v4861_v38 }
 0x626   :  { %2678 = vmatpush.msra.mxu0 %v4866_v28 }
 0x631   :  { %v2036_v37 = vpop.permute.xlu1 %2035 }
 0x639   :  { %v2034_v57 = vpop.permute.xlu1 %2033 }
 0x646   :  { %v995_v44 = vpop.trf.xlu0 }
 0x647   :  { %3832 = vmatmul.msk.f32.gmra.mxu0 %vm5280_vm2, %v995_v44 }
 0x652   :  { %v1946_v41 = vpop.f32.mrf.mxu2 }
 0x66e   :  { %v1949_v10 = vpop.f32.mrf.mxu2 }
 0x69c   :  { %v1888_v45 = vpop.f32.mrf.mxu0 }
 0x69d   :  { %v1915_v63 = vadd.f32 %v1914_v7, %v1888_v45 }
 0x69f   :  { %v1952_v54 = vadd.f32 %v1946_v41, %v1915_v63 }
 0x6a1   :  { %v4908_v8 = vadd.f32 %v3912_v12, %v1952_v54 }
 0x6a3   :  { %v1985_v18 = vadd.f32 %v1978_v5, %v4908_v8 }
 0x6a5   :  { %v3839_v29 = vmul.f32 -1.442695, %v1985_v18 }
 0x6a7   :  { %3989 = vpow2.f32 %v3839_v29 }
 0x6ad   :  { %v3990_v17 = vpop.eup %3989 }
 0x6ae   :  { %v1993_v42 = vadd.f32 1.0, %v3990_v17 }
 0x6b0   :  { %v2006_v61 = vand.u32 2147483648, %v1993_v42  ;;  %vm2000_vm15 = vweird.f32 %v1993_v42  ;;  %v2004_v46 = vand.u32 2147483647, %v1993_v42 }
 0x6b2   :  { %v2007_v52 = vor.u32 1.1754944e-38, %v2006_v61  ;;  %vm2005_vm8 = vcmp.eq.f32.partialorder %v2004_v46, 8.507059e+37 }
 0x6c4   :  { %v1891_v13 = vpop.f32.mrf.mxu0 }
 0x6c5   :  { %v1918_v20 = vadd.f32 %v1917_v9, %v1891_v13 }
 0x6c7   :  { %v1953_v24 = vadd.f32 %v1949_v10, %v1918_v20 }
 0x6c9   :  { %v4911_v27 = vadd.f32 %v3912_v12, %v1953_v24 }
 0x6cb   :  { %v1986_v22 = vadd.f32 %v1982_v19, %v4911_v27 }
 0x6cd   :  { %v3840_v23 = vmul.f32 -1.442695, %v1986_v22 }
 0x6cf   :  { %3991 = vpow2.f32 %v3840_v23 }
 0x6d0   :  { %3993 = vrcp.f32 %v1993_v42 }
 0x6d5   :  { %v3992_v40 = vpop.eup %3991 }
 0x6d6   :  { %v1994_v51 = vadd.f32 1.0, %v3992_v40  ;;  %v3994_v34 = vpop.eup %3993 }
 0x6d7   :  { %v1996_v56 = vmul.f32 %v3994_v34, %v1993_v42  ;;  %vm2001_vm13 = vweird.f32 %v3994_v34 }
 0x6d8   :  { %3995 = vrcp.f32 %v1994_v51  ;;  %v2021_v31 = vand.u32 2147483648, %v1994_v51  ;;  %v2019_v36 = vand.u32 2147483647, %v1994_v51  ;;  %vm2015_vm7 = vweird.f32 %v1994_v51  ;;  %vm2002_vm10 = vmor %vm2000_vm15, %vm2001_vm13 }
 0x6d9   :  { %v1997_v38 = vsub.f32 1.0, %v1996_v56 }
 0x6da   :  { %v2022_v14 = vor.u32 1.1754944e-38, %v2021_v31  ;;  %vm2020_vm14 = vcmp.eq.f32.partialorder %v2019_v36, 8.507059e+37 }
 0x6db   :  { %v1998_v32 = vmul.f32 %v3994_v34, %v1997_v38 }
 0x6dd   :  { %v1999_v6 = vadd.f32 %v3994_v34, %v1998_v32 }
 0x6de   :  { %v3996_v33 = vpop.eup %3995 }
 0x6df   :  { %v2011_v28 = vmul.f32 %v3996_v33, %v1994_v51  ;;  %vm2016_vm11 = vweird.f32 %v3996_v33  ;;  %v2003_v26 = vsel %vm2002_vm10, %v3994_v34, %v1999_v6 }
 0x6e0   :  { %vm2017_vm12 = vmor %vm2015_vm7, %vm2016_vm11  ;;  %v2008_v60 = vsel %vm2005_vm8, %v2007_v52, %v2003_v26  ;;  %vm1957_vm11 = vcmask 261120  }
 0x6e1   :  { %v2012_v49 = vsub.f32 1.0, %v2011_v28  ;;  %v2039_v55 = vmul.f32 %v2034_v57, %v2008_v60  ;;  %v2053_v35 = vsub.f32 1.0, %v2008_v60  ;;  %v2065_v47 = vmul.f32 0.0, %v2008_v60 }
 0x6e3   :  { %v2013_v25 = vmul.f32 %v3996_v33, %v2012_v49 }
 0x6e5   :  { %v2014_v15 = vadd.f32 %v3996_v33, %v2013_v25 }
 0x6e7   :  { %v2018_v39 = vsel %vm2017_vm12, %v3996_v33, %v2014_v15 }
 0x6e8   :  { %v2023_v43 = vsel %vm2020_vm14, %v2022_v14, %v2018_v39 }
 0x6e9   :  { %v2040_v48 = vmul.f32 %v2036_v37, %v2023_v43  ;;  %v2054_v2 = vsub.f32 1.0, %v2023_v43  ;;  %v2066_v3 = vmul.f32 0.0, %v2023_v43 }
 0x6eb   :  { %2045 = vrot.lane.b32.xlu1 %v2040_v48, %s4216_s28 }
 0x6f3   :  { %2043 = vrot.lane.b32.xlu1 %v2039_v55, %s4216_s28 }
 0x75d   :  { %v2046_v59 = vpop.permute.xlu1 %2045 }
 0x75e   :  { %v2050_v16 = vadd.f32 %v2046_v59, %v4911_v27 }
 0x760   :  { %3997 = vtanh.f32 %v2050_v16 }
 0x765   :  { %v2044_v58 = vpop.permute.xlu1 %2043 }
 0x766   :  { %v3998_v53 = vpop.eup %3997  ;;  %v2049_v1 = vadd.f32 %v2044_v58, %v4908_v8 }
 0x767   :  { %2059 = vrot.lane.b32.xlu0 %v3998_v53, %s4219_s0 }
 0x768   :  { %3999 = vtanh.f32 %v2049_v1 }
 0x76e   :  { %v4000_v62 = vpop.eup %3999 }
 0x76f   :  { %2057 = vrot.lane.b32.xlu2 %v4000_v62, %s4219_s0 }
 0x7c9   :  { %v2058_v0 = vpop.permute.xlu2 %2057 }
 0x7ca   :  { %v2063_v50 = vmul.f32 %v2058_v0, %v2053_v35 }
 0x7cc   :  { %v4922_v44 = vadd.f32 %v2065_v47, %v2063_v50 }
 0x7ce   :  { %v2176_v53 = vrot.slane %v4922_v44, 7 }
 0x7d9   :  { %v2060_v4 = vpop.permute.xlu0 %2059 }
 0x7da   :  { %v2064_v5 = vmul.f32 %v2060_v4, %v2054_v2 }
 0x7dc   :  { %v4920_v11 = vadd.f32 %v2066_v3, %v2064_v5 }
 0x7de   :  { %v2071_v45 = vrot.slane %v4920_v11, 7 }
 0x7e0   :  { %v2072_v7 = vsel %vm673_vm9, %v2071_v45, %v4922_v44 }
 0x7e1   :  { %2073 = vrot.lane.b32.xlu1 %v2072_v7, %s4219_s0 }
 0x853   :  { %v2074_v63 = vpop.permute.xlu1 %2073 }
 0x854   :  { %3841 = vmatmul.msk.f32.vlgmr.msrb.gmra.mxu3 %vm1957_vm11, %v2074_v63 }
 0x8d7   :  { %v2094_v41 = vpop.f32.mrf.mxu3 }
 0x8d8   :  { %v2141_v54 = vadd.f32 %v2094_v41, %v4902_v21  ;;  %v2098_v18 = vrot.slane %v2094_v41, 7  ;;  %v2102_v13 = vadd.f32 %v2094_v41, %v4911_v27 }
 0x8da   :  { %v2143_v12 = vrot.slane %v2141_v54, 7  ;;  %v2101_v29 = vadd.f32 %v2098_v18, %v4908_v8  ;;  %v3843_v20 = vmul.f32 -1.442695, %v2102_v13 }
 0x8dc   :  { %2144 = vrot.lane.b32.xlu1 %v2143_v12, %s4216_s28  ;;  %v3842_v9 = vmul.f32 -1.442695, %v2101_v29 }
 0x8de   :  { %4001 = vpow2.f32 %v3842_v9 }
 0x8df   :  { %4003 = vpow2.f32 %v3843_v20 }
 0x8e4   :  { %2146 = vrot.lane.b32.xlu1 %v2141_v54, %s4216_s28  ;;  %v4002_v10 = vpop.eup %4001 }
 0x8e5   :  { %v2109_v24 = vadd.f32 1.0, %v4002_v10  ;;  %v4004_v19 = vpop.eup %4003 }
 0x8e6   :  { %v2110_v17 = vadd.f32 1.0, %v4004_v19 }
 0x8e7   :  { %4005 = vrcp.f32 %v2109_v24  ;;  %v2122_v38 = vand.u32 2147483648, %v2109_v24  ;;  %vm2116_vm12 = vweird.f32 %v2109_v24  ;;  %v2120_v28 = vand.u32 2147483647, %v2109_v24 }
 0x8e8   :  { %4007 = vrcp.f32 %v2110_v17  ;;  %v2137_v14 = vand.u32 2147483648, %v2110_v17  ;;  %vm2131_vm10 = vweird.f32 %v2110_v17  ;;  %v2135_v6 = vand.u32 2147483647, %v2110_v17 }
 0x8e9   :  { %v2123_v32 = vor.u32 1.1754944e-38, %v2122_v38  ;;  %vm2121_vm14 = vcmp.eq.f32.partialorder %v2120_v28, 8.507059e+37 }
 0x8ea   :  { %v2138_v61 = vor.u32 1.1754944e-38, %v2137_v14  ;;  %vm2136_vm2 = vcmp.eq.f32.partialorder %v2135_v6, 8.507059e+37 }
 0x8ed   :  { %v4006_v22 = vpop.eup %4005 }
 0x8ee   :  { %v2112_v23 = vmul.f32 %v4006_v22, %v2109_v24  ;;  %v4008_v40 = vpop.eup %4007  ;;  %vm2117_vm7 = vweird.f32 %v4006_v22 }
 0x8ef   :  { %v2127_v34 = vmul.f32 %v4008_v40, %v2110_v17  ;;  %vm2118_vm13 = vmor %vm2116_vm12, %vm2117_vm7  ;;  %vm2132_vm15 = vweird.f32 %v4008_v40 }
 0x8f0   :  { %v2113_v42 = vsub.f32 1.0, %v2112_v23  ;;  %vm2133_vm8 = vmor %vm2131_vm10, %vm2132_vm15 }
 0x8f1   :  { %v2128_v33 = vsub.f32 1.0, %v2127_v34 }
 0x8f2   :  { %v2114_v51 = vmul.f32 %v4006_v22, %v2113_v42 }
 0x8f3   :  { %v2129_v31 = vmul.f32 %v4008_v40, %v2128_v33 }
 0x8f4   :  { %v2115_v56 = vadd.f32 %v4006_v22, %v2114_v51 }
 0x8f5   :  { %v2130_v15 = vadd.f32 %v4008_v40, %v2129_v31 }
 0x8f6   :  { %v2119_v49 = vsel %vm2118_vm13, %v4006_v22, %v2115_v56 }
 0x8f7   :  { %v2124_v36 = vsel %vm2121_vm14, %v2123_v32, %v2119_v49  ;;  %v2134_v39 = vsel %vm2133_vm8, %v4008_v40, %v2130_v15 }
 0x8f8   :  { %v2139_v46 = vsel %vm2136_vm2, %v2138_v61, %v2134_v39  ;;  %v2164_v58 = vsub.f32 1.0, %v2124_v36  ;;  %v2179_v62 = vmul.f32 %v2176_v53, %v2124_v36 }
 0x8f9   :  { %v2165_v35 = vsub.f32 1.0, %v2139_v46  ;;  %v2180_v4 = vmul.f32 %v2139_v46, %v2071_v45 }
 0x94e   :  { %v2145_v25 = vpop.permute.xlu1 %2144 }
 0x94f   :  { %v2150_v37 = vmul.f32 %v2145_v25, %v2124_v36 }
 0x951   :  { %2154 = vrot.lane.b32.xlu1 %v2150_v37, %s4216_s28 }
 0x956   :  { %v2147_v43 = vpop.permute.xlu1 %2146 }
 0x957   :  { %v2151_v48 = vmul.f32 %v2147_v43, %v2139_v46 }
 0x959   :  { %2156 = vrot.lane.b32.xlu1 %v2151_v48, %s4216_s28 }
 0x9c3   :  { %v2155_v26 = vpop.permute.xlu1 %2154 }
 0x9c4   :  { %v2160_v52 = vadd.f32 %v2155_v26, %v4908_v8 }
 0x9c6   :  { %4009 = vtanh.f32 %v2160_v52 }
 0x9cb   :  { %v2157_v57 = vpop.permute.xlu1 %2156 }
 0x9cc   :  { %v4010_v60 = vpop.eup %4009  ;;  %v2161_v55 = vadd.f32 %v2157_v57, %v4911_v27 }
 0x9cd   :  { %2168 = vrot.lane.b32.xlu1 %v4010_v60, %s4219_s0 }
 0x9ce   :  { %4011 = vtanh.f32 %v2161_v55 }
 0x9d4   :  { %v4012_v59 = vpop.eup %4011 }
 0x9d5   :  { %2170 = vrot.lane.b32.xlu1 %v4012_v59, %s4219_s0 }
 0xa3f   :  { %v2169_v16 = vpop.permute.xlu1 %2168 }
 0xa40   :  { %v2174_v1 = vmul.f32 %v2169_v16, %v2164_v58 }
 0xa42   :  { %v4943_v0 = vadd.f32 %v2179_v62, %v2174_v1 }
 0xa44   :  { %v2185_v3 = vrot.slane %v4943_v0, 1  ;;  %v2292_v53 = vrot.slane %v4943_v0, 7 }
 0xa47   :  { %v2171_v2 = vpop.permute.xlu1 %2170 }
 0xa48   :  { %v2175_v50 = vmul.f32 %v2171_v2, %v2165_v35 }
 0xa4a   :  { %v4948_v5 = vadd.f32 %v2180_v4, %v2175_v50 }
 0xa4c   :  { %v2186_v47 = vsel %vm673_vm9, %v4948_v5, %v2185_v3  ;;  %v2293_v16 = vrot.slane %v4948_v5, 7 }
 0xa4d   :  { %2187 = vrot.lane.b32.xlu1 %v2186_v47, %s4219_s0 }
 0xabf   :  { %v2188_v44 = vpop.permute.xlu1 %2187 }
 0xac0   :  { %3844 = vmatmul.msk.f32.vlgmr.msrb.gmra.mxu0 %vm1957_vm11, %v2188_v44 }
 0xb3d   :  { %v2208_v7 = vpop.f32.mrf.mxu0 }
 0xb3e   :  { %v2256_v63 = vadd.f32 %v2208_v7, %v4902_v21  ;;  %v2212_v45 = vrot.slane %v2208_v7, 6  ;;  %v2213_v12 = vrot.slane %v2208_v7, 7 }
 0xb40   :  { %v2258_v41 = vrot.slane %v2256_v63, 6  ;;  %v2259_v11 = vrot.slane %v2256_v63, 7  ;;  %v2216_v54 = vadd.f32 %v2212_v45, %v4908_v8  ;;  %v2217_v29 = vadd.f32 %v2213_v12, %v4911_v27 }
 0xb42   :  { %2260 = vrot.lane.b32.xlu1 %v2258_v41, %s4216_s28  ;;  %v3845_v18 = vmul.f32 -1.442695, %v2216_v54  ;;  %v3846_v9 = vmul.f32 -1.442695, %v2217_v29 }
 0xb44   :  { %4013 = vpow2.f32 %v3845_v18 }
 0xb45   :  { %4015 = vpow2.f32 %v3846_v9 }
 0xb4a   :  { %2262 = vrot.lane.b32.xlu1 %v2259_v11, %s4216_s28  ;;  %v4014_v13 = vpop.eup %4013 }
 0xb4b   :  { %v2224_v20 = vadd.f32 1.0, %v4014_v13  ;;  %v4016_v10 = vpop.eup %4015 }
 0xb4c   :  { %v2225_v24 = vadd.f32 1.0, %v4016_v10 }
 0xb4d   :  { %4017 = vrcp.f32 %v2224_v20  ;;  %v2237_v56 = vand.u32 2147483648, %v2224_v20  ;;  %vm2231_vm7 = vweird.f32 %v2224_v20  ;;  %v2235_v33 = vand.u32 2147483647, %v2224_v20 }
 0xb4e   :  { %4019 = vrcp.f32 %v2225_v24  ;;  %v2252_v37 = vand.u32 2147483648, %v2225_v24  ;;  %vm2246_vm15 = vweird.f32 %v2225_v24  ;;  %v2250_v15 = vand.u32 2147483647, %v2225_v24 }
 0xb4f   :  { %v2238_v49 = vor.u32 1.1754944e-38, %v2237_v56  ;;  %vm2236_vm13 = vcmp.eq.f32.partialorder %v2235_v33, 8.507059e+37 }
 0xb50   :  { %v2253_v6 = vor.u32 1.1754944e-38, %v2252_v37  ;;  %vm2251_vm8 = vcmp.eq.f32.partialorder %v2250_v15, 8.507059e+37 }
 0xb53   :  { %v4018_v19 = vpop.eup %4017 }
 0xb54   :  { %v2227_v17 = vmul.f32 %v4018_v19, %v2224_v20  ;;  %v4020_v23 = vpop.eup %4019  ;;  %vm2232_vm2 = vweird.f32 %v4018_v19 }
 0xb55   :  { %v2242_v40 = vmul.f32 %v4020_v23, %v2225_v24  ;;  %vm2233_vm12 = vmor %vm2231_vm7, %vm2232_vm2  ;;  %vm2247_vm14 = vweird.f32 %v4020_v23 }
 0xb56   :  { %v2228_v22 = vsub.f32 1.0, %v2227_v17  ;;  %vm2248_vm10 = vmor %vm2246_vm15, %vm2247_vm14 }
 0xb57   :  { %v2243_v34 = vsub.f32 1.0, %v2242_v40 }
 0xb58   :  { %v2229_v42 = vmul.f32 %v4018_v19, %v2228_v22 }
 0xb59   :  { %v2244_v28 = vmul.f32 %v4020_v23, %v2243_v34 }
 0xb5a   :  { %v2230_v51 = vadd.f32 %v4018_v19, %v2229_v42 }
 0xb5b   :  { %v2245_v36 = vadd.f32 %v4020_v23, %v2244_v28 }
 0xb5c   :  { %v2234_v38 = vsel %vm2233_vm12, %v4018_v19, %v2230_v51 }
 0xb5d   :  { %v2239_v32 = vsel %vm2236_vm13, %v2238_v49, %v2234_v38  ;;  %v2249_v14 = vsel %vm2248_vm10, %v4020_v23, %v2245_v36 }
 0xb5e   :  { %v2254_v61 = vsel %vm2251_vm8, %v2253_v6, %v2249_v14  ;;  %v2280_v62 = vsub.f32 1.0, %v2239_v32  ;;  %v2296_v4 = vmul.f32 %v2292_v53, %v2239_v32 }
 0xb5f   :  { %v2281_v59 = vsub.f32 1.0, %v2254_v61  ;;  %v2297_v1 = vmul.f32 %v2293_v16, %v2254_v61 }
 0xbb4   :  { %v2261_v31 = vpop.permute.xlu1 %2260 }
 0xbb5   :  { %v2266_v25 = vmul.f32 %v2261_v31, %v2239_v32 }
 0xbb7   :  { %2270 = vrot.lane.b32.xlu1 %v2266_v25, %s4216_s28 }
 0xbbc   :  { %v2263_v39 = vpop.permute.xlu1 %2262 }
 0xbbd   :  { %v2267_v43 = vmul.f32 %v2263_v39, %v2254_v61 }
 0xbbf   :  { %2272 = vrot.lane.b32.xlu1 %v2267_v43, %s4216_s28 }
 0xc29   :  { %v2271_v46 = vpop.permute.xlu1 %2270 }
 0xc2a   :  { %v2276_v48 = vadd.f32 %v2271_v46, %v4908_v8 }
 0xc2c   :  { %4021 = vtanh.f32 %v2276_v48 }
 0xc31   :  { %v2273_v26 = vpop.permute.xlu1 %2272 }
 0xc32   :  { %v4022_v52 = vpop.eup %4021  ;;  %v2277_v57 = vadd.f32 %v2273_v26, %v4911_v27 }
 0xc33   :  { %2284 = vrot.lane.b32.xlu1 %v4022_v52, %s4219_s0 }
 0xc34   :  { %4023 = vtanh.f32 %v2277_v57 }
 0xc3a   :  { %v4024_v60 = vpop.eup %4023 }
 0xc3b   :  { %2286 = vrot.lane.b32.xlu2 %v4024_v60, %s4219_s0 }
 0xc95   :  { %v2287_v55 = vpop.permute.xlu2 %2286 }
 0xc96   :  { %v2291_v58 = vmul.f32 %v2287_v55, %v2281_v59 }
 0xc98   :  { %v2299_v2 = vadd.f32 %v2297_v1, %v2291_v58 }
 0xc9a   :  { %v2303_v47 = vrot.slane %v2299_v2, 1  ;;  %v2411_v23 = vrot.slane %v2299_v2, 7 }
 0xca5   :  { %v2285_v35 = vpop.permute.xlu1 %2284 }
 0xca6   :  { %v2290_v50 = vmul.f32 %v2285_v35, %v2280_v62 }
 0xca8   :  { %v4967_v3 = vadd.f32 %v2296_v4, %v2290_v50 }
 0xcaa   :  { %v2302_v44 = vrot.slane %v4967_v3, 2  ;;  %v2410_v16 = vrot.slane %v4967_v3, 7 }
 0xcac   :  { %v2304_v7 = vsel %vm673_vm9, %v2303_v47, %v2302_v44 }
 0xcad   :  { %2305 = vrot.lane.b32.xlu0 %v2304_v7, %s4219_s0 }
 0xd1f   :  { %v2306_v63 = vpop.permute.xlu0 %2305 }
 0xd20   :  { %3847 = vmatmul.msk.f32.vlgmr.msra.gmra.mxu1 %vm1957_vm11, %v2306_v63 }
 0xd9d   :  { %v2326_v5 = vpop.f32.mrf.mxu1 }
 0xd9e   :  { %v2331_v0 = vrot.slane %v2326_v5, 6  ;;  %v2374_v41 = vadd.f32 %v2326_v5, %v4902_v21  ;;  %v2330_v34 = vrot.slane %v2326_v5, 5 }
 0xda0   :  { %v2335_v11 = vadd.f32 %v2331_v0, %v4911_v27  ;;  %v2377_v45 = vrot.slane %v2374_v41, 6  ;;  %v2376_v54 = vrot.slane %v2374_v41, 5  ;;  %v2334_v56 = vadd.f32 %v2330_v34, %v4908_v8 }
 0xda2   :  { %v3849_v12 = vmul.f32 -1.442695, %v2335_v11  ;;  %2380 = vrot.lane.b32.xlu2 %v2377_v45, %s4216_s28  ;;  %2378 = vrot.lane.b32.xlu1 %v2376_v54, %s4216_s28  ;;  %v3848_v33 = vmul.f32 -1.442695, %v2334_v56 }
 0xda4   :  { %4025 = vpow2.f32 %v3849_v12 }
 0xdaa   :  { %v4026_v18 = vpop.eup %4025 }
 0xdab   :  { %v2343_v29 = vadd.f32 1.0, %v4026_v18 }
 0xdad   :  { %4027 = vrcp.f32 %v2343_v29  ;;  %v2370_v10 = vand.u32 2147483648, %v2343_v29  ;;  %v2368_v19 = vand.u32 2147483647, %v2343_v29  ;;  %vm2364_vm7 = vweird.f32 %v2343_v29 }
 0xdae   :  { %4029 = vpow2.f32 %v3848_v33 }
 0xdaf   :  { %v2371_v22 = vor.u32 1.1754944e-38, %v2370_v10  ;;  %vm2369_vm13 = vcmp.eq.f32.partialorder %v2368_v19, 8.507059e+37 }
 0xdb3   :  { %v4028_v9 = vpop.eup %4027 }
 0xdb4   :  { %v2360_v13 = vmul.f32 %v4028_v9, %v2343_v29  ;;  %vm2365_vm2 = vweird.f32 %v4028_v9  ;;  %v4030_v38 = vpop.eup %4029 }
 0xdb5   :  { %vm2366_vm12 = vmor %vm2364_vm7, %vm2365_vm2  ;;  %v2342_v28 = vadd.f32 1.0, %v4030_v38 }
 0xdb6   :  { %v2361_v20 = vsub.f32 1.0, %v2360_v13 }
 0xdb7   :  { %4031 = vrcp.f32 %v2342_v28  ;;  %v2355_v14 = vand.u32 2147483648, %v2342_v28  ;;  %vm2349_vm15 = vweird.f32 %v2342_v28  ;;  %v2353_v6 = vand.u32 2147483647, %v2342_v28 }
 0xdb8   :  { %v2362_v24 = vmul.f32 %v4028_v9, %v2361_v20 }
 0xdb9   :  { %v2356_v61 = vor.u32 1.1754944e-38, %v2355_v14  ;;  %vm2354_vm8 = vcmp.eq.f32.partialorder %v2353_v6, 8.507059e+37 }
 0xdba   :  { %v2363_v17 = vadd.f32 %v4028_v9, %v2362_v24 }
 0xdbc   :  { %v2367_v42 = vsel %vm2366_vm12, %v4028_v9, %v2363_v17 }
 0xdbd   :  { %v2372_v40 = vsel %vm2369_vm13, %v2371_v22, %v2367_v42  ;;  %v4032_v32 = vpop.eup %4031 }
 0xdbe   :  { %v2415_v51 = vmul.f32 %v2411_v23, %v2372_v40  ;;  %v2345_v25 = vmul.f32 %v4032_v32, %v2342_v28  ;;  %vm2350_vm14 = vweird.f32 %v4032_v32  ;;  %v2399_v53 = vsub.f32 1.0, %v2372_v40 }
 0xdbf   :  { %vm2351_vm10 = vmor %vm2349_vm15, %vm2350_vm14 }
 0xdc0   :  { %v2346_v36 = vsub.f32 1.0, %v2345_v25 }
 0xdc2   :  { %v2347_v37 = vmul.f32 %v4032_v32, %v2346_v36 }
 0xdc4   :  { %v2348_v15 = vadd.f32 %v4032_v32, %v2347_v37 }
 0xdc6   :  { %v2352_v39 = vsel %vm2351_vm10, %v4032_v32, %v2348_v15 }
 0xdc7   :  { %v2357_v46 = vsel %vm2354_vm8, %v2356_v61, %v2352_v39 }
 0xdc8   :  { %v2398_v58 = vsub.f32 1.0, %v2357_v46  ;;  %v2414_v35 = vmul.f32 %v2410_v16, %v2357_v46 }
 0xdfc   :  { %v2381_v49 = vpop.permute.xlu2 %2380 }
 0xdfd   :  { %v2385_v31 = vmul.f32 %v2381_v49, %v2372_v40 }
 0xdff   :  { %2390 = vrot.lane.b32.xlu1 %v2385_v31, %s4216_s28 }
 0xe14   :  { %v2379_v43 = vpop.permute.xlu1 %2378 }
 0xe15   :  { %v2384_v48 = vmul.f32 %v2379_v43, %v2357_v46 }
 0xe17   :  { %2388 = vrot.lane.b32.xlu0 %v2384_v48, %s4216_s28 }
 0xe71   :  { %v2391_v26 = vpop.permute.xlu1 %2390 }
 0xe72   :  { %v2395_v52 = vadd.f32 %v2391_v26, %v4911_v27 }
 0xe74   :  { %4033 = vtanh.f32 %v2395_v52 }
 0xe7a   :  { %v4034_v57 = vpop.eup %4033 }
 0xe7b   :  { %2404 = vrot.lane.b32.xlu0 %v4034_v57, %s4219_s0 }
 0xe89   :  { %v2389_v60 = vpop.permute.xlu0 %2388 }
 0xe8a   :  { %v2394_v55 = vadd.f32 %v2389_v60, %v4908_v8 }
 0xe8c   :  { %4035 = vtanh.f32 %v2394_v55 }
 0xe92   :  { %v4036_v59 = vpop.eup %4035 }
 0xe93   :  { %2402 = vrot.lane.b32.xlu2 %v4036_v59, %s4219_s0 }
 0xeed   :  { %v2403_v1 = vpop.permute.xlu2 %2402  ;;  %v2405_v62 = vpop.permute.xlu0 %2404 }
 0xeee   :  { %v2408_v2 = vmul.f32 %v2403_v1, %v2398_v58  ;;  %v2409_v4 = vmul.f32 %v2405_v62, %v2399_v53 }
 0xef0   :  { %v2416_v50 = vadd.f32 %v2414_v35, %v2408_v2  ;;  %v4985_v47 = vadd.f32 %v2415_v51, %v2409_v4 }
 0xef2   :  { %v2420_v44 = vrot.slane %v2416_v50, 3  ;;  %v2421_v7 = vrot.slane %v4985_v47, 2  ;;  %v2528_v23 = vrot.slane %v2416_v50, 7  ;;  %v2529_v16 = vrot.slane %v4985_v47, 7 }
 0xef4   :  { %v2422_v63 = vsel %vm673_vm9, %v2421_v7, %v2420_v44 }
 0xef5   :  { %2423 = vrot.lane.b32.xlu1 %v2422_v63, %s4219_s0 }
 0xf67   :  { %v2424_v5 = vpop.permute.xlu1 %2423 }
 0xf68   :  { %3850 = vmatmul.msk.f32.vlgmr.msra.gmra.mxu2 %vm1957_vm11, %v2424_v5 }
 0xfeb   :  { %v2444_v3 = vpop.f32.mrf.mxu2 }
 0xfec   :  { %v2448_v0 = vrot.slane %v2444_v3, 4  ;;  %v2492_v41 = vadd.f32 %v2444_v3, %v4902_v21  ;;  %v2449_v34 = vrot.slane %v2444_v3, 5 }
 0xfee   :  { %v2452_v11 = vadd.f32 %v2448_v0, %v4908_v8  ;;  %v2495_v45 = vrot.slane %v2492_v41, 5  ;;  %v2494_v54 = vrot.slane %v2492_v41, 4  ;;  %v2453_v56 = vadd.f32 %v2449_v34, %v4911_v27 }
 0xff0   :  { %v3851_v12 = vmul.f32 -1.442695, %v2452_v11  ;;  %2498 = vrot.lane.b32.xlu0 %v2495_v45, %s4216_s28  ;;  %2496 = vrot.lane.b32.xlu2 %v2494_v54, %s4216_s28  ;;  %v3852_v33 = vmul.f32 -1.442695, %v2453_v56 }
 0xff2   :  { %4037 = vpow2.f32 %v3851_v12 }
 0xff8   :  { %v4038_v18 = vpop.eup %4037 }
 0xff9   :  { %v2460_v29 = vadd.f32 1.0, %v4038_v18 }
 0xffb   :  { %4039 = vrcp.f32 %v2460_v29  ;;  %v2473_v10 = vand.u32 2147483648, %v2460_v29  ;;  %v2471_v19 = vand.u32 2147483647, %v2460_v29  ;;  %vm2467_vm7 = vweird.f32 %v2460_v29 }
 0xffc   :  { %4041 = vpow2.f32 %v3852_v33 }
 0xffd   :  { %v2474_v22 = vor.u32 1.1754944e-38, %v2473_v10  ;;  %vm2472_vm13 = vcmp.eq.f32.partialorder %v2471_v19, 8.507059e+37 }
0x1001   :  { %v4040_v9 = vpop.eup %4039 }
0x1002   :  { %v2463_v13 = vmul.f32 %v4040_v9, %v2460_v29  ;;  %vm2468_vm2 = vweird.f32 %v4040_v9  ;;  %v4042_v38 = vpop.eup %4041 }
0x1003   :  { %vm2469_vm12 = vmor %vm2467_vm7, %vm2468_vm2  ;;  %v2461_v28 = vadd.f32 1.0, %v4042_v38 }
0x1004   :  { %v2464_v20 = vsub.f32 1.0, %v2463_v13 }
0x1005   :  { %4043 = vrcp.f32 %v2461_v28  ;;  %v2488_v14 = vand.u32 2147483648, %v2461_v28  ;;  %vm2482_vm15 = vweird.f32 %v2461_v28  ;;  %v2486_v6 = vand.u32 2147483647, %v2461_v28 }
0x1006   :  { %v2465_v24 = vmul.f32 %v4040_v9, %v2464_v20 }
0x1007   :  { %v2489_v61 = vor.u32 1.1754944e-38, %v2488_v14  ;;  %vm2487_vm8 = vcmp.eq.f32.partialorder %v2486_v6, 8.507059e+37 }
0x1008   :  { %v2466_v17 = vadd.f32 %v4040_v9, %v2465_v24 }
0x100a   :  { %v2470_v42 = vsel %vm2469_vm12, %v4040_v9, %v2466_v17 }
0x100b   :  { %v2475_v40 = vsel %vm2472_vm13, %v2474_v22, %v2470_v42  ;;  %v4044_v32 = vpop.eup %4043 }
0x100c   :  { %v2532_v51 = vmul.f32 %v2528_v23, %v2475_v40  ;;  %v2478_v25 = vmul.f32 %v4044_v32, %v2461_v28  ;;  %vm2483_vm14 = vweird.f32 %v4044_v32  ;;  %v2516_v53 = vsub.f32 1.0, %v2475_v40 }
0x100d   :  { %vm2484_vm10 = vmor %vm2482_vm15, %vm2483_vm14 }
0x100e   :  { %v2479_v36 = vsub.f32 1.0, %v2478_v25 }
0x1010   :  { %v2480_v37 = vmul.f32 %v4044_v32, %v2479_v36 }
0x1012   :  { %v2481_v15 = vadd.f32 %v4044_v32, %v2480_v37 }
0x1014   :  { %v2485_v39 = vsel %vm2484_vm10, %v4044_v32, %v2481_v15 }
0x1015   :  { %v2490_v46 = vsel %vm2487_vm8, %v2489_v61, %v2485_v39 }
0x1016   :  { %v2517_v58 = vsub.f32 1.0, %v2490_v46  ;;  %v2533_v35 = vmul.f32 %v2529_v16, %v2490_v46 }
0x104a   :  { %v2497_v49 = vpop.permute.xlu2 %2496 }
0x104b   :  { %v2502_v31 = vmul.f32 %v2497_v49, %v2475_v40 }
0x104d   :  { %2506 = vrot.lane.b32.xlu1 %v2502_v31, %s4216_s28 }
0x1062   :  { %v2499_v43 = vpop.permute.xlu0 %2498 }
0x1063   :  { %v2503_v48 = vmul.f32 %v2499_v43, %v2490_v46 }
0x1065   :  { %2508 = vrot.lane.b32.xlu2 %v2503_v48, %s4216_s28 }
0x10bf   :  { %v2509_v26 = vpop.permute.xlu2 %2508  ;;  %v2507_v52 = vpop.permute.xlu1 %2506 }
0x10c0   :  { %v2513_v57 = vadd.f32 %v2509_v26, %v4911_v27  ;;  %v2512_v60 = vadd.f32 %v2507_v52, %v4908_v8 }
0x10c2   :  { %4045 = vtanh.f32 %v2513_v57 }
0x10c3   :  { %4047 = vtanh.f32 %v2512_v60 }
0x10c8   :  { %v4046_v55 = vpop.eup %4045 }
0x10c9   :  { %v4048_v59 = vpop.eup %4047  ;;  %2522 = vrot.lane.b32.xlu1 %v4046_v55, %s4219_s0 }
0x10ca   :  { %2520 = vrot.lane.b32.xlu0 %v4048_v59, %s4219_s0 }
0x113b   :  { %v2523_v1 = vpop.permute.xlu1 %2522 }
0x113c   :  { %v2521_v62 = vpop.permute.xlu0 %2520  ;;  %v2527_v2 = vmul.f32 %v2523_v1, %v2517_v58 }
0x113d   :  { %v2526_v4 = vmul.f32 %v2521_v62, %v2516_v53 }
0x113e   :  { %v5003_v50 = vadd.f32 %v2533_v35, %v2527_v2 }
0x113f   :  { %v5005_v44 = vadd.f32 %v2532_v51, %v2526_v4 }
0x1140   :  { %v2539_v7 = vrot.slane %v5003_v50, 3  ;;  %v2647_v59 = vrot.slane %v5003_v50, 7 }
0x1141   :  { %v2538_v63 = vrot.slane %v5005_v44, 4  ;;  %v2646_v55 = vrot.slane %v5005_v44, 7 }
0x1143   :  { %v2540_v5 = vsel %vm673_vm9, %v2539_v7, %v2538_v63 }
0x1144   :  { %2541 = vrot.lane.b32.xlu2 %v2540_v5, %s4219_s0 }
0x119e   :  { %v2542_v47 = vpop.permute.xlu2 %2541 }
0x119f   :  { %3853 = vmatmul.msk.f32.vlgmr.msra.gmra.mxu3 %vm1957_vm11, %v2542_v47 }
0x1222   :  { %v2562_v3 = vpop.f32.mrf.mxu3 }
0x1223   :  { %v2610_v0 = vadd.f32 %v2562_v3, %v4902_v21  ;;  %v2566_v45 = vrot.slane %v2562_v3, 3  ;;  %v2567_v54 = vrot.slane %v2562_v3, 4 }
0x1225   :  { %v2613_v41 = vrot.slane %v2610_v0, 4  ;;  %v2612_v11 = vrot.slane %v2610_v0, 3  ;;  %v2570_v12 = vadd.f32 %v2566_v45, %v4908_v8  ;;  %v2571_v18 = vadd.f32 %v2567_v54, %v4911_v27 }
0x1227   :  { %2616 = vrot.lane.b32.xlu1 %v2613_v41, %s4216_s28  ;;  %2614 = vrot.lane.b32.xlu0 %v2612_v11, %s4216_s28  ;;  %v3854_v29 = vmul.f32 -1.442695, %v2570_v12  ;;  %v3855_v9 = vmul.f32 -1.442695, %v2571_v18 }
0x1229   :  { %4049 = vpow2.f32 %v3854_v29 }
0x122a   :  { %4051 = vpow2.f32 %v3855_v9 }
0x122f   :  { %v4050_v13 = vpop.eup %4049 }
0x1230   :  { %v4052_v20 = vpop.eup %4051  ;;  %v2578_v10 = vadd.f32 1.0, %v4050_v13 }
0x1231   :  { %v2579_v24 = vadd.f32 1.0, %v4052_v20 }
0x1232   :  { %4053 = vrcp.f32 %v2578_v10  ;;  %vm2585_vm12 = vweird.f32 %v2578_v10  ;;  %v2591_v28 = vand.u32 2147483648, %v2578_v10  ;;  %v2589_v31 = vand.u32 2147483647, %v2578_v10 }
0x1233   :  { %4055 = vrcp.f32 %v2579_v24  ;;  %v2606_v38 = vand.u32 2147483648, %v2579_v24  ;;  %vm2600_vm13 = vweird.f32 %v2579_v24  ;;  %v2604_v49 = vand.u32 2147483647, %v2579_v24 }
0x1234   :  { %v2592_v37 = vor.u32 1.1754944e-38, %v2591_v28  ;;  %vm2590_vm8 = vcmp.eq.f32.partialorder %v2589_v31, 8.507059e+37 }
0x1235   :  { %v2607_v36 = vor.u32 1.1754944e-38, %v2606_v38  ;;  %vm2605_vm10 = vcmp.eq.f32.partialorder %v2604_v49, 8.507059e+37 }
0x1238   :  { %v4054_v19 = vpop.eup %4053 }
0x1239   :  { %v4056_v17 = vpop.eup %4055  ;;  %v2581_v23 = vmul.f32 %v4054_v19, %v2578_v10  ;;  %vm2586_vm2 = vweird.f32 %v4054_v19 }
0x123a   :  { %v2596_v22 = vmul.f32 %v4056_v17, %v2579_v24  ;;  %vm2601_vm7 = vweird.f32 %v4056_v17  ;;  %vm2587_vm14 = vmor %vm2585_vm12, %vm2586_vm2 }
0x123b   :  { %v2582_v40 = vsub.f32 1.0, %v2581_v23  ;;  %vm2602_vm15 = vmor %vm2600_vm13, %vm2601_vm7 }
0x123c   :  { %v2597_v42 = vsub.f32 1.0, %v2596_v22 }
0x123d   :  { %v2583_v34 = vmul.f32 %v4054_v19, %v2582_v40 }
0x123e   :  { %v2598_v51 = vmul.f32 %v4056_v17, %v2597_v42 }
0x123f   :  { %v2584_v33 = vadd.f32 %v4054_v19, %v2583_v34 }
0x1240   :  { %v2599_v56 = vadd.f32 %v4056_v17, %v2598_v51 }
0x1241   :  { %v2588_v25 = vsel %vm2587_vm14, %v4054_v19, %v2584_v33 }
0x1242   :  { %v2603_v32 = vsel %vm2602_vm15, %v4056_v17, %v2599_v56  ;;  %v2593_v39 = vsel %vm2590_vm8, %v2592_v37, %v2588_v25 }
0x1243   :  { %v2608_v14 = vsel %vm2605_vm10, %v2607_v36, %v2603_v32  ;;  %v2634_v16 = vsub.f32 1.0, %v2593_v39  ;;  %v2650_v62 = vmul.f32 %v2646_v55, %v2593_v39 }
0x1244   :  { %v2635_v58 = vsub.f32 1.0, %v2608_v14  ;;  %v2651_v2 = vmul.f32 %v2647_v59, %v2608_v14 }
0x1299   :  { %v2617_v15 = vpop.permute.xlu1 %2616  ;;  %v2615_v6 = vpop.permute.xlu0 %2614 }
0x129a   :  { %v2621_v61 = vmul.f32 %v2617_v15, %v2608_v14  ;;  %v2620_v43 = vmul.f32 %v2615_v6, %v2593_v39 }
0x129c   :  { %2626 = vrot.lane.b32.xlu0 %v2621_v61, %s4216_s28  ;;  %2624 = vrot.lane.b32.xlu2 %v2620_v43, %s4216_s28 }
0x12f6   :  { %v2625_v46 = vpop.permute.xlu2 %2624 }
0x12f7   :  { %v2630_v48 = vadd.f32 %v2625_v46, %v4908_v8 }
0x12f9   :  { %4057 = vtanh.f32 %v2630_v48 }
0x12ff   :  { %v4058_v26 = vpop.eup %4057 }
0x1300   :  { %2638 = vrot.lane.b32.xlu1 %v4058_v26, %s4219_s0 }
0x130e   :  { %v2627_v52 = vpop.permute.xlu0 %2626 }
0x130f   :  { %v2631_v57 = vadd.f32 %v2627_v52, %v4911_v27 }
0x1311   :  { %4059 = vtanh.f32 %v2631_v57 }
0x1317   :  { %v4060_v60 = vpop.eup %4059 }
0x1318   :  { %2640 = vrot.lane.b32.xlu2 %v4060_v60, %s4219_s0 }
0x1372   :  { %v2639_v53 = vpop.permute.xlu1 %2638  ;;  %v2641_v1 = vpop.permute.xlu2 %2640 }
0x1373   :  { %v2644_v35 = vmul.f32 %v2639_v53, %v2634_v16  ;;  %v2645_v4 = vmul.f32 %v2641_v1, %v2635_v58 }
0x1375   :  { %v5025_v7 = vadd.f32 %v2650_v62, %v2644_v35  ;;  %v2653_v63 = vadd.f32 %v2651_v2, %v2645_v4 }
0x1377   :  { %v2656_v5 = vrot.slane %v5025_v7, 5  ;;  %v2657_v47 = vrot.slane %v2653_v63, 4  ;;  %v2765_v23 = vrot.slane %v2653_v63, 7  ;;  %v2764_v16 = vrot.slane %v5025_v7, 7 }
0x1379   :  { %v2658_v3 = vsel %vm673_vm9, %v2657_v47, %v2656_v5 }
0x137a   :  { %2659 = vrot.lane.b32.xlu0 %v2658_v3, %s4219_s0 }
0x13ec   :  { %v2660_v44 = vpop.permute.xlu0 %2659 }
0x13ed   :  { %3856 = vmatmul.msk.f32.vlgmr.msra.gmra.mxu0 %vm1957_vm11, %v2660_v44 }
0x146a   :  { %v2680_v50 = vpop.f32.mrf.mxu0 }
0x146b   :  { %v2685_v0 = vrot.slane %v2680_v50, 3  ;;  %v2728_v41 = vadd.f32 %v2680_v50, %v4902_v21  ;;  %v2684_v34 = vrot.slane %v2680_v50, 2 }
0x146d   :  { %v2689_v11 = vadd.f32 %v2685_v0, %v4911_v27  ;;  %v2731_v45 = vrot.slane %v2728_v41, 3  ;;  %v2730_v54 = vrot.slane %v2728_v41, 2  ;;  %v2688_v56 = vadd.f32 %v2684_v34, %v4908_v8 }
0x146f   :  { %v3858_v12 = vmul.f32 -1.442695, %v2689_v11  ;;  %2734 = vrot.lane.b32.xlu2 %v2731_v45, %s4216_s28  ;;  %2732 = vrot.lane.b32.xlu1 %v2730_v54, %s4216_s28  ;;  %v3857_v33 = vmul.f32 -1.442695, %v2688_v56 }
0x1471   :  { %4061 = vpow2.f32 %v3858_v12 }
0x1477   :  { %v4062_v18 = vpop.eup %4061 }
0x1478   :  { %v2697_v29 = vadd.f32 1.0, %v4062_v18 }
0x147a   :  { %4063 = vrcp.f32 %v2697_v29  ;;  %v2724_v10 = vand.u32 2147483648, %v2697_v29  ;;  %v2722_v19 = vand.u32 2147483647, %v2697_v29  ;;  %vm2718_vm7 = vweird.f32 %v2697_v29 }
0x147b   :  { %4065 = vpow2.f32 %v3857_v33 }
0x147c   :  { %v2725_v22 = vor.u32 1.1754944e-38, %v2724_v10  ;;  %vm2723_vm13 = vcmp.eq.f32.partialorder %v2722_v19, 8.507059e+37 }
0x1480   :  { %v4064_v9 = vpop.eup %4063 }
0x1481   :  { %v2714_v13 = vmul.f32 %v4064_v9, %v2697_v29  ;;  %vm2719_vm2 = vweird.f32 %v4064_v9  ;;  %v4066_v38 = vpop.eup %4065 }
0x1482   :  { %vm2720_vm12 = vmor %vm2718_vm7, %vm2719_vm2  ;;  %v2696_v28 = vadd.f32 1.0, %v4066_v38 }
0x1483   :  { %v2715_v20 = vsub.f32 1.0, %v2714_v13 }
0x1484   :  { %4067 = vrcp.f32 %v2696_v28  ;;  %v2709_v14 = vand.u32 2147483648, %v2696_v28  ;;  %vm2703_vm15 = vweird.f32 %v2696_v28  ;;  %v2707_v6 = vand.u32 2147483647, %v2696_v28 }
0x1485   :  { %v2716_v24 = vmul.f32 %v4064_v9, %v2715_v20 }
0x1486   :  { %v2710_v61 = vor.u32 1.1754944e-38, %v2709_v14  ;;  %vm2708_vm8 = vcmp.eq.f32.partialorder %v2707_v6, 8.507059e+37 }
0x1487   :  { %v2717_v17 = vadd.f32 %v4064_v9, %v2716_v24 }
0x1489   :  { %v2721_v42 = vsel %vm2720_vm12, %v4064_v9, %v2717_v17 }
0x148a   :  { %v2726_v40 = vsel %vm2723_vm13, %v2725_v22, %v2721_v42  ;;  %v4068_v32 = vpop.eup %4067 }
0x148b   :  { %v2769_v51 = vmul.f32 %v2765_v23, %v2726_v40  ;;  %v2699_v25 = vmul.f32 %v4068_v32, %v2696_v28  ;;  %vm2704_vm14 = vweird.f32 %v4068_v32  ;;  %v2753_v53 = vsub.f32 1.0, %v2726_v40 }
0x148c   :  { %vm2705_vm10 = vmor %vm2703_vm15, %vm2704_vm14 }
0x148d   :  { %v2700_v36 = vsub.f32 1.0, %v2699_v25 }
0x148f   :  { %v2701_v37 = vmul.f32 %v4068_v32, %v2700_v36 }
0x1491   :  { %v2702_v15 = vadd.f32 %v4068_v32, %v2701_v37 }
0x1493   :  { %v2706_v39 = vsel %vm2705_vm10, %v4068_v32, %v2702_v15 }
0x1494   :  { %v2711_v46 = vsel %vm2708_vm8, %v2710_v61, %v2706_v39 }
0x1495   :  { %v2752_v58 = vsub.f32 1.0, %v2711_v46  ;;  %v2768_v35 = vmul.f32 %v2764_v16, %v2711_v46  ;;  %v76_v16 = vld [vmem:[#allocation2 + $0xd8] sm:$0xff] }
0x1496   :  { %2912 = vmatpush.msrb.mxu2 %v76_v16  ;;  %v2954_v16 = vld [vmem:[#allocation5 + $0x38] sm:$0xff] }
0x14c9   :  { %v2735_v49 = vpop.permute.xlu2 %2734 }
0x14ca   :  { %v2739_v31 = vmul.f32 %v2735_v49, %v2726_v40 }
0x14cc   :  { %2744 = vrot.lane.b32.xlu1 %v2739_v31, %s4216_s28 }
0x14e1   :  { %v2733_v43 = vpop.permute.xlu1 %2732 }
0x14e2   :  { %v2738_v48 = vmul.f32 %v2733_v43, %v2711_v46 }
0x14e4   :  { %2742 = vrot.lane.b32.xlu0 %v2738_v48, %s4216_s28 }
0x153e   :  { %v2745_v26 = vpop.permute.xlu1 %2744 }
0x153f   :  { %v2749_v52 = vadd.f32 %v2745_v26, %v4911_v27 }
0x1541   :  { %4069 = vtanh.f32 %v2749_v52 }
0x1547   :  { %v4070_v57 = vpop.eup %4069 }
0x1548   :  { %2758 = vrot.lane.b32.xlu0 %v4070_v57, %s4219_s0 }
0x1556   :  { %v2743_v60 = vpop.permute.xlu0 %2742 }
0x1557   :  { %v2748_v55 = vadd.f32 %v2743_v60, %v4908_v8 }
0x1559   :  { %4071 = vtanh.f32 %v2748_v55 }
0x155f   :  { %v4072_v59 = vpop.eup %4071 }
0x1560   :  { %2756 = vrot.lane.b32.xlu2 %v4072_v59, %s4219_s0  ;;  %v2971_v59 = vld [vmem:[#allocation5 + $0xc0] sm:$0xff] }
0x1561   :  { %3012 = vmatpush.msrb.mxu0 %v2971_v59 }
0x15ba   :  { %v2757_v1 = vpop.permute.xlu2 %2756  ;;  %v2759_v62 = vpop.permute.xlu0 %2758 }
0x15bb   :  { %v2762_v2 = vmul.f32 %v2757_v1, %v2752_v58  ;;  %v2763_v4 = vmul.f32 %v2759_v62, %v2753_v53  ;;  %v2972_v58 = vld [vmem:[#allocation5 + $0xc8] sm:$0xff]  ;;  %v2963_v53 = vld [vmem:[#allocation5 + $0x80] sm:$0xff]  ;;  %v75_v1 = vld [vmem:[#allocation2 + $0xd0] sm:$0xff] }
0x15bc   :  { %v2964_v62 = vld [vmem:[#allocation5 + $0x88] sm:$0xff]  ;;  %3032 = vmatpush.msra.mxu1 %v2972_v58  ;;  %3013 = vmatpush.msrb.mxu0 %v2963_v53 }
0x15bd   :  { %v2770_v63 = vadd.f32 %v2768_v35, %v2762_v2  ;;  %v5043_v5 = vadd.f32 %v2769_v51, %v2763_v4  ;;  %v74_v35 = vld [vmem:[#allocation2 + $0xc8] sm:$0xff]  ;;  %2913 = vmatpush.msrb.mxu2 %v75_v1  ;;  %v2947_v2 = vld [vmem:[#allocation5] sm:$0xff] }
0x15be   :  { %3033 = vmatpush.msra.mxu1 %v2964_v62  ;;  %v73_v4 = vld [vmem:[#allocation2 + $0xc0] sm:$0xff] }
0x15bf   :  { %v2774_v47 = vrot.slane %v2770_v63, 6  ;;  %v2775_v3 = vrot.slane %v5043_v5, 5  ;;  %v2882_v22 = vrot.slane %v2770_v63, 7  ;;  %2914 = vmatpush.msrb.mxu2 %v74_v35  ;;  %v2948_v63 = vld [vmem:[#allocation5 + $0x8] sm:$0xff] }
0x15c0   :  { %v2980_v1 = vld [vmem:[#allocation5 + $0x100] ss:$8 sm:$0xf] }
0x15c1   :  { %v2776_v44 = vsel %vm673_vm9, %v2775_v3, %v2774_v47  ;;  %2915 = vmatpush.msrb.mxu2 %v73_v4  ;;  %v2883_v47 = vrot.slane %v5043_v5, 7  ;;  %v2976_v5 = vld [vmem:[#allocation5 + $0xe8] sm:$0xff] }
0x15c2   :  { %2777 = vrot.lane.b32.xlu1 %v2776_v44, %s4219_s0  ;;  %v2981_v62 = vld [vmem:[#allocation5 + $0x100] ss:$8 sm:$0xf0] }
0x1634   :  { %v2778_v50 = vpop.permute.xlu1 %2777 }
0x1635   :  { %3859 = vmatmul.msk.f32.vlgmr.msrb.gmra.mxu1 %vm1957_vm11, %v2778_v50 }
0x16b2   :  { %v2798_v7 = vpop.f32.mrf.mxu1 }
0x16b3   :  { %v2802_v0 = vrot.slane %v2798_v7, 1  ;;  %v2846_v41 = vadd.f32 %v2798_v7, %v4902_v21  ;;  %v2803_v51 = vrot.slane %v2798_v7, 2 }
0x16b5   :  { %v2806_v11 = vadd.f32 %v2802_v0, %v4908_v8  ;;  %v2849_v45 = vrot.slane %v2846_v41, 2  ;;  %v2848_v54 = vrot.slane %v2846_v41, 1  ;;  %v2807_v34 = vadd.f32 %v2803_v51, %v4911_v27  ;;  %v5072_v51 = vld [vmem:[#allocation2 + $0x128] sm:$0xff] }
0x16b7   :  { %v3860_v12 = vmul.f32 -1.442695, %v2806_v11  ;;  %2852 = vrot.lane.b32.xlu0 %v2849_v45, %s4216_s28  ;;  %2850 = vrot.lane.b32.xlu2 %v2848_v54, %s4216_s28  ;;  %v3861_v56 = vmul.f32 -1.442695, %v2807_v34 }
0x16b9   :  { %4073 = vpow2.f32 %v3860_v12 }
0x16bf   :  { %v4074_v18 = vpop.eup %4073 }
0x16c0   :  { %v2814_v29 = vadd.f32 1.0, %v4074_v18 }
0x16c2   :  { %4075 = vrcp.f32 %v2814_v29  ;;  %v2827_v10 = vand.u32 2147483648, %v2814_v29  ;;  %v2825_v21 = vand.u32 2147483647, %v2814_v29  ;;  %vm2821_vm7 = vweird.f32 %v2814_v29 }
0x16c3   :  { %4077 = vpow2.f32 %v3861_v56  ;;  %v2977_v56 = vld [vmem:[#allocation5 + $0xf0] sm:$0xff] }
0x16c4   :  { %v2828_v17 = vor.u32 1.1754944e-38, %v2827_v10  ;;  %vm2826_vm13 = vcmp.eq.f32.partialorder %v2825_v21, 8.507059e+37  ;;  %v2965_v10 = vld [vmem:[#allocation5 + $0x90] sm:$0xff]  ;;  %v2959_v21 = vld [vmem:[#allocation5 + $0x60] sm:$0xff] }
0x16c8   :  { %v4076_v9 = vpop.eup %4075 }
0x16c9   :  { %v2817_v13 = vmul.f32 %v4076_v9, %v2814_v29  ;;  %vm2822_vm2 = vweird.f32 %v4076_v9  ;;  %v4078_v33 = vpop.eup %4077 }
0x16ca   :  { %vm2823_vm12 = vmor %vm2821_vm7, %vm2822_vm2  ;;  %v2815_v38 = vadd.f32 1.0, %v4078_v33  ;;  %v5080_v33 = vld [vmem:[#allocation2 + $0x120] sm:$0xff] }
0x16cb   :  { %v2818_v20 = vsub.f32 1.0, %v2817_v13  ;;  %v2973_v13 = vld [vmem:[#allocation5 + $0xd0] sm:$0xff] }
0x16cc   :  { %4079 = vrcp.f32 %v2815_v38  ;;  %v2842_v15 = vand.u32 2147483648, %v2815_v38  ;;  %vm2836_vm15 = vweird.f32 %v2815_v38  ;;  %v2840_v14 = vand.u32 2147483647, %v2815_v38  ;;  %3052 = vmatpush.msra.mxu2 %v2973_v13 }
0x16cd   :  { %v2819_v24 = vmul.f32 %v4076_v9, %v2818_v20  ;;  %v2967_v20 = vld [vmem:[#allocation5 + $0xa0] sm:$0xff] }
0x16ce   :  { %v2843_v39 = vor.u32 1.1754944e-38, %v2842_v15  ;;  %vm2841_vm8 = vcmp.eq.f32.partialorder %v2840_v14, 8.507059e+37  ;;  %3053 = vmatpush.msra.mxu2 %v2965_v10  ;;  %v2974_v15 = vld [vmem:[#allocation5 + $0xd8] sm:$0xff] }
0x16cf   :  { %v2820_v19 = vadd.f32 %v4076_v9, %v2819_v24  ;;  %v2968_v24 = vld [vmem:[#allocation5 + $0xa8] sm:$0xff]  ;;  %v2966_v14 = vld [vmem:[#allocation5 + $0x98] sm:$0xff] }
0x16d1   :  { %v2824_v23 = vsel %vm2823_vm12, %v4076_v9, %v2820_v19  ;;  %v2975_v9 = vld [vmem:[#allocation5 + $0xe0] sm:$0xff]  ;;  %v2957_v19 = vld [vmem:[#allocation5 + $0x50] sm:$0xff] }
0x16d2   :  { %v5053_v42 = vsel %vm2826_vm13, %v2828_v17, %v2824_v23  ;;  %v4080_v31 = vpop.eup %4079  ;;  %v2960_v17 = vld [vmem:[#allocation5 + $0x68] sm:$0xff]  ;;  %v2949_v23 = vld [vmem:[#allocation5 + $0x10] sm:$0xff]  ;;  %3054 = vmatpush.msra.mxu2 %v2957_v19  ;;  %vm2945_vm13 = vcmask 25600  }
0x16d3   :  { %v5056_v40 = vmul.f32 %v2882_v22, %v5053_v42  ;;  %v2832_v32 = vmul.f32 %v4080_v31, %v2815_v38  ;;  %vm2837_vm14 = vweird.f32 %v4080_v31  ;;  %v2870_v44 = vsub.f32 1.0, %v5053_v42  ;;  %v2951_v22 = vld [vmem:[#allocation5 + $0x20] sm:$0xff]  ;;  %v2969_v38 = vld [vmem:[#allocation5 + $0xb0] sm:$0xff] }
0x16d4   :  { %vm2838_vm10 = vmor %vm2836_vm15, %vm2837_vm14  ;;  %3055 = vmatpush.msra.mxu2 %v2949_v23 }
0x16d5   :  { %v2833_v25 = vsub.f32 1.0, %v2832_v32  ;;  %v2953_v32 = vld [vmem:[#allocation5 + $0x30] sm:$0xff] }
0x16d7   :  { %v2834_v36 = vmul.f32 %v4080_v31, %v2833_v25  ;;  %v81_v25 = vld [vmem:[#allocation2 + $0x100] sm:$0xff] }
0x16d8   :  { %2937 = vmatpush.msrb.mxu3 %v81_v25 }
0x16d9   :  { %v2835_v37 = vadd.f32 %v4080_v31, %v2834_v36  ;;  %v80_v36 = vld [vmem:[#allocation2 + $0xf8] sm:$0xff] }
0x16da   :  { %2938 = vmatpush.msrb.mxu3 %v80_v36 }
0x16db   :  { %v2839_v6 = vsel %vm2838_vm10, %v4080_v31, %v2835_v37  ;;  %v5089_v31 = vld [vmem:[#allocation2 + $0x110] sm:$0xff] }
0x16dc   :  { %v2844_v43 = vsel %vm2841_vm8, %v2843_v39, %v2839_v6  ;;  %v79_v37 = vld [vmem:[#allocation2 + $0xf0] sm:$0xff]  ;;  %v2958_v6 = vld [vmem:[#allocation5 + $0x58] sm:$0xff] }
0x16dd   :  { %v2871_v3 = vsub.f32 1.0, %v2844_v43  ;;  %v2887_v0 = vmul.f32 %v2883_v47, %v2844_v43  ;;  %2939 = vmatpush.msrb.mxu3 %v79_v37  ;;  %v2950_v39 = vld [vmem:[#allocation5 + $0x18] sm:$0xff] }
0x1711   :  { %v2851_v28 = vpop.permute.xlu2 %2850 }
0x1712   :  { %v2856_v49 = vmul.f32 %v2851_v28, %v5053_v42  ;;  %v2952_v42 = vld [vmem:[#allocation5 + $0x28] sm:$0xff]  ;;  %v5085_v28 = vld [vmem:[#allocation2 + $0x118] sm:$0xff] }
0x1714   :  { %2860 = vrot.lane.b32.xlu1 %v2856_v49, %s4216_s28  ;;  %v2961_v49 = vld [vmem:[#allocation5 + $0x70] sm:$0xff] }
0x1729   :  { %v2853_v61 = vpop.permute.xlu0 %2852 }
0x172a   :  { %v2857_v46 = vmul.f32 %v2853_v61, %v2844_v43  ;;  %v3914_v43 = vld [vmem:[#allocation2 + $0xe0] ss:$0 sm:$0xff] }
0x172c   :  { %2862 = vrot.lane.b32.xlu2 %v2857_v46, %s4216_s28 }
0x1786   :  { %v2863_v48 = vpop.permute.xlu2 %2862  ;;  %v2861_v26 = vpop.permute.xlu1 %2860 }
0x1787   :  { %v2867_v52 = vadd.f32 %v2863_v48, %v4911_v27  ;;  %v2866_v57 = vadd.f32 %v2861_v26, %v4908_v8  ;;  %v2955_v27 = vld [vmem:[#allocation5 + $0x40] sm:$0xff]  ;;  %v2956_v8 = vld [vmem:[#allocation5 + $0x48] sm:$0xff] }
0x1788   :  { %3014 = vmatpush.msrb.mxu0 %v2955_v27  ;;  %3034 = vmatpush.msra.mxu1 %v2956_v8  ;;  %v5140_v27 = vor.u32 %v2981_v62, %v2980_v1 }
0x1789   :  { %4081 = vtanh.f32 %v2867_v52 }
0x178a   :  { %4083 = vtanh.f32 %v2866_v57  ;;  %3015 = vmatpush.msrb.mxu0 %v2947_v2  ;;  %3035 = vmatpush.msra.mxu1 %v2948_v63  ;;  %v2978_v57 = vld [vmem:[#allocation5 + $0xf8] sm:$0xff]  ;;  %v2984_v35 = vperm.slane %v5140_v27, 0 }
0x178c   :  { %3092 = vmatpush.msra.mxu0 %v2975_v9  ;;  %3112 = vmatpush.msrb.mxu1 %v2976_v5  ;;  %v3915_v9 = vld [vmem:[#allocation2 + $0x108] ss:$0 sm:$0xff] }
0x178e   :  { %3093 = vmatpush.msra.mxu0 %v2967_v20  ;;  %3113 = vmatpush.msrb.mxu1 %v2968_v24 }
0x178f   :  { %v4082_v60 = vpop.eup %4081 }
0x1790   :  { %v4084_v55 = vpop.eup %4083  ;;  %2876 = vrot.lane.b32.xlu1 %v4082_v60, %s4219_s0  ;;  %3094 = vmatpush.msra.mxu0 %v2959_v21  ;;  %v2970_v60 = vld [vmem:[#allocation5 + $0xb8] sm:$0xff] }
0x1791   :  { %2874 = vrot.lane.b32.xlu0 %v4084_v55, %s4219_s0  ;;  %3114 = vmatpush.msrb.mxu1 %v2960_v17  ;;  %v2962_v55 = vld [vmem:[#allocation5 + $0x78] sm:$0xff] }
0x1792   :  { %3095 = vmatpush.msra.mxu0 %v2951_v22 }
0x1793   :  { %3115 = vmatpush.msrb.mxu1 %v2952_v42 }
0x1802   :  { %v2877_v50 = vpop.permute.xlu1 %2876 }
0x1803   :  { %v2875_v7 = vpop.permute.xlu0 %2874  ;;  %v2881_v41 = vmul.f32 %v2877_v50, %v2871_v3 }
0x1804   :  { %v2880_v11 = vmul.f32 %v2875_v7, %v2870_v44 }
0x1805   :  { %v2889_v45 = vadd.f32 %v2887_v0, %v2881_v41 }
0x1806   :  { %v2888_v54 = vadd.f32 %v5056_v40, %v2880_v11  ;;  %v3913_v40 = vld [vmem:[#allocation2 + $0x130] ss:$0 sm:$0xff] }
0x1807   :  { %v2894_v12 = vrot.slane %v2889_v45, 6  ;;  %3202 = vrot.lane.b32.xlu0 %v3913_v40, %s4216_s28 }
0x1808   :  { %v2893_v18 = vrot.slane %v2888_v54, 7 }
0x180a   :  { %v2895_v29 = vsel %vm673_vm9, %v2894_v12, %v2893_v18 }
0x180b   :  { %2896 = vrot.lane.b32.xlu2 %v2895_v29, %s4219_s0 }
0x1865   :  { %v5074_v34 = vpop.permute.xlu2 %2896 }
0x1866   :  { %3862 = vmatmul.msk.f32.vlgmr.msrb.gmra.mxu2 %vm1957_vm11, %v5074_v34  ;;  %3864 = vmatmul.msk.f32.vlgmr.msrb.gmra.mxu0 %vm1957_vm11, %v5074_v34 }
0x1867   :  { %3865 = vmatmul.msk.f32.vlgmr.msra.gmra.mxu1 %vm1957_vm11, %v5074_v34  ;;  %3172 = vmatpush.msrb.mxu0 %v5072_v51 }
0x1868   :  { %3132 = vmatpush.msrb.mxu2 %v2977_v56  ;;  %3242 = vmatpush.msra.mxu1 %v5072_v51 }
0x1869   :  { %3173 = vmatpush.msrb.mxu0 %v5080_v33 }
0x186a   :  { %3133 = vmatpush.msrb.mxu2 %v2969_v38  ;;  %3243 = vmatpush.msra.mxu1 %v5080_v33 }
0x186b   :  { %3174 = vmatpush.msrb.mxu0 %v5085_v28 }
0x186c   :  { %3134 = vmatpush.msrb.mxu2 %v2961_v49  ;;  %3244 = vmatpush.msra.mxu1 %v5085_v28 }
0x186d   :  { %3175 = vmatpush.msrb.mxu0 %v5089_v31 }
0x186e   :  { %3866 = vmatmul.msk.f32.vlgmr.msra.gmra.mxu2 %vm1957_vm11, %v5074_v34  ;;  %3868 = vmatmul.msk.f32.vlgmr.msra.gmra.mxu0 %vm1957_vm11, %v5074_v34 }
0x186f   :  { %3869 = vmatmul.msk.f32.vlgmr.msrb.gmra.mxu1 %vm1957_vm11, %v5074_v34  ;;  %3135 = vmatpush.msrb.mxu2 %v2953_v32 }
0x1870   :  { %3245 = vmatpush.msra.mxu1 %v5089_v31  ;;  %3437 = vmatpush.msra.mxu0 %v5072_v51 }
0x1871   :  { %3307 = vmatpush.msra.mxu2 %v5072_v51 }
0x1872   :  { %3502 = vmatpush.msrb.mxu1 %v5072_v51  ;;  %3438 = vmatpush.msra.mxu0 %v5080_v33 }
0x1873   :  { %3308 = vmatpush.msra.mxu2 %v5080_v33 }
0x1874   :  { %3503 = vmatpush.msrb.mxu1 %v5080_v33  ;;  %3439 = vmatpush.msra.mxu0 %v5085_v28 }
0x1875   :  { %3309 = vmatpush.msra.mxu2 %v5085_v28 }
0x1876   :  { %3504 = vmatpush.msrb.mxu1 %v5085_v28  ;;  %3870 = vmatmul.msk.f32.vlgmr.msrb.gmra.mxu2 %vm1957_vm11, %v5074_v34 }
0x1877   :  { %3176 = vmatmul.f32.vlgmr.msrb.gmra.mxu0 %v4218_v30  ;;  %3310 = vmatpush.msra.mxu2 %v5089_v31  ;;  %v78_v30 = vld [vmem:[#allocation2 + $0xe8] sm:$0xff] }
0x1878   :  { %3440 = vmatpush.msra.mxu0 %v5089_v31  ;;  %3505 = vmatpush.msrb.mxu1 %v5089_v31 }
0x1879   :  { %3567 = vmatpush.msrb.mxu2 %v5072_v51  ;;  %2940 = vmatpush.msrb.mxu3 %v78_v30  ;;  %v5124_v59 = vpop.permute.xlu0 %3202 }
0x187b   :  { %3568 = vmatpush.msrb.mxu2 %v5080_v33  ;;  %3072 = vmatpush.msra.mxu3 %v2974_v15 }
0x187d   :  { %3569 = vmatpush.msrb.mxu2 %v5085_v28  ;;  %3073 = vmatpush.msra.mxu3 %v2966_v14 }
0x187f   :  { %3570 = vmatpush.msrb.mxu2 %v5089_v31  ;;  %3074 = vmatpush.msra.mxu3 %v2958_v6 }
0x1881   :  { %3075 = vmatpush.msra.mxu3 %v2950_v39 }
0x18e3   :  { %v3017_v61 = vpop.f32.mrf.mxu0 }
0x18e4   :  { %v3018_v8 = vadd.f32 %v3017_v61, %v2984_v35  ;;  %v3037_v40 = vpop.f32.mrf.mxu1 }
0x18e9   :  { %v2917_v46 = vpop.f32.mrf.mxu2 }
0x18ea   :  { %v2918_v48 = vadd.f32 %v3914_v43, %v2917_v46 }
0x18eb   :  { %v5121_v26 = vpop.f32.mrf.mxu0 }
0x18ec   :  { %v2920_v52 = vmax.f32 %v2918_v48, 0.0 }
0x18ee   :  { %3863 = vmatmul.msk.f32.vlgmr.msrb.gmra.mxu3 %vm1957_vm11, %v2920_v52 }
0x18ef   :  { %3152 = vmatpush.msrb.mxu3 %v2978_v57 }
0x18f1   :  { %3153 = vmatpush.msrb.mxu3 %v2970_v60  ;;  %v3057_v35 = vpop.f32.mrf.mxu2 }
0x18f3   :  { %3154 = vmatpush.msrb.mxu3 %v2962_v55 }
0x18f4   :  { %v3177_v58 = vpop.f32.mrf.mxu0 }
0x18f5   :  { %v3205_v53 = vadd.f32 %v5124_v59, %v3177_v58  ;;  %3155 = vmatpush.msrb.mxu3 %v2954_v16  ;;  %v3180_v2 = vadd.f32 %v3177_v58, %v3018_v8 }
0x18f6   :  { %3867 = vmatmul.msk.f32.vlgmr.msra.gmra.mxu3 %vm1957_vm11, %v5074_v34 }
0x18f7   :  { %3207 = vrot.lane.b32.xlu1 %v3205_v53, %s4216_s28  ;;  %3372 = vmatpush.msra.mxu3 %v5072_v51  ;;  %v3872_v4 = vmul.f32 -1.442695, %v3180_v2 }
0x18f9   :  { %3373 = vmatpush.msra.mxu3 %v5080_v33  ;;  %4085 = vpow2.f32 %v3872_v4 }
0x18fb   :  { %3374 = vmatpush.msra.mxu3 %v5085_v28 }
0x18fd   :  { %3375 = vmatpush.msra.mxu3 %v5089_v31 }
0x18fe   :  { %3871 = vmatmul.msk.f32.vlgmr.msrb.gmra.mxu3 %vm1957_vm11, %v5074_v34 }
0x18ff   :  { %3632 = vmatpush.msrb.mxu3 %v5072_v51  ;;  %v4086_v63 = vpop.eup %4085  ;;  %v5150_v51 = vpop.f32.mrf.mxu1 }
0x1900   :  { %v3184_v47 = vadd.f32 1.0, %v4086_v63  ;;  %v2986_v63 = vperm.slane %v5140_v27, 2 }
0x1901   :  { %3633 = vmatpush.msrb.mxu3 %v5080_v33  ;;  %v2985_v33 = vperm.slane %v5140_v27, 1 }
0x1902   :  { %4087 = vrcp.f32 %v3184_v47  ;;  %v3196_v41 = vand.u32 2147483648, %v3184_v47  ;;  %vm3190_vm2 = vweird.f32 %v3184_v47  ;;  %v3194_v11 = vand.u32 2147483647, %v3184_v47 }
0x1903   :  { %3634 = vmatpush.msrb.mxu3 %v5085_v28  ;;  %v3038_v38 = vadd.f32 %v3037_v40, %v2985_v33 }
0x1904   :  { %v3197_v54 = vor.u32 1.1754944e-38, %v3196_v41  ;;  %vm3195_vm12 = vcmp.eq.f32.partialorder %v3194_v11, 8.507059e+37 }
0x1905   :  { %3635 = vmatpush.msrb.mxu3 %v5089_v31 }
0x1908   :  { %v4088_v3 = vpop.eup %4087 }
0x1909   :  { %v3186_v44 = vmul.f32 %v4088_v3, %v3184_v47  ;;  %vm3191_vm9 = vweird.f32 %v4088_v3  ;;  %v3058_v47 = vadd.f32 %v3057_v35, %v2986_v63 }
0x190a   :  { %vm3192_vm7 = vmor %vm3190_vm2, %vm3191_vm9 }
0x190b   :  { %v3187_v50 = vsub.f32 1.0, %v3186_v44 }
0x190d   :  { %v3188_v7 = vmul.f32 %v4088_v3, %v3187_v50 }
0x190f   :  { %v3189_v0 = vadd.f32 %v4088_v3, %v3188_v7 }
0x1911   :  { %v3193_v45 = vsel %vm3192_vm7, %v4088_v3, %v3189_v0 }
0x1912   :  { %v3198_v18 = vsel %vm3195_vm12, %v3197_v54, %v3193_v45 }
0x1913   :  { %v3217_v21 = vsub.f32 1.0, %v3198_v18  ;;  %v3223_v17 = vmul.f32 0.0, %v3198_v18 }
0x1969   :  { %v3208_v12 = vpop.permute.xlu1 %3207 }
0x196a   :  { %v3210_v29 = vmul.f32 %v3208_v12, %v3198_v18 }
0x196c   :  { %3212 = vrot.lane.b32.xlu2 %v3210_v29, %s4216_s28 }
0x1971   :  { %v2942_v13 = vpop.f32.mrf.mxu3 }
0x1972   :  { %v2943_v5 = vadd.f32 %v3915_v9, %v2942_v13 }
0x1974   :  { %2946 = vst.msk [vmem:[#allocation7] sm:$0x3] %vm2945_vm13, %v2943_v5 }
0x1975   :  { %3779 = dma.vmem_to_hbm [thread:$0]  %s3775_s13, 32, %s3777_s11, [#allocation4]  }
0x19c6   :  { %v3213_v20 = vpop.permute.xlu2 %3212 }
0x19c7   :  { %v3215_v10 = vadd.f32 %v3213_v20, %v3018_v8  ;;  %v5163_v8 = vpop.f32.mrf.mxu2 }
0x19c9   :  { %4089 = vtanh.f32 %v3215_v10 }
0x19cf   :  { %v4090_v24 = vpop.eup %4089 }
0x19d0   :  { %3219 = vrot.lane.b32.xlu0 %v4090_v24, %s4219_s0 }
0x1a42   :  { %v3220_v19 = vpop.permute.xlu0 %3219 }
0x1a43   :  { %v3222_v22 = vmul.f32 %v3220_v19, %v3217_v21 }
0x1a45   :  { %v5145_v23 = vadd.f32 %v3223_v17, %v3222_v22 }
0x1a47   :  { %3226 = vrot.lane.b32.xlu1 %v5145_v23, %s4219_s0 }
0x1ab9   :  { %v3227_v42 = vpop.permute.xlu1 %3226 }
0x1aba   :  { %3873 = vmatmul.msk.f32.vlgmr.msra.gmra.mxu1 %vm1957_vm11, %v3227_v42 }
0x1b37   :  { %v3247_v34 = vpop.f32.mrf.mxu1 }
0x1b38   :  { %v3270_v56 = vadd.f32 %v3247_v34, %v5124_v59  ;;  %v3250_v28 = vadd.f32 %v3247_v34, %v3038_v38 }
0x1b3a   :  { %3272 = vrot.lane.b32.xlu2 %v3270_v56, %s4216_s28  ;;  %v3874_v49 = vmul.f32 -1.442695, %v3250_v28  ;;  %v3077_v56 = vpop.f32.mrf.mxu3 }
0x1b3c   :  { %4091 = vpow2.f32 %v3874_v49  ;;  %v2987_v49 = vperm.slane %v5140_v27, 3 }
0x1b42   :  { %v4092_v31 = vpop.eup %4091  ;;  %v5176_v33 = vpop.f32.mrf.mxu3 }
0x1b43   :  { %v3254_v32 = vadd.f32 1.0, %v4092_v31  ;;  %v3078_v31 = vadd.f32 %v3077_v56, %v2987_v49 }
0x1b45   :  { %4093 = vrcp.f32 %v3254_v32  ;;  %v3266_v14 = vand.u32 2147483648, %v3254_v32  ;;  %vm3260_vm15 = vweird.f32 %v3254_v32  ;;  %v3264_v6 = vand.u32 2147483647, %v3254_v32 }
0x1b47   :  { %v3267_v61 = vor.u32 1.1754944e-38, %v3266_v14  ;;  %vm3265_vm8 = vcmp.eq.f32.partialorder %v3264_v6, 8.507059e+37 }
0x1b4b   :  { %v4094_v25 = vpop.eup %4093 }
0x1b4c   :  { %v3256_v36 = vmul.f32 %v4094_v25, %v3254_v32  ;;  %vm3261_vm14 = vweird.f32 %v4094_v25 }
0x1b4d   :  { %vm3262_vm10 = vmor %vm3260_vm15, %vm3261_vm14 }
0x1b4e   :  { %v3257_v37 = vsub.f32 1.0, %v3256_v36 }
0x1b50   :  { %v3258_v30 = vmul.f32 %v4094_v25, %v3257_v37 }
0x1b52   :  { %v3259_v15 = vadd.f32 %v4094_v25, %v3258_v30 }
0x1b54   :  { %v3263_v39 = vsel %vm3262_vm10, %v4094_v25, %v3259_v15 }
0x1b55   :  { %v3268_v46 = vsel %vm3265_vm8, %v3267_v61, %v3263_v39 }
0x1b56   :  { %v3282_v55 = vsub.f32 1.0, %v3268_v46  ;;  %v3288_v58 = vmul.f32 %v3268_v46, %v5145_v23 }
0x1b94   :  { %v3273_v43 = vpop.permute.xlu2 %3272 }
0x1b95   :  { %v3275_v48 = vmul.f32 %v3273_v43, %v3268_v46 }
0x1b97   :  { %3277 = vrot.lane.b32.xlu0 %v3275_v48, %s4216_s28 }
0x1c09   :  { %v3278_v52 = vpop.permute.xlu0 %3277 }
0x1c0a   :  { %v3280_v57 = vadd.f32 %v3278_v52, %v3038_v38 }
0x1c0c   :  { %4095 = vtanh.f32 %v3280_v57 }
0x1c12   :  { %v4096_v60 = vpop.eup %4095 }
0x1c13   :  { %3284 = vrot.lane.b32.xlu1 %v4096_v60, %s4219_s0 }
0x1c85   :  { %v3285_v16 = vpop.permute.xlu1 %3284 }
0x1c86   :  { %v3287_v53 = vmul.f32 %v3285_v16, %v3282_v55 }
0x1c88   :  { %v5158_v1 = vadd.f32 %v3288_v58, %v3287_v53 }
0x1c8a   :  { %3291 = vrot.lane.b32.xlu2 %v5158_v1, %s4219_s0 }
0x1ce4   :  { %v3292_v62 = vpop.permute.xlu2 %3291 }
0x1ce5   :  { %3875 = vmatmul.msk.f32.vlgmr.msra.gmra.mxu2 %vm1957_vm11, %v3292_v62 }
0x1d68   :  { %v3312_v2 = vpop.f32.mrf.mxu2 }
0x1d69   :  { %v3335_v4 = vadd.f32 %v3312_v2, %v5124_v59  ;;  %v3315_v3 = vadd.f32 %v3312_v2, %v3058_v47 }
0x1d6b   :  { %3337 = vrot.lane.b32.xlu0 %v3335_v4, %s4216_s28  ;;  %v3876_v44 = vmul.f32 -1.442695, %v3315_v3 }
0x1d6d   :  { %4097 = vpow2.f32 %v3876_v44  ;;  %v2988_v44 = vperm.slane %v5140_v27, 4 }
0x1d73   :  { %v4098_v50 = vpop.eup %4097 }
0x1d74   :  { %v3319_v7 = vadd.f32 1.0, %v4098_v50  ;;  %v3098_v50 = vadd.f32 %v5121_v26, %v2988_v44 }
0x1d76   :  { %4099 = vrcp.f32 %v3319_v7  ;;  %v3331_v12 = vand.u32 2147483648, %v3319_v7  ;;  %vm3325_vm2 = vweird.f32 %v3319_v7  ;;  %v3329_v18 = vand.u32 2147483647, %v3319_v7 }
0x1d78   :  { %v3332_v9 = vor.u32 1.1754944e-38, %v3331_v12  ;;  %vm3330_vm12 = vcmp.eq.f32.partialorder %v3329_v18, 8.507059e+37 }
0x1d7c   :  { %v4100_v0 = vpop.eup %4099 }
0x1d7d   :  { %v3321_v41 = vmul.f32 %v4100_v0, %v3319_v7  ;;  %vm3326_vm9 = vweird.f32 %v4100_v0 }
0x1d7e   :  { %vm3327_vm7 = vmor %vm3325_vm2, %vm3326_vm9 }
0x1d7f   :  { %v3322_v11 = vsub.f32 1.0, %v3321_v41 }
0x1d81   :  { %v3323_v45 = vmul.f32 %v4100_v0, %v3322_v11 }
0x1d83   :  { %v3324_v54 = vadd.f32 %v4100_v0, %v3323_v45 }
0x1d85   :  { %v3328_v29 = vsel %vm3327_vm7, %v4100_v0, %v3324_v54 }
0x1d86   :  { %v3333_v5 = vsel %vm3330_vm12, %v3332_v9, %v3328_v29 }
0x1d87   :  { %v3347_v19 = vsub.f32 1.0, %v3333_v5  ;;  %v3353_v22 = vmul.f32 %v3333_v5, %v5158_v1 }
0x1ddd   :  { %v3338_v13 = vpop.permute.xlu0 %3337 }
0x1dde   :  { %v3340_v20 = vmul.f32 %v3338_v13, %v3333_v5 }
0x1de0   :  { %3342 = vrot.lane.b32.xlu1 %v3340_v20, %s4216_s28 }
0x1e52   :  { %v3343_v10 = vpop.permute.xlu1 %3342 }
0x1e53   :  { %v3345_v24 = vadd.f32 %v3343_v10, %v3058_v47 }
0x1e55   :  { %4101 = vtanh.f32 %v3345_v24 }
0x1e5b   :  { %v4102_v21 = vpop.eup %4101 }
0x1e5c   :  { %3349 = vrot.lane.b32.xlu2 %v4102_v21, %s4219_s0 }
0x1eb6   :  { %v3350_v17 = vpop.permute.xlu2 %3349 }
0x1eb7   :  { %v3352_v42 = vmul.f32 %v3350_v17, %v3347_v19 }
0x1eb9   :  { %v5171_v40 = vadd.f32 %v3353_v22, %v3352_v42 }
0x1ebb   :  { %3356 = vrot.lane.b32.xlu0 %v5171_v40, %s4219_s0 }
0x1f2d   :  { %v3357_v34 = vpop.permute.xlu0 %3356 }
0x1f2e   :  { %3877 = vmatmul.msk.f32.vlgmr.msra.gmra.mxu3 %vm1957_vm11, %v3357_v34 }
0x1fb1   :  { %v3377_v38 = vpop.f32.mrf.mxu3 }
0x1fb2   :  { %v3400_v28 = vadd.f32 %v3377_v38, %v5124_v59  ;;  %v3380_v32 = vadd.f32 %v3377_v38, %v3078_v31 }
0x1fb4   :  { %3402 = vrot.lane.b32.xlu1 %v3400_v28, %s4216_s28  ;;  %v3878_v25 = vmul.f32 -1.442695, %v3380_v32  ;;  %v2989_v32 = vperm.slane %v5140_v27, 5 }
0x1fb6   :  { %4103 = vpow2.f32 %v3878_v25  ;;  %v3118_v25 = vadd.f32 %v5150_v51, %v2989_v32 }
0x1fbc   :  { %v4104_v36 = vpop.eup %4103 }
0x1fbd   :  { %v3384_v37 = vadd.f32 1.0, %v4104_v36 }
0x1fbf   :  { %4105 = vrcp.f32 %v3384_v37  ;;  %v3396_v61 = vand.u32 2147483648, %v3384_v37  ;;  %vm3390_vm14 = vweird.f32 %v3384_v37  ;;  %v3394_v43 = vand.u32 2147483647, %v3384_v37 }
0x1fc1   :  { %v3397_v48 = vor.u32 1.1754944e-38, %v3396_v61  ;;  %vm3395_vm10 = vcmp.eq.f32.partialorder %v3394_v43, 8.507059e+37 }
0x1fc5   :  { %v4106_v30 = vpop.eup %4105 }
0x1fc6   :  { %v3386_v15 = vmul.f32 %v4106_v30, %v3384_v37  ;;  %vm3391_vm13 = vweird.f32 %v4106_v30 }
0x1fc7   :  { %vm3392_vm15 = vmor %vm3390_vm14, %vm3391_vm13 }
0x1fc8   :  { %v3387_v14 = vsub.f32 1.0, %v3386_v15 }
0x1fca   :  { %v3388_v6 = vmul.f32 %v4106_v30, %v3387_v14 }
0x1fcc   :  { %v3389_v39 = vadd.f32 %v4106_v30, %v3388_v6 }
0x1fce   :  { %v3393_v46 = vsel %vm3392_vm15, %v4106_v30, %v3389_v39 }
0x1fcf   :  { %v3398_v57 = vsel %vm3395_vm10, %v3397_v48, %v3393_v46 }
0x1fd0   :  { %v3412_v53 = vsub.f32 1.0, %v3398_v57  ;;  %v3418_v35 = vmul.f32 %v3398_v57, %v5171_v40 }
0x2026   :  { %v3403_v52 = vpop.permute.xlu1 %3402 }
0x2027   :  { %v3405_v60 = vmul.f32 %v3403_v52, %v3398_v57 }
0x2029   :  { %3407 = vrot.lane.b32.xlu2 %v3405_v60, %s4216_s28 }
0x2083   :  { %v3408_v55 = vpop.permute.xlu2 %3407 }
0x2084   :  { %v3410_v16 = vadd.f32 %v3408_v55, %v3078_v31 }
0x2086   :  { %4107 = vtanh.f32 %v3410_v16 }
0x208c   :  { %v4108_v58 = vpop.eup %4107 }
0x208d   :  { %3414 = vrot.lane.b32.xlu0 %v4108_v58, %s4219_s0 }
0x20ff   :  { %v3415_v62 = vpop.permute.xlu0 %3414 }
0x2100   :  { %v3417_v2 = vmul.f32 %v3415_v62, %v3412_v53 }
0x2102   :  { %v5184_v4 = vadd.f32 %v3418_v35, %v3417_v2 }
0x2104   :  { %3421 = vrot.lane.b32.xlu1 %v5184_v4, %s4219_s0 }
0x2176   :  { %v3422_v63 = vpop.permute.xlu1 %3421 }
0x2177   :  { %3879 = vmatmul.msk.f32.vlgmr.msra.gmra.mxu0 %vm1957_vm11, %v3422_v63 }
0x21f4   :  { %v3442_v47 = vpop.f32.mrf.mxu0 }
0x21f5   :  { %v3465_v3 = vadd.f32 %v3442_v47, %v5124_v59  ;;  %v3445_v7 = vadd.f32 %v3442_v47, %v3098_v50 }
0x21f7   :  { %3467 = vrot.lane.b32.xlu2 %v3465_v3, %s4216_s28  ;;  %v3880_v0 = vmul.f32 -1.442695, %v3445_v7  ;;  %v2990_v7 = vperm.slane %v5140_v27, 6 }
0x21f9   :  { %4109 = vpow2.f32 %v3880_v0  ;;  %v3138_v0 = vadd.f32 %v5163_v8, %v2990_v7  ;;  %v3680_v7 = vrot.slane %v5145_v23, 1 }
0x21ff   :  { %v4110_v41 = vpop.eup %4109 }
0x2200   :  { %v3449_v11 = vadd.f32 1.0, %v4110_v41 }
0x2202   :  { %4111 = vrcp.f32 %v3449_v11  ;;  %v3461_v9 = vand.u32 2147483648, %v3449_v11  ;;  %vm3455_vm9 = vweird.f32 %v3449_v11  ;;  %v3459_v13 = vand.u32 2147483647, %v3449_v11 }
0x2204   :  { %v3462_v20 = vor.u32 1.1754944e-38, %v3461_v9  ;;  %vm3460_vm7 = vcmp.eq.f32.partialorder %v3459_v13, 8.507059e+37 }
0x2208   :  { %v4112_v45 = vpop.eup %4111 }
0x2209   :  { %v3451_v54 = vmul.f32 %v4112_v45, %v3449_v11  ;;  %vm3456_vm8 = vweird.f32 %v4112_v45 }
0x220a   :  { %vm3457_vm2 = vmor %vm3455_vm9, %vm3456_vm8 }
0x220b   :  { %v3452_v12 = vsub.f32 1.0, %v3451_v54 }
0x220d   :  { %v3453_v18 = vmul.f32 %v4112_v45, %v3452_v12 }
0x220f   :  { %v3454_v29 = vadd.f32 %v4112_v45, %v3453_v18 }
0x2211   :  { %v3458_v5 = vsel %vm3457_vm2, %v4112_v45, %v3454_v29 }
0x2212   :  { %v3463_v10 = vsel %vm3460_vm7, %v3462_v20, %v3458_v5 }
0x2213   :  { %v3477_v22 = vsub.f32 1.0, %v3463_v10  ;;  %v3483_v34 = vmul.f32 %v3463_v10, %v5184_v4 }
0x2251   :  { %v3468_v26 = vpop.permute.xlu2 %3467 }
0x2252   :  { %v3470_v24 = vmul.f32 %v3468_v26, %v3463_v10 }
0x2254   :  { %3472 = vrot.lane.b32.xlu0 %v3470_v24, %s4216_s28 }
0x22c6   :  { %v3473_v21 = vpop.permute.xlu0 %3472 }
0x22c7   :  { %v3475_v19 = vadd.f32 %v3473_v21, %v3098_v50 }
0x22c9   :  { %4113 = vtanh.f32 %v3475_v19 }
0x22cf   :  { %v4114_v17 = vpop.eup %4113 }
0x22d0   :  { %3479 = vrot.lane.b32.xlu1 %v4114_v17, %s4219_s0 }
0x2342   :  { %v3480_v42 = vpop.permute.xlu1 %3479 }
0x2343   :  { %v3482_v56 = vmul.f32 %v3480_v42, %v3477_v22 }
0x2345   :  { %v5196_v38 = vadd.f32 %v3483_v34, %v3482_v56 }
0x2347   :  { %3486 = vrot.lane.b32.xlu2 %v5196_v38, %s4219_s0 }
0x23a1   :  { %v3487_v28 = vpop.permute.xlu2 %3486 }
0x23a2   :  { %3881 = vmatmul.msk.f32.vlgmr.msrb.gmra.mxu1 %vm1957_vm11, %v3487_v28 }
0x241f   :  { %v3507_v49 = vpop.f32.mrf.mxu1 }
0x2420   :  { %v3530_v31 = vadd.f32 %v3507_v49, %v5124_v59  ;;  %v3510_v36 = vadd.f32 %v3507_v49, %v3118_v25 }
0x2422   :  { %3532 = vrot.lane.b32.xlu0 %v3530_v31, %s4216_s28  ;;  %v3882_v37 = vmul.f32 -1.442695, %v3510_v36  ;;  %v2991_v36 = vperm.slane %v5140_v27, 7 }
0x2424   :  { %4115 = vpow2.f32 %v3882_v37  ;;  %v3158_v37 = vadd.f32 %v5176_v33, %v2991_v36 }
0x242a   :  { %v4116_v30 = vpop.eup %4115 }
0x242b   :  { %v3514_v15 = vadd.f32 1.0, %v4116_v30 }
0x242d   :  { %4117 = vrcp.f32 %v3514_v15  ;;  %v3526_v46 = vand.u32 2147483648, %v3514_v15  ;;  %vm3520_vm13 = vweird.f32 %v3514_v15  ;;  %v3524_v48 = vand.u32 2147483647, %v3514_v15 }
0x242f   :  { %v3527_v57 = vor.u32 1.1754944e-38, %v3526_v46  ;;  %vm3525_vm15 = vcmp.eq.f32.partialorder %v3524_v48, 8.507059e+37 }
0x2433   :  { %v4118_v14 = vpop.eup %4117 }
0x2434   :  { %v3516_v6 = vmul.f32 %v4118_v14, %v3514_v15  ;;  %vm3521_vm12 = vweird.f32 %v4118_v14 }
0x2435   :  { %vm3522_vm14 = vmor %vm3520_vm13, %vm3521_vm12 }
0x2436   :  { %v3517_v39 = vsub.f32 1.0, %v3516_v6 }
0x2438   :  { %v3518_v61 = vmul.f32 %v4118_v14, %v3517_v39 }
0x243a   :  { %v3519_v43 = vadd.f32 %v4118_v14, %v3518_v61 }
0x243c   :  { %v3523_v52 = vsel %vm3522_vm14, %v4118_v14, %v3519_v43 }
0x243d   :  { %v3528_v60 = vsel %vm3525_vm15, %v3527_v57, %v3523_v52  ;;  %vm3718_vm15 = vcmask 1040384  }
0x243e   :  { %v3542_v62 = vsub.f32 1.0, %v3528_v60  ;;  %v3548_v2 = vmul.f32 %v3528_v60, %v5196_v38 }
0x2494   :  { %v3533_v51 = vpop.permute.xlu0 %3532 }
0x2495   :  { %v3535_v55 = vmul.f32 %v3533_v51, %v3528_v60 }
0x2497   :  { %3537 = vrot.lane.b32.xlu1 %v3535_v55, %s4216_s28 }
0x2509   :  { %v3538_v16 = vpop.permute.xlu1 %3537 }
0x250a   :  { %v3540_v58 = vadd.f32 %v3538_v16, %v3118_v25 }
0x250c   :  { %4119 = vtanh.f32 %v3540_v58 }
0x2512   :  { %v4120_v53 = vpop.eup %4119 }
0x2513   :  { %3544 = vrot.lane.b32.xlu2 %v4120_v53, %s4219_s0  ;;  %v91_v53 = vld [vmem:[#allocation2 + $0x150] sm:$0xff] }
0x2514   :  { %3756 = vmatpush.msrb.mxu0 %v91_v53 }
0x256d   :  { %v3545_v35 = vpop.permute.xlu2 %3544 }
0x256e   :  { %v3547_v63 = vmul.f32 %v3545_v35, %v3542_v62  ;;  %v90_v62 = vld [vmem:[#allocation2 + $0x148] sm:$0xff]  ;;  %v89_v35 = vld [vmem:[#allocation2 + $0x140] sm:$0xff] }
0x256f   :  { %3757 = vmatpush.msrb.mxu0 %v90_v62 }
0x2570   :  { %v5208_v47 = vadd.f32 %v3548_v2, %v3547_v63  ;;  %v88_v2 = vld [vmem:[#allocation2 + $0x138] sm:$0xff]  ;;  %v3682_v63 = vrot.slane %v5158_v1, 1 }
0x2571   :  { %3758 = vmatpush.msrb.mxu0 %v89_v35 }
0x2572   :  { %3551 = vrot.lane.b32.xlu0 %v5208_v47, %s4219_s0 }
0x2573   :  { %3759 = vmatpush.msrb.mxu0 %v88_v2 }
0x25e4   :  { %v3552_v3 = vpop.permute.xlu0 %3551 }
0x25e5   :  { %3883 = vmatmul.msk.f32.vlgmr.msrb.gmra.mxu2 %vm1957_vm11, %v3552_v3  ;;  %v3690_v3 = vperm.slane %v5158_v1, 0 }
0x25e7   :  { %v3719_v1 = vsel %vm3718_vm15, %v5145_v23, %v3690_v3 }
0x2668   :  { %v3572_v44 = vpop.f32.mrf.mxu2 }
0x2669   :  { %v3595_v50 = vadd.f32 %v3572_v44, %v5124_v59  ;;  %v3575_v41 = vadd.f32 %v3572_v44, %v3138_v0  ;;  %v3683_v44 = vrot.slane %v5171_v40, 1 }
0x266b   :  { %3597 = vrot.lane.b32.xlu1 %v3595_v50, %s4216_s28  ;;  %v3884_v11 = vmul.f32 -1.442695, %v3575_v41  ;;  %v3684_v50 = vrot.slane %v5184_v4, 1  ;;  %v3685_v41 = vrot.slane %v5196_v38, 1 }
0x266d   :  { %4121 = vpow2.f32 %v3884_v11  ;;  %v3691_v11 = vperm.slane %v3682_v63, 0 }
0x2673   :  { %v4122_v45 = vpop.eup %4121 }
0x2674   :  { %v3579_v54 = vadd.f32 1.0, %v4122_v45  ;;  %v3698_v45 = vperm.slane %v5184_v4, 0 }
0x2676   :  { %4123 = vrcp.f32 %v3579_v54  ;;  %v3591_v5 = vand.u32 2147483648, %v3579_v54  ;;  %vm3585_vm8 = vweird.f32 %v3579_v54  ;;  %v3589_v20 = vand.u32 2147483647, %v3579_v54 }
0x2678   :  { %v3592_v10 = vor.u32 1.1754944e-38, %v3591_v5  ;;  %vm3590_vm2 = vcmp.eq.f32.partialorder %v3589_v20, 8.507059e+37  ;;  %v3699_v5 = vperm.slane %v3684_v50, 0 }
0x267c   :  { %v4124_v12 = vpop.eup %4123 }
0x267d   :  { %v3581_v18 = vmul.f32 %v4124_v12, %v3579_v54  ;;  %vm3586_vm10 = vweird.f32 %v4124_v12  ;;  %v3686_v54 = vrot.slane %v5208_v47, 1 }
0x267e   :  { %vm3587_vm9 = vmor %vm3585_vm8, %vm3586_vm10 }
0x267f   :  { %v3582_v29 = vsub.f32 1.0, %v3581_v18  ;;  %v3695_v18 = vperm.slane %v3683_v44, 0  ;;  %v3707_v23 = vperm.slane %v3686_v54, 0 }
0x2681   :  { %v3583_v9 = vmul.f32 %v4124_v12, %v3582_v29  ;;  %v3702_v29 = vperm.slane %v5196_v38, 0 }
0x2683   :  { %v3584_v13 = vadd.f32 %v4124_v12, %v3583_v9 }
0x2685   :  { %v3588_v26 = vsel %vm3587_vm9, %v4124_v12, %v3584_v13 }
0x2686   :  { %v3593_v24 = vsel %vm3590_vm2, %v3592_v10, %v3588_v26  ;;  %v3703_v10 = vperm.slane %v3685_v41, 0 }
0x2687   :  { %v3607_v42 = vsub.f32 1.0, %v3593_v24  ;;  %v3613_v56 = vmul.f32 %v3593_v24, %v5208_v47 }
0x26dd   :  { %v3598_v8 = vpop.permute.xlu1 %3597 }
0x26de   :  { %v3600_v21 = vmul.f32 %v3598_v8, %v3593_v24  ;;  %v3720_v24 = vsel %vm3718_vm15, %v3680_v7, %v3691_v11 }
0x26e0   :  { %3602 = vrot.lane.b32.xlu2 %v3600_v21, %s4216_s28 }
0x273a   :  { %v3603_v19 = vpop.permute.xlu2 %3602 }
0x273b   :  { %v3605_v17 = vadd.f32 %v3603_v19, %v3138_v0  ;;  %v3694_v0 = vperm.slane %v5171_v40, 0  ;;  %v3706_v40 = vperm.slane %v5208_v47, 0 }
0x273d   :  { %4125 = vtanh.f32 %v3605_v17  ;;  %v3721_v8 = vsel %vm325_vm5, %v3719_v1, %v3694_v0 }
0x273e   :  { %v3723_v38 = vsel %vm286_vm6, %v3721_v8, %v3698_v45 }
0x273f   :  { %v3725_v19 = vsel %vm115_vm0, %v3723_v38, %v3702_v29 }
0x2743   :  { %v4126_v22 = vpop.eup %4125 }
0x2744   :  { %3609 = vrot.lane.b32.xlu0 %v4126_v22, %s4219_s0  ;;  %v3722_v22 = vsel %vm325_vm5, %v3720_v24, %v3695_v18 }
0x27b6   :  { %v3610_v34 = vpop.permute.xlu0 %3609 }
0x27b7   :  { %v3612_v28 = vmul.f32 %v3610_v34, %v3607_v42  ;;  %v3727_v34 = vsel %vm209_vm4, %v3725_v19, %v3706_v40 }
0x27b9   :  { %v5220_v49 = vadd.f32 %v3613_v56, %v3612_v28  ;;  %v3724_v56 = vsel %vm286_vm6, %v3722_v22, %v3699_v5 }
0x27bb   :  { %3616 = vrot.lane.b32.xlu1 %v5220_v49, %s4219_s0  ;;  %v3687_v9 = vrot.slane %v5220_v49, 1  ;;  %v3710_v4 = vperm.slane %v5220_v49, 0 }
0x27bd   :  { %v3711_v17 = vperm.slane %v3687_v9, 0  ;;  %v3729_v28 = vsel %vm170_vm3, %v3727_v34, %v3710_v4 }
0x282d   :  { %v3617_v31 = vpop.permute.xlu1 %3616 }
0x282e   :  { %3885 = vmatmul.msk.f32.vlgmr.msrb.gmra.mxu3 %vm1957_vm11, %v3617_v31 }
0x28b1   :  { %v3637_v32 = vpop.f32.mrf.mxu3 }
0x28b2   :  { %v3660_v25 = vadd.f32 %v3637_v32, %v5124_v59  ;;  %v3640_v30 = vadd.f32 %v3637_v32, %v3158_v37 }
0x28b4   :  { %3662 = vrot.lane.b32.xlu2 %v3660_v25, %s4216_s28  ;;  %v3886_v15 = vmul.f32 -1.442695, %v3640_v30 }
0x28b6   :  { %4127 = vpow2.f32 %v3886_v15 }
0x28bc   :  { %v4128_v14 = vpop.eup %4127 }
0x28bd   :  { %v3644_v6 = vadd.f32 1.0, %v4128_v14  ;;  %v3916_v14 = vld [vmem:[#allocation2 + $0x158] ss:$0 sm:$0xff] }
0x28bf   :  { %4129 = vrcp.f32 %v3644_v6  ;;  %v3656_v52 = vand.u32 2147483648, %v3644_v6  ;;  %vm3650_vm12 = vweird.f32 %v3644_v6  ;;  %v3654_v59 = vand.u32 2147483647, %v3644_v6 }
0x28c1   :  { %v3657_v27 = vor.u32 1.1754944e-38, %v3656_v52  ;;  %vm3655_vm14 = vcmp.eq.f32.partialorder %v3654_v59, 8.507059e+37 }
0x28c5   :  { %v4130_v39 = vpop.eup %4129 }
0x28c6   :  { %v3646_v61 = vmul.f32 %v4130_v39, %v3644_v6  ;;  %vm3651_vm7 = vweird.f32 %v4130_v39 }
0x28c7   :  { %vm3652_vm13 = vmor %vm3650_vm12, %vm3651_vm7 }
0x28c8   :  { %v3647_v43 = vsub.f32 1.0, %v3646_v61 }
0x28ca   :  { %v3648_v46 = vmul.f32 %v4130_v39, %v3647_v43 }
0x28cc   :  { %v3649_v48 = vadd.f32 %v4130_v39, %v3648_v46 }
0x28ce   :  { %v3653_v57 = vsel %vm3652_vm13, %v4130_v39, %v3649_v48 }
0x28cf   :  { %v3658_v51 = vsel %vm3655_vm14, %v3657_v27, %v3653_v57 }
0x28d0   :  { %v3672_v12 = vsub.f32 1.0, %v3658_v51  ;;  %v3678_v20 = vmul.f32 %v3658_v51, %v5220_v49  ;;  %v3726_v49 = vsel %vm115_vm0, %v3724_v56, %v3703_v10  ;;  %vm5281_vm0 = vcmask 31744  }
0x28d1   :  { %v3728_v25 = vsel %vm209_vm4, %v3726_v49, %v3707_v23 }
0x28d2   :  { %v3730_v36 = vsel %vm170_vm3, %v3728_v25, %v3711_v17 }
0x290e   :  { %v3663_v33 = vpop.permute.xlu2 %3662 }
0x290f   :  { %v3665_v60 = vmul.f32 %v3663_v33, %v3658_v51 }
0x2911   :  { %3667 = vrot.lane.b32.xlu0 %v3665_v60, %s4216_s28 }
0x2983   :  { %v3668_v55 = vpop.permute.xlu0 %3667 }
0x2984   :  { %v3670_v16 = vadd.f32 %v3668_v55, %v3158_v37 }
0x2986   :  { %4131 = vtanh.f32 %v3670_v16 }
0x298c   :  { %v4132_v58 = vpop.eup %4131 }
0x298d   :  { %3674 = vrot.lane.b32.xlu1 %v4132_v58, %s4219_s0 }
0x29ff   :  { %v3675_v13 = vpop.permute.xlu1 %3674 }
0x2a00   :  { %v3677_v26 = vmul.f32 %v3675_v13, %v3672_v12 }
0x2a02   :  { %v3679_v21 = vadd.f32 %v3678_v20, %v3677_v26 }
0x2a04   :  { %v3689_v47 = vrot.slane %v3679_v21, 1  ;;  %v3714_v42 = vperm.slane %v3679_v21, 0 }
0x2a06   :  { %v3715_v31 = vperm.slane %v3689_v47, 0  ;;  %v3731_v32 = vsel %vm101_vm1, %v3729_v28, %v3714_v42 }
0x2a07   :  { %3736 = vrot.lane.b32.xlu2 %v3731_v32, %s4219_s0 }
0x2a08   :  { %v3732_v37 = vsel %vm101_vm1, %v3730_v36, %v3715_v31  ;;  %vm5282_vm1 = vmmov %vm5281_vm0 }
0x2a09   :  { %3738 = vrot.lane.b32.xlu0 %v3732_v37, %s4219_s0 }
0x2a61   :  { %v3737_v30 = vpop.permute.xlu2 %3736 }
0x2a62   :  { %3887 = vmatmul.msk.f32.vlgmr.msrb.gmra.mxu0 %vm1957_vm11, %v3737_v30 }
0x2a7b   :  { %v3739_v15 = vpop.permute.xlu0 %3738 }
0x2a7c   :  { %3888 = vmatmul.msk.f32.gmra.mxu0 %vm1957_vm11, %v3739_v15 }
0x2adf   :  { %v3761_v6 = vpop.f32.mrf.mxu0 }
0x2ae0   :  { %v3762_v39 = vadd.f32 %v3916_v14, %v3761_v6 }
0x2ae2   :  { %3767 = vst.msk [vmem:[%s5279_s4] sm:$0xff] %vm5281_vm0, %v3762_v39 }
0x2af9   :  { %v3764_v61 = vpop.f32.mrf.mxu0 }
0x2afa   :  { %v3765_v43 = vadd.f32 %v3916_v14, %v3764_v61 }
0x2afc   :  { %3768 = vst.msk [vmem:[%s5279_s4 + $0x8] sm:$0xff] %vm5282_vm1, %v3765_v43 }
0x2afd   :  { %4209 = dma.done.wait [#allocation4], 32  }
0x2afe   :  { %4210 = vsyncadd [#allocation4], 4294967264 }
0x2aff   :  { %3788 = vsyncpa [#allocation3], 1 }
0x2b00   :  { %3789 = vsyncpa [#allocation6], 1 }
0x2b01   :  { %3790 = vsyncpa [#allocation4], 1 }

</bundles_post_ra>
